<compile_context>
chip_gen: v5e
topology: v5e:2x2
jax: 0.10.0
libtpu: 0.0.40
codegen_flags: <defaults>
</compile_context>

<pallas_src>
import functools

import jax
import jax.numpy as jnp
import numpy as np
from jax import lax
from jax.experimental import pallas as pl
from jax.experimental.pallas import tpu as pltpu


def _round_up(x, m):
    return ((x + m - 1) // m) * m


# ---------------------------------------------------------------------------
# VMEM budgeting / row-block selection
# ---------------------------------------------------------------------------
def _vmem_budget_bytes():
    """Physical VMEM minus headroom (generation aware, safe fallback)."""
    phys = None
    try:
        info = pltpu.get_tpu_info()
        for attr in ("vmem_capacity_bytes", "vmem_size_bytes"):
            v = getattr(info, attr, None)
            if v:
                phys = int(v)
                break
    except Exception:
        phys = None
    if not phys:
        phys = 64 << 20  # conservative default: safe on every generation
    # Leave headroom for Mosaic internal scratch / pipeline slack:
    #   128 MiB parts (v5e/v6e) -> ~100 MiB, 64 MiB parts (v7x) -> ~50 MiB.
    return min((phys * 25) // 32, phys - (12 << 20))


def _step_vmem_bytes(TH, Wp, Cin_p, width_p, Cout_p):
    """Rough per-grid-step VMEM footprint of the kernel (bytes)."""
    bf16, f32 = 2, 4
    Wp2 = _round_up(Wp + 2, 8)
    M = TH * Wp
    est = 0
    est += TH * Wp * Cin_p * bf16 * 2                 # x row block (double buffer)
    est += 2 * Wp * Cin_p * bf16 * 2                  # halo rows (double buffer)
    est += TH * Wp * Cout_p * bf16 * 2                # bf16 out block (double buffer)
    est += (Cin_p * (width_p + Cout_p) + 9 * width_p * width_p
            + width_p * Cout_p) * bf16 * 2            # weights (worst case x2)
    est += 2 * (width_p + Cout_p) * f32               # biases
    est += (TH + 2) * Wp2 * width_p * bf16            # conv2 zero-pad scratch
    est += M * (width_p + Cout_p) * f32               # conv1 + downsample result
    est += M * width_p * f32                          # h1
    est += M * 9 * width_p * bf16                     # im2col patch
    est += M * width_p * f32                          # h2
    est += M * Cout_p * f32                           # h3 / residual add
    return est


def _fits(TH, Wp, Cin_p, width_p, Cout_p, budget):
    need = int(1.35 * _step_vmem_bytes(TH, Wp, Cin_p, width_p, Cout_p)) + (4 << 20)
    return need <= budget, need


def _pick_row_block(H, Wp, Cin_p, width_p, Cout_p, budget):
    """Largest divisor of H whose per-step block footprint fits the budget."""
    for TH in range(H, 0, -1):
        if H % TH:
            continue
        ok, _ = _fits(TH, Wp, Cin_p, width_p, Cout_p, budget)
        if ok:
            return TH
    return 1


# ---------------------------------------------------------------------------
# Pallas kernel: one (image, row-block) per grid step.
# ---------------------------------------------------------------------------
def _bottleneck_kernel(
    w_valid,     # static: number of valid (unpadded) image columns
    x_ref,       # (TH, Wp, Cin_p)          bf16  input row block
    top_ref,     # (Wp, Cin_p)              bf16  input row above the block (or 0)
    bot_ref,     # (Wp, Cin_p)              bf16  input row below the block (or 0)
    wcat_ref,    # (Cin_p, width_p+Cout_p)  bf16  [conv1 | downsample], BN folded
    w2_ref,      # (9*width_p, width_p)     bf16  conv2 im2col weights, BN folded
    w3_ref,      # (width_p, Cout_p)        bf16  conv3, BN folded
    bcat_ref,    # (1, width_p+Cout_p)      f32   [bn1 bias | bn_down bias]
    b2_ref,      # (1, width_p)             f32   bn2 bias
    b3_ref,      # (1, Cout_p)              f32   bn3 bias
    o_ref,       # (TH, Wp, Cout_p)         bf16  output block
    pad_ref,     # scratch (TH+2, Wp2, width_p) bf16  zero-padded conv2 input
):
    TH, Wp, Cin = x_ref.shape
    width = w2_ref.shape[1]
    Cout = w3_ref.shape[1]
    M = TH * Wp

    r = pl.program_id(1)
    last_r = pl.num_programs(1) - 1

    bcat = bcat_ref[...]                       # (1, width + Cout) f32
    b1 = bcat[:, :width]

    # ---- fused conv1 (1x1) + downsample (1x1): one MXU matmul ---------------
    xm = x_ref[...].reshape(M, Cin)                                  # bf16
    h = jnp.dot(xm, wcat_ref[...], preferred_element_type=jnp.float32) + bcat
    h1 = jnp.maximum(h[:, :width], 0.0)        # bn1 + relu  (M, width) f32
    # Stage the downsample branch in the (bf16) output block instead of
    # holding a live f32 (M, Cout) value across the 3x3 / 1x1 stages.
    o_ref[...] = h[:, width:].reshape(TH, Wp, Cout).astype(o_ref.dtype)

    # ---- stage conv2 input into the zero-padded scratch ---------------------
    pad_ref[1:TH + 1, 1:Wp + 1, :] = h1.reshape(TH, Wp, width).astype(pad_ref.dtype)

    # Halo rows: recompute conv1 for the neighbouring input row when it
    # exists; only write the zero row at the actual image border.
    @pl.when(r > 0)
    def _top_halo():
        hr = jnp.maximum(
            jnp.dot(top_ref[...], wcat_ref[:, :width],
                    preferred_element_type=jnp.float32) + b1, 0.0)
        pad_ref[0:1, 1:Wp + 1, :] = hr.reshape(1, Wp, width).astype(pad_ref.dtype)

    @pl.when(r == 0)
    def _top_zero():
        pad_ref[0:1, 1:Wp + 1, :] = jnp.zeros((1, Wp, width), pad_ref.dtype)

    @pl.when(r < last_r)
    def _bot_halo():
        hr = jnp.maximum(
            jnp.dot(bot_ref[...], wcat_ref[:, :width],
                    preferred_element_type=jnp.float32) + b1, 0.0)
        pad_ref[TH + 1:TH + 2, 1:Wp + 1, :] = hr.reshape(1, Wp, width).astype(
            pad_ref.dtype)

    @pl.when(r == last_r)
    def _bot_zero():
        pad_ref[TH + 1:TH + 2, 1:Wp + 1, :] = jnp.zeros((1, Wp, width),
                                                        pad_ref.dtype)

    # Zero-pad columns: the left border column plus everything right of the
    # last *valid* image column (real right border + W-alignment padding).
    # Re-written every step (tiny) so correctness never depends on how the
    # parallel grid dims map to cores (scratch is per-core).
    pad_ref[:, 0:1, :] = jnp.zeros((TH + 2, 1, width), pad_ref.dtype)
    ncols = pad_ref.shape[1] - (w_valid + 1)
    pad_ref[:, w_valid + 1:, :] = jnp.zeros((TH + 2, ncols, width), pad_ref.dtype)

    # ---- conv2 (3x3, pad=1) as ONE matmul with K = 9*width ------------------
    # TODO(synk): on v7x (MRB accumulation) benchmark 9 shifted accumulating
    # matmuls instead of materializing the (M, 9*width) im2col patch.
    taps = [pad_ref[ky:ky + TH, kx:kx + Wp, :]
            for ky in range(3) for kx in range(3)]
    patch = jnp.concatenate(taps, axis=-1).reshape(M, 9 * width)     # bf16
    h2 = jnp.maximum(
        jnp.dot(patch, w2_ref[...], preferred_element_type=jnp.float32)
        + b2_ref[...], 0.0)                                 # (M, width) f32

    # ---- conv3 (1x1) + bn3 + residual add + relu ----------------------------
    h3 = jnp.dot(h2.astype(w3_ref.dtype), w3_ref[...],
                 preferred_element_type=jnp.float32) + b3_ref[...]
    idn = o_ref[...].reshape(M, Cout).astype(jnp.float32)
    o_ref[...] = jnp.maximum(h3 + idn, 0.0).reshape(TH, Wp, Cout).astype(o_ref.dtype)


# ---------------------------------------------------------------------------
# Parameter preparation: fold BN scales into weights, pad channels to 128,
# concatenate conv1 + downsample, cast matmul operands to bf16.
# ---------------------------------------------------------------------------
def prepare_kernel_params(p):
    width, Cin = p["w1_oihw"].shape[:2]
    Cout = p["w3_oihw"].shape[0]
    Cin_p = _round_up(Cin, 128)
    width_p = _round_up(width, 128)
    Cout_p = _round_up(Cout, 128)

    def pad2(m, rows, cols):
        return jnp.pad(m, ((0, rows - m.shape[0]), (0, cols - m.shape[1])))

    def padv(v, n):
        return jnp.pad(v, (0, n - v.shape[0]))

    # 1x1 convs -> (Cin, Cout) matrices, BN scale folded into output columns.
    w1 = jnp.transpose(p["w1_oihw"][:, :, 0, 0], (1, 0)) * p["s1"][None, :]
    wd = jnp.transpose(p["wd_oihw"][:, :, 0, 0], (1, 0)) * p["sd"][None, :]
    w3 = jnp.transpose(p["w3_oihw"][:, :, 0, 0], (1, 0)) * p["s3"][None, :]
    # 3x3 conv -> HWIO, BN scale folded, padded, flattened for im2col matmul.
    # TODO(synk): for width=64 stages on v5e, consider padding conv2's K once
    # (9*64 -> 640) instead of per-tap to 9*128 to cut padded MXU work.
    w2 = jnp.transpose(p["w2_oihw"], (2, 3, 1, 0)) * p["s2"][None, None, None, :]

    w1 = pad2(w1, Cin_p, width_p)
    wd = pad2(wd, Cin_p, Cout_p)
    w3 = pad2(w3, width_p, Cout_p)
    w2 = jnp.pad(w2, ((0, 0), (0, 0),
                      (0, width_p - width), (0, width_p - width)))
    w2 = w2.reshape(9 * width_p, width_p)

    wcat = jnp.concatenate([w1, wd], axis=1).astype(jnp.bfloat16)
    bcat = jnp.concatenate([padv(p["b1"], width_p),
                            padv(p["bd"], Cout_p)]).reshape(1, -1)

    return dict(
        wcat=wcat,
        w2=w2.astype(jnp.bfloat16),
        w3=w3.astype(jnp.bfloat16),
        bcat=bcat.astype(jnp.float32),
        b2=padv(p["b2"], width_p).reshape(1, -1).astype(jnp.float32),
        b3=padv(p["b3"], Cout_p).reshape(1, -1).astype(jnp.float32),
        Cin=Cin, width=width, Cout=Cout,
        Cin_p=Cin_p, width_p=width_p, Cout_p=Cout_p,
    )


# ---------------------------------------------------------------------------
# Wrapper (NCHW in / NCHW out, like the PyTorch module; stride=1, groups=1)
# ---------------------------------------------------------------------------
def bottleneck_pallas(x_nchw, kp, row_block=None):
    N, Cin, H, W = x_nchw.shape
    assert Cin == kp["Cin"], "input channel count mismatch"
    Cin_p, width_p, Cout_p = kp["Cin_p"], kp["width_p"], kp["Cout_p"]

    Wp = _round_up(W, 8)            # sublane-aligned spatial width
    Wp2 = _round_up(Wp + 2, 8)      # conv2 pad-scratch width

    budget = _vmem_budget_bytes()
    TH = (_pick_row_block(H, Wp, Cin_p, width_p, Cout_p, budget)
          if row_block is None else row_block)
    assert H % TH == 0, "H must be divisible by the row block"
    R = H // TH
    _, need = _fits(TH, Wp, Cin_p, width_p, Cout_p, budget)
    vmem_limit = int(max(32 << 20, min(budget, need)))

    x = jnp.transpose(x_nchw, (0, 2, 3, 1))                      # NHWC
    x = jnp.pad(x, ((0, 0), (0, 0), (0, Wp - W), (0, Cin_p - Cin)))
    x = x.astype(jnp.bfloat16)

    # Tiny pre-sliced halo rows: top[n, r] = x[n, r*TH - 1] (zeros at r == 0),
    # bot[n, r] = x[n, (r+1)*TH] (zeros at r == R-1).  This keeps the main x
    # input row-blocked instead of resident as a full image in VMEM.
    zrow = jnp.zeros((N, 1, Wp, Cin_p), x.dtype)
    if R > 1:
        top = jnp.concatenate([zrow, x[:, TH - 1:H - 1:TH]], axis=1)
        bot = jnp.concatenate([x[:, TH:H:TH], zrow], axis=1)
    else:
        top = zrow
        bot = zrow

    kernel = functools.partial(_bottleneck_kernel, W)

    def build(single_buffer_weights):
        use_buffered = single_buffer_weights and hasattr(pl, "Buffered")

        def cspec(shape):
            zeros = (0,) * len(shape)
            if use_buffered:
                return pl.BlockSpec(shape, lambda n, r, _z=zeros: _z,
                                    pipeline_mode=pl.Buffered(1))
            return pl.BlockSpec(shape, lambda n, r, _z=zeros: _z)

        in_specs = [
            pl.BlockSpec((None, TH, Wp, Cin_p), lambda n, r: (n, r, 0, 0)),
            pl.BlockSpec((None, None, Wp, Cin_p), lambda n, r: (n, r, 0, 0)),
            pl.BlockSpec((None, None, Wp, Cin_p), lambda n, r: (n, r, 0, 0)),
            cspec(kp["wcat"].shape),
            cspec(kp["w2"].shape),
            cspec(kp["w3"].shape),
            cspec(kp["bcat"].shape),
            cspec(kp["b2"].shape),
            cspec(kp["b3"].shape),
        ]
        return pl.pallas_call(
            kernel,
            out_shape=jax.ShapeDtypeStruct((N, H, Wp, Cout_p), jnp.bfloat16),
            grid_spec=pltpu.PrefetchScalarGridSpec(
                num_scalar_prefetch=0,
                grid=(N, R),
                in_specs=in_specs,
                out_specs=pl.BlockSpec((None, TH, Wp, Cout_p),
                                       lambda n, r: (n, r, 0, 0)),
                scratch_shapes=[pltpu.VMEM((TH + 2, Wp2, width_p),
                                           jnp.bfloat16)],
            ),
            compiler_params=pltpu.CompilerParams(
                dimension_semantics=("parallel", "parallel"),
                vmem_limit_bytes=vmem_limit,
            ),
        )

    args = (x, top, bot, kp["wcat"], kp["w2"], kp["w3"],
            kp["bcat"], kp["b2"], kp["b3"])
    try:
        out = build(True)(*args)           # single-buffered constant weights
    except (pltpu.LoweringException, NotImplementedError, TypeError,
            ValueError):
        out = build(False)(*args)          # fallback: default double buffering

    out = out[:, :, :W, :kp["Cout"]]
    return jnp.transpose(out, (0, 3, 1, 2)).astype(x_nchw.dtype)


# ---------------------------------------------------------------------------
# Deterministic parameter construction (mirrors Bottleneck.__init__)
# ---------------------------------------------------------------------------
def make_params(key, in_planes, planes, base_width=64, groups=1, eps=1e-5):
    expansion = 4
    width = int(planes * (base_width / 64.0)) * groups
    cout = expansion * planes
    ks = jax.random.split(key, 8)

    w1_oihw = 0.1 * jax.random.normal(ks[0], (width, in_planes, 1, 1), jnp.float32)
    w2_oihw = 0.1 * jax.random.normal(ks[1], (width, width, 3, 3), jnp.float32)
    w3_oihw = 0.1 * jax.random.normal(ks[2], (cout, width, 1, 1), jnp.float32)
    wd_oihw = 0.1 * jax.random.normal(ks[3], (cout, in_planes, 1, 1), jnp.float32)

    def bn(k, c):
        k1, k2, k3, k4 = jax.random.split(k, 4)
        gamma = jax.random.uniform(k1, (c,), minval=0.5, maxval=1.5)
        beta = 0.1 * jax.random.normal(k2, (c,))
        mean = 0.1 * jax.random.normal(k3, (c,))
        var = jax.random.uniform(k4, (c,), minval=0.5, maxval=1.5)
        scale = gamma / jnp.sqrt(var + eps)
        bias = beta - mean * scale
        return (gamma, beta, mean, var), (scale, bias)

    bn1_raw, (s1, b1) = bn(ks[4], width)
    bn2_raw, (s2, b2) = bn(ks[5], width)
    bn3_raw, (s3, b3) = bn(ks[6], cout)
    bnd_raw, (sd, bd) = bn(ks[7], cout)

    return dict(
        w1_oihw=w1_oihw, w2_oihw=w2_oihw, w3_oihw=w3_oihw, wd_oihw=wd_oihw,
        bn1=bn1_raw, bn2=bn2_raw, bn3=bn3_raw, bnd=bnd_raw,
        s1=s1, b1=b1, s2=s2, b2=b2, s3=s3, b3=b3, sd=sd, bd=bd,
        eps=eps,
    )


# ---------------------------------------------------------------------------
# Pure-JAX f32 reference (mirrors the PyTorch forward, eval-mode BN)
# ---------------------------------------------------------------------------
def bottleneck_ref(x, p):
    eps = p["eps"]

    def conv(x, w, stride=1, pad=0):
        return lax.conv_general_dilated(
            x, w, (stride, stride), [(pad, pad), (pad, pad)],
            dimension_numbers=("NCHW", "OIHW", "NCHW"))

    def bn(x, raw):
        gamma, beta, mean, var = raw
        inv = gamma / jnp.sqrt(var + eps)
        return x * inv[None, :, None, None] + (beta - mean * inv)[None, :, None, None]

    out = jax.nn.relu(bn(conv(x, p["w1_oihw"]), p["bn1"]))
    out = jax.nn.relu(bn(conv(out, p["w2_oihw"], pad=1), p["bn2"]))
    out = bn(conv(out, p["w3_oihw"]), p["bn3"])
    identity = bn(conv(x, p["wd_oihw"]), p["bnd"])
    return jax.nn.relu(out + identity)


# ---------------------------------------------------------------------------
if __name__ == "__main__":
    # batch=2, in_planes=8, planes=4 -> width=4, out channels=16 (downsample
    # branch exercised); H=W=16.
    N, Cin, H, W = 2, 8, 16, 16
    planes = 4

    key = jax.random.PRNGKey(0)
    kx_key, kp_key = jax.random.split(key)
    x = jax.random.normal(kx_key, (N, Cin, H, W), jnp.float32)
    params = make_params(kp_key, Cin, planes)
    kparams = prepare_kernel_params(params)

    ref = jax.block_until_ready(bottleneck_ref(x, params))

    # Auto row block: the VMEM budget picks TH == H here (no halo path).
    out = jax.block_until_ready(bottleneck_pallas(x, kparams))
    # bf16 matmul operands / bf16 output (f32 accumulation) -> ~1e-2 rel err.
    np.testing.assert_allclose(np.asarray(out), np.asarray(ref),
                               rtol=4e-2, atol=4e-2)

    # Forced smaller row block: exercises the halo-recompute path (R=2).
    out2 = jax.block_until_ready(bottleneck_pallas(x, kparams, row_block=8))
    np.testing.assert_allclose(np.asarray(out2), np.asarray(ref),
                               rtol=4e-2, atol=4e-2)

    # TODO(synk): stride != 1, groups != 1, dilation != 1 Bottleneck variants
    # and train-mode BatchNorm are not implemented (default config is
    # stride=1, groups=1, dilation=1, eval-mode BN).
    print("KERNEL_OK")
</pallas_src>

<mosaic_0001>
module attributes {stable_mosaic.version = 11 : i64} {
  func.func @_bottleneck_kernel(%arg0: i32, %arg1: i32, %arg2: memref<1x16x16x128xbf16, #tpu.memory_space<vmem>>, %arg3: memref<1x1x16x128xbf16, #tpu.memory_space<vmem>>, %arg4: memref<1x1x16x128xbf16, #tpu.memory_space<vmem>>, %arg5: memref<128x256xbf16, #tpu.memory_space<vmem>>, %arg6: memref<1152x128xbf16, #tpu.memory_space<vmem>>, %arg7: memref<128x128xbf16, #tpu.memory_space<vmem>>, %arg8: memref<1x256xf32, #tpu.memory_space<vmem>>, %arg9: memref<1x128xf32, #tpu.memory_space<vmem>>, %arg10: memref<1x128xf32, #tpu.memory_space<vmem>>, %arg11: memref<1x16x16x128xbf16, #tpu.memory_space<vmem>>, %arg12: memref<18x24x128xbf16, #tpu.memory_space<vmem>>) attributes {dimension_semantics = [#tpu.dimension_semantics<parallel>, #tpu.dimension_semantics<parallel>], iteration_bounds = array<i64: 2, 1>, scalar_prefetch = 0 : i64, scratch_operands = 1 : i64, tpu.core_type = #tpu.core_type<tc>, window_params = [{transform_indices = @transform_0, window_bounds = array<i64: 1, 16, 16, 128>}, {transform_indices = @transform_1, window_bounds = array<i64: 1, 1, 16, 128>}, {transform_indices = @transform_2, window_bounds = array<i64: 1, 1, 16, 128>}, {pipeline_mode = #tpu.pipeline_mode<synchronous>, transform_indices = @transform_3, window_bounds = array<i64: 128, 256>}, {pipeline_mode = #tpu.pipeline_mode<synchronous>, transform_indices = @transform_4, window_bounds = array<i64: 1152, 128>}, {pipeline_mode = #tpu.pipeline_mode<synchronous>, transform_indices = @transform_5, window_bounds = array<i64: 128, 128>}, {pipeline_mode = #tpu.pipeline_mode<synchronous>, transform_indices = @transform_6, window_bounds = array<i64: 1, 256>}, {pipeline_mode = #tpu.pipeline_mode<synchronous>, transform_indices = @transform_7, window_bounds = array<i64: 1, 128>}, {pipeline_mode = #tpu.pipeline_mode<synchronous>, transform_indices = @transform_8, window_bounds = array<i64: 1, 128>}, {transform_indices = @transform_9, window_bounds = array<i64: 1, 16, 16, 128>}]} {
    %c0 = arith.constant 0 : index
    %c0_0 = arith.constant 0 : index
    %0 = vector.load %arg8[%c0, %c0_0] : memref<1x256xf32, #tpu.memory_space<vmem>>, vector<1x256xf32>
    %1 = vector.extract_strided_slice %0 {offsets = [0, 0], sizes = [1, 128], strides = [1, 1]} : vector<1x256xf32> to vector<1x128xf32>
    %c0_1 = arith.constant 0 : index
    %c0_2 = arith.constant 0 : index
    %c0_3 = arith.constant 0 : index
    %c0_4 = arith.constant 0 : index
    %2 = vector.load %arg2[%c0_1, %c0_2, %c0_3, %c0_4] : memref<1x16x16x128xbf16, #tpu.memory_space<vmem>>, vector<1x16x16x128xbf16>
    %3 = vector.shape_cast %2 : vector<1x16x16x128xbf16> to vector<16x16x128xbf16>
    %4 = vector.shape_cast %3 : vector<16x16x128xbf16> to vector<256x128xbf16>
    %c0_5 = arith.constant 0 : index
    %c0_6 = arith.constant 0 : index
    %5 = vector.load %arg5[%c0_5, %c0_6] : memref<128x256xbf16, #tpu.memory_space<vmem>>, vector<128x256xbf16>
    %cst = arith.constant dense<0.000000e+00> : vector<256x256xf32>
    %6 = tpu.matmul %4, %5, %cst {dimension_numbers = #tpu.dot_dimension_numbers<[1], [0], [0], [1], [0, 0, 1, 1], [], []>} : vector<256x128xbf16>, vector<128x256xbf16>, vector<256x256xf32> -> vector<256x256xf32>
    %7 = vector.broadcast %0 : vector<1x256xf32> to vector<256x256xf32>
    %8 = arith.addf %6, %7 : vector<256x256xf32>
    %9 = vector.extract_strided_slice %8 {offsets = [0, 0], sizes = [256, 128], strides = [1, 1]} : vector<256x256xf32> to vector<256x128xf32>
    %cst_7 = arith.constant 0.000000e+00 : f32
    %10 = vector.broadcast %cst_7 : f32 to vector<256x128xf32>
    %11 = arith.maximumf %9, %10 : vector<256x128xf32>
    %12 = vector.extract_strided_slice %8 {offsets = [0, 128], sizes = [256, 128], strides = [1, 1]} : vector<256x256xf32> to vector<256x128xf32>
    %13 = vector.shape_cast %12 : vector<256x128xf32> to vector<16x16x128xf32>
    %14 = arith.truncf %13 : vector<16x16x128xf32> to vector<16x16x128xbf16>
    %c0_8 = arith.constant 0 : index
    %c0_9 = arith.constant 0 : index
    %c0_10 = arith.constant 0 : index
    %c0_11 = arith.constant 0 : index
    %15 = vector.load %arg11[%c0_8, %c0_9, %c0_10, %c0_11] : memref<1x16x16x128xbf16, #tpu.memory_space<vmem>>, vector<1x16x16x128xbf16>
    %16 = vector.shape_cast %15 : vector<1x16x16x128xbf16> to vector<16x16x128xbf16>
    %17 = vector.shape_cast %14 : vector<16x16x128xbf16> to vector<1x16x16x128xbf16>
    tpu.vector_store %arg11[%c0_8, %c0_9, %c0_10, %c0_11], %17 {strides = array<i32>} : memref<1x16x16x128xbf16, #tpu.memory_space<vmem>>, vector<1x16x16x128xbf16>,
    %18 = vector.shape_cast %11 : vector<256x128xf32> to vector<16x16x128xf32>
    %19 = arith.truncf %18 : vector<16x16x128xf32> to vector<16x16x128xbf16>
    %c1 = arith.constant 1 : index
    %c1_12 = arith.constant 1 : index
    %c0_13 = arith.constant 0 : index
    %20 = vector.load %arg12[%c1, %c1_12, %c0_13] : memref<18x24x128xbf16, #tpu.memory_space<vmem>>, vector<16x16x128xbf16>
    tpu.vector_store %arg12[%c1, %c1_12, %c0_13], %19 {strides = array<i32>} : memref<18x24x128xbf16, #tpu.memory_space<vmem>>, vector<16x16x128xbf16>,
    %c0_i32 = arith.constant 0 : i32
    %21 = arith.cmpi sgt, %arg1, %c0_i32 : i32
    %22 = arith.extui %21 : i1 to i32
    %c0_i32_14 = arith.constant 0 : i32
    %23 = arith.cmpi ne, %22, %c0_i32_14 : i32
    scf.if %23 {
      %c0_74 = arith.constant 0 : index
      %c0_75 = arith.constant 0 : index
      %c0_76 = arith.constant 0 : index
      %c0_77 = arith.constant 0 : index
      %73 = vector.load %arg3[%c0_74, %c0_75, %c0_76, %c0_77] : memref<1x1x16x128xbf16, #tpu.memory_space<vmem>>, vector<1x1x16x128xbf16>
      %74 = vector.shape_cast %73 : vector<1x1x16x128xbf16> to vector<16x128xbf16>
      %c0_78 = arith.constant 0 : index
      %c0_79 = arith.constant 0 : index
      %75 = vector.load %arg5[%c0_78, %c0_79] : memref<128x256xbf16, #tpu.memory_space<vmem>>, vector<128x128xbf16>
      %cst_80 = arith.constant dense<0.000000e+00> : vector<16x128xf32>
      %76 = tpu.matmul %74, %75, %cst_80 {dimension_numbers = #tpu.dot_dimension_numbers<[1], [0], [0], [1], [0, 0, 1, 1], [], []>} : vector<16x128xbf16>, vector<128x128xbf16>, vector<16x128xf32> -> vector<16x128xf32>
      %77 = vector.broadcast %1 : vector<1x128xf32> to vector<16x128xf32>
      %78 = arith.addf %76, %77 : vector<16x128xf32>
      %cst_81 = arith.constant 0.000000e+00 : f32
      %79 = vector.broadcast %cst_81 : f32 to vector<16x128xf32>
      %80 = arith.maximumf %78, %79 : vector<16x128xf32>
      %81 = vector.shape_cast %80 : vector<16x128xf32> to vector<1x16x128xf32>
      %82 = arith.truncf %81 : vector<1x16x128xf32> to vector<1x16x128xbf16>
      %c0_82 = arith.constant 0 : index
      %c1_83 = arith.constant 1 : index
      %c0_84 = arith.constant 0 : index
      %83 = vector.load %arg12[%c0_82, %c1_83, %c0_84] : memref<18x24x128xbf16, #tpu.memory_space<vmem>>, vector<1x16x128xbf16>
      tpu.vector_store %arg12[%c0_82, %c1_83, %c0_84], %82 {strides = array<i32>} : memref<18x24x128xbf16, #tpu.memory_space<vmem>>, vector<1x16x128xbf16>,
    } else {
    }
    %c0_i32_15 = arith.constant 0 : i32
    %24 = arith.cmpi eq, %arg1, %c0_i32_15 : i32
    %25 = arith.extui %24 : i1 to i32
    %c0_i32_16 = arith.constant 0 : i32
    %26 = arith.cmpi ne, %25, %c0_i32_16 : i32
    scf.if %26 {
      %cst_74 = arith.constant 0.000000e+00 : bf16
      %73 = vector.broadcast %cst_74 : bf16 to vector<1x16x128xbf16>
      %c0_75 = arith.constant 0 : index
      %c1_76 = arith.constant 1 : index
      %c0_77 = arith.constant 0 : index
      %74 = vector.load %arg12[%c0_75, %c1_76, %c0_77] : memref<18x24x128xbf16, #tpu.memory_space<vmem>>, vector<1x16x128xbf16>
      tpu.vector_store %arg12[%c0_75, %c1_76, %c0_77], %73 {strides = array<i32>} : memref<18x24x128xbf16, #tpu.memory_space<vmem>>, vector<1x16x128xbf16>,
    } else {
    }
    %c0_i32_17 = arith.constant 0 : i32
    %27 = arith.cmpi slt, %arg1, %c0_i32_17 : i32
    %28 = arith.extui %27 : i1 to i32
    %c0_i32_18 = arith.constant 0 : i32
    %29 = arith.cmpi ne, %28, %c0_i32_18 : i32
    scf.if %29 {
      %c0_74 = arith.constant 0 : index
      %c0_75 = arith.constant 0 : index
      %c0_76 = arith.constant 0 : index
      %c0_77 = arith.constant 0 : index
      %73 = vector.load %arg4[%c0_74, %c0_75, %c0_76, %c0_77] : memref<1x1x16x128xbf16, #tpu.memory_space<vmem>>, vector<1x1x16x128xbf16>
      %74 = vector.shape_cast %73 : vector<1x1x16x128xbf16> to vector<16x128xbf16>
      %c0_78 = arith.constant 0 : index
      %c0_79 = arith.constant 0 : index
      %75 = vector.load %arg5[%c0_78, %c0_79] : memref<128x256xbf16, #tpu.memory_space<vmem>>, vector<128x128xbf16>
      %cst_80 = arith.constant dense<0.000000e+00> : vector<16x128xf32>
      %76 = tpu.matmul %74, %75, %cst_80 {dimension_numbers = #tpu.dot_dimension_numbers<[1], [0], [0], [1], [0, 0, 1, 1], [], []>} : vector<16x128xbf16>, vector<128x128xbf16>, vector<16x128xf32> -> vector<16x128xf32>
      %77 = vector.broadcast %1 : vector<1x128xf32> to vector<16x128xf32>
      %78 = arith.addf %76, %77 : vector<16x128xf32>
      %cst_81 = arith.constant 0.000000e+00 : f32
      %79 = vector.broadcast %cst_81 : f32 to vector<16x128xf32>
      %80 = arith.maximumf %78, %79 : vector<16x128xf32>
      %81 = vector.shape_cast %80 : vector<16x128xf32> to vector<1x16x128xf32>
      %82 = arith.truncf %81 : vector<1x16x128xf32> to vector<1x16x128xbf16>
      %c17_82 = arith.constant 17 : index
      %c1_83 = arith.constant 1 : index
      %c0_84 = arith.constant 0 : index
      %83 = vector.load %arg12[%c17_82, %c1_83, %c0_84] : memref<18x24x128xbf16, #tpu.memory_space<vmem>>, vector<1x16x128xbf16>
      tpu.vector_store %arg12[%c17_82, %c1_83, %c0_84], %82 {strides = array<i32>} : memref<18x24x128xbf16, #tpu.memory_space<vmem>>, vector<1x16x128xbf16>,
    } else {
    }
    %c0_i32_19 = arith.constant 0 : i32
    %30 = arith.cmpi eq, %arg1, %c0_i32_19 : i32
    %31 = arith.extui %30 : i1 to i32
    %c0_i32_20 = arith.constant 0 : i32
    %32 = arith.cmpi ne, %31, %c0_i32_20 : i32
    scf.if %32 {
      %cst_74 = arith.constant 0.000000e+00 : bf16
      %73 = vector.broadcast %cst_74 : bf16 to vector<1x16x128xbf16>
      %c17_75 = arith.constant 17 : index
      %c1_76 = arith.constant 1 : index
      %c0_77 = arith.constant 0 : index
      %74 = vector.load %arg12[%c17_75, %c1_76, %c0_77] : memref<18x24x128xbf16, #tpu.memory_space<vmem>>, vector<1x16x128xbf16>
      tpu.vector_store %arg12[%c17_75, %c1_76, %c0_77], %73 {strides = array<i32>} : memref<18x24x128xbf16, #tpu.memory_space<vmem>>, vector<1x16x128xbf16>,
    } else {
    }
    %cst_21 = arith.constant 0.000000e+00 : bf16
    %33 = vector.broadcast %cst_21 : bf16 to vector<18x1x128xbf16>
    %c0_22 = arith.constant 0 : index
    %c0_23 = arith.constant 0 : index
    %c0_24 = arith.constant 0 : index
    %34 = vector.load %arg12[%c0_22, %c0_23, %c0_24] : memref<18x24x128xbf16, #tpu.memory_space<vmem>>, vector<18x1x128xbf16>
    tpu.vector_store %arg12[%c0_22, %c0_23, %c0_24], %33 {strides = array<i32>} : memref<18x24x128xbf16, #tpu.memory_space<vmem>>, vector<18x1x128xbf16>,
    %cst_25 = arith.constant 0.000000e+00 : bf16
    %35 = vector.broadcast %cst_25 : bf16 to vector<18x7x128xbf16>
    %c0_26 = arith.constant 0 : index
    %c17 = arith.constant 17 : index
    %c0_27 = arith.constant 0 : index
    %36 = vector.load %arg12[%c0_26, %c17, %c0_27] : memref<18x24x128xbf16, #tpu.memory_space<vmem>>, vector<18x7x128xbf16>
    tpu.vector_store %arg12[%c0_26, %c17, %c0_27], %35 {strides = array<i32>} : memref<18x24x128xbf16, #tpu.memory_space<vmem>>, vector<18x7x128xbf16>,
    %c0_28 = arith.constant 0 : index
    %c0_29 = arith.constant 0 : index
    %c0_30 = arith.constant 0 : index
    %37 = vector.load %arg12[%c0_28, %c0_29, %c0_30] : memref<18x24x128xbf16, #tpu.memory_space<vmem>>, vector<16x16x128xbf16>
    %c0_31 = arith.constant 0 : index
    %c1_32 = arith.constant 1 : index
    %c0_33 = arith.constant 0 : index
    %38 = vector.load %arg12[%c0_31, %c1_32, %c0_33] : memref<18x24x128xbf16, #tpu.memory_space<vmem>>, vector<16x16x128xbf16>
    %c0_34 = arith.constant 0 : index
    %c2 = arith.constant 2 : index
    %c0_35 = arith.constant 0 : index
    %39 = vector.load %arg12[%c0_34, %c2, %c0_35] : memref<18x24x128xbf16, #tpu.memory_space<vmem>>, vector<16x16x128xbf16>
    %c1_36 = arith.constant 1 : index
    %c0_37 = arith.constant 0 : index
    %c0_38 = arith.constant 0 : index
    %40 = vector.load %arg12[%c1_36, %c0_37, %c0_38] : memref<18x24x128xbf16, #tpu.memory_space<vmem>>, vector<16x16x128xbf16>
    %c1_39 = arith.constant 1 : index
    %c1_40 = arith.constant 1 : index
    %c0_41 = arith.constant 0 : index
    %41 = vector.load %arg12[%c1_39, %c1_40, %c0_41] : memref<18x24x128xbf16, #tpu.memory_space<vmem>>, vector<16x16x128xbf16>
    %c1_42 = arith.constant 1 : index
    %c2_43 = arith.constant 2 : index
    %c0_44 = arith.constant 0 : index
    %42 = vector.load %arg12[%c1_42, %c2_43, %c0_44] : memref<18x24x128xbf16, #tpu.memory_space<vmem>>, vector<16x16x128xbf16>
    %c2_45 = arith.constant 2 : index
    %c0_46 = arith.constant 0 : index
    %c0_47 = arith.constant 0 : index
    %43 = vector.load %arg12[%c2_45, %c0_46, %c0_47] : memref<18x24x128xbf16, #tpu.memory_space<vmem>>, vector<16x16x128xbf16>
    %c2_48 = arith.constant 2 : index
    %c1_49 = arith.constant 1 : index
    %c0_50 = arith.constant 0 : index
    %44 = vector.load %arg12[%c2_48, %c1_49, %c0_50] : memref<18x24x128xbf16, #tpu.memory_space<vmem>>, vector<16x16x128xbf16>
    %c2_51 = arith.constant 2 : index
    %c2_52 = arith.constant 2 : index
    %c0_53 = arith.constant 0 : index
    %45 = vector.load %arg12[%c2_51, %c2_52, %c0_53] : memref<18x24x128xbf16, #tpu.memory_space<vmem>>, vector<16x16x128xbf16>
    %46 = tpu.concatenate %37, %38, %39, %40, %41, %42, %43, %44, %45 in 2 : vector<16x16x128xbf16>, vector<16x16x128xbf16>, vector<16x16x128xbf16>, vector<16x16x128xbf16>, vector<16x16x128xbf16>, vector<16x16x128xbf16>, vector<16x16x128xbf16>, vector<16x16x128xbf16>, vector<16x16x128xbf16> -> vector<16x16x1152xbf16>
    %47 = vector.shape_cast %46 : vector<16x16x1152xbf16> to vector<256x1152xbf16>
    %c0_54 = arith.constant 0 : index
    %c0_55 = arith.constant 0 : index
    %48 = vector.load %arg6[%c0_54, %c0_55] : memref<1152x128xbf16, #tpu.memory_space<vmem>>, vector<1152x128xbf16>
    %cst_56 = arith.constant dense<0.000000e+00> : vector<256x128xf32>
    %49 = tpu.matmul %47, %48, %cst_56 {dimension_numbers = #tpu.dot_dimension_numbers<[1], [0], [0], [1], [0, 0, 1, 1], [], []>} : vector<256x1152xbf16>, vector<1152x128xbf16>, vector<256x128xf32> -> vector<256x128xf32>
    %c0_57 = arith.constant 0 : index
    %c0_58 = arith.constant 0 : index
    %50 = vector.load %arg9[%c0_57, %c0_58] : memref<1x128xf32, #tpu.memory_space<vmem>>, vector<1x128xf32>
    %51 = vector.broadcast %50 : vector<1x128xf32> to vector<256x128xf32>
    %52 = arith.addf %49, %51 : vector<256x128xf32>
    %cst_59 = arith.constant 0.000000e+00 : f32
    %53 = vector.broadcast %cst_59 : f32 to vector<256x128xf32>
    %54 = arith.maximumf %52, %53 : vector<256x128xf32>
    %55 = arith.truncf %54 : vector<256x128xf32> to vector<256x128xbf16>
    %c0_60 = arith.constant 0 : index
    %c0_61 = arith.constant 0 : index
    %56 = vector.load %arg7[%c0_60, %c0_61] : memref<128x128xbf16, #tpu.memory_space<vmem>>, vector<128x128xbf16>
    %cst_62 = arith.constant dense<0.000000e+00> : vector<256x128xf32>
    %57 = tpu.matmul %55, %56, %cst_62 {dimension_numbers = #tpu.dot_dimension_numbers<[1], [0], [0], [1], [0, 0, 1, 1], [], []>} : vector<256x128xbf16>, vector<128x128xbf16>, vector<256x128xf32> -> vector<256x128xf32>
    %c0_63 = arith.constant 0 : index
    %c0_64 = arith.constant 0 : index
    %58 = vector.load %arg10[%c0_63, %c0_64] : memref<1x128xf32, #tpu.memory_space<vmem>>, vector<1x128xf32>
    %59 = vector.broadcast %58 : vector<1x128xf32> to vector<256x128xf32>
    %60 = arith.addf %57, %59 : vector<256x128xf32>
    %c0_65 = arith.constant 0 : index
    %c0_66 = arith.constant 0 : index
    %c0_67 = arith.constant 0 : index
    %c0_68 = arith.constant 0 : index
    %61 = vector.load %arg11[%c0_65, %c0_66, %c0_67, %c0_68] : memref<1x16x16x128xbf16, #tpu.memory_space<vmem>>, vector<1x16x16x128xbf16>
    %62 = vector.shape_cast %61 : vector<1x16x16x128xbf16> to vector<16x16x128xbf16>
    %63 = vector.shape_cast %62 : vector<16x16x128xbf16> to vector<256x128xbf16>
    %64 = arith.extf %63 : vector<256x128xbf16> to vector<256x128xf32>
    %65 = arith.addf %60, %64 : vector<256x128xf32>
    %cst_69 = arith.constant 0.000000e+00 : f32
    %66 = vector.broadcast %cst_69 : f32 to vector<256x128xf32>
    %67 = arith.maximumf %65, %66 : vector<256x128xf32>
    %68 = vector.shape_cast %67 : vector<256x128xf32> to vector<16x16x128xf32>
    %69 = arith.truncf %68 : vector<16x16x128xf32> to vector<16x16x128xbf16>
    %c0_70 = arith.constant 0 : index
    %c0_71 = arith.constant 0 : index
    %c0_72 = arith.constant 0 : index
    %c0_73 = arith.constant 0 : index
    %70 = vector.load %arg11[%c0_70, %c0_71, %c0_72, %c0_73] : memref<1x16x16x128xbf16, #tpu.memory_space<vmem>>, vector<1x16x16x128xbf16>
    %71 = vector.shape_cast %70 : vector<1x16x16x128xbf16> to vector<16x16x128xbf16>
    %72 = vector.shape_cast %69 : vector<16x16x128xbf16> to vector<1x16x16x128xbf16>
    tpu.vector_store %arg11[%c0_70, %c0_71, %c0_72, %c0_73], %72 {strides = array<i32>} : memref<1x16x16x128xbf16, #tpu.memory_space<vmem>>, vector<1x16x16x128xbf16>,
    return
  }
  func.func @transform_0(%arg0: i32, %arg1: i32) -> (i32, i32, i32, i32) {
    %c0_i32 = arith.constant 0 : i32
    %c0_i32_0 = arith.constant 0 : i32
    %c0_i32_1 = arith.constant 0 : i32
    return %arg0, %arg1, %c0_i32, %c0_i32_0 : i32, i32, i32, i32
  }
  func.func @transform_1(%arg0: i32, %arg1: i32) -> (i32, i32, i32, i32) {
    %c0_i32 = arith.constant 0 : i32
    %c0_i32_0 = arith.constant 0 : i32
    %c0_i32_1 = arith.constant 0 : i32
    return %arg0, %arg1, %c0_i32, %c0_i32_0 : i32, i32, i32, i32
  }
  func.func @transform_2(%arg0: i32, %arg1: i32) -> (i32, i32, i32, i32) {
    %c0_i32 = arith.constant 0 : i32
    %c0_i32_0 = arith.constant 0 : i32
    %c0_i32_1 = arith.constant 0 : i32
    return %arg0, %arg1, %c0_i32, %c0_i32_0 : i32, i32, i32, i32
  }
  func.func @transform_3(%arg0: i32, %arg1: i32) -> (i32, i32) {
    %c0_i32 = arith.constant 0 : i32
    %c0_i32_0 = arith.constant 0 : i32
    %c0_i32_1 = arith.constant 0 : i32
    return %c0_i32, %c0_i32_0 : i32, i32
  }
  func.func @transform_4(%arg0: i32, %arg1: i32) -> (i32, i32) {
    %c0_i32 = arith.constant 0 : i32
    %c0_i32_0 = arith.constant 0 : i32
    %c0_i32_1 = arith.constant 0 : i32
    return %c0_i32, %c0_i32_0 : i32, i32
  }
  func.func @transform_5(%arg0: i32, %arg1: i32) -> (i32, i32) {
    %c0_i32 = arith.constant 0 : i32
    %c0_i32_0 = arith.constant 0 : i32
    %c0_i32_1 = arith.constant 0 : i32
    return %c0_i32, %c0_i32_0 : i32, i32
  }
  func.func @transform_6(%arg0: i32, %arg1: i32) -> (i32, i32) {
    %c0_i32 = arith.constant 0 : i32
    %c0_i32_0 = arith.constant 0 : i32
    %c0_i32_1 = arith.constant 0 : i32
    return %c0_i32, %c0_i32_0 : i32, i32
  }
  func.func @transform_7(%arg0: i32, %arg1: i32) -> (i32, i32) {
    %c0_i32 = arith.constant 0 : i32
    %c0_i32_0 = arith.constant 0 : i32
    %c0_i32_1 = arith.constant 0 : i32
    return %c0_i32, %c0_i32_0 : i32, i32
  }
  func.func @transform_8(%arg0: i32, %arg1: i32) -> (i32, i32) {
    %c0_i32 = arith.constant 0 : i32
    %c0_i32_0 = arith.constant 0 : i32
    %c0_i32_1 = arith.constant 0 : i32
    return %c0_i32, %c0_i32_0 : i32, i32
  }
  func.func @transform_9(%arg0: i32, %arg1: i32) -> (i32, i32, i32, i32) {
    %c0_i32 = arith.constant 0 : i32
    %c0_i32_0 = arith.constant 0 : i32
    %c0_i32_1 = arith.constant 0 : i32
    return %arg0, %arg1, %c0_i32, %c0_i32_0 : i32, i32, i32, i32
  }
}

</mosaic_0001>

<bundles_post_ra>
// kernel: tpu_custom_call.1
= control target key start
LH: loop header
LB: loop body
LE: loop exit
PB: predicated region body
PF: predicated region fallthrough
CT: control target
= control target key end

     0   :  { %s8574_s0 = inlined_call_operand.hbm [shape: bf16[2,16,16,128], index: 0, kind: input, shape index: {}]   ;;  %s8575_s1 = inlined_call_operand.hbm [shape: bf16[2,1,16,128], index: 1, kind: input, shape index: {}]   ;;  %s8576_s2 = inlined_call_operand.hbm [shape: bf16[2,1,16,128], index: 2, kind: input, shape index: {}]   ;;  %s8577_s3 = inlined_call_operand.hbm [shape: bf16[128,256], index: 3, kind: input, shape index: {}]   ;;  %s8578_s4 = inlined_call_operand.hbm [shape: bf16[1152,128], index: 4, kind: input, shape index: {}]   ;;  %s8579_s5 = inlined_call_operand.hbm [shape: bf16[128,128], index: 5, kind: input, shape index: {}]   ;;  %s8580_s6 = inlined_call_operand.vmem [shape: f32[1,256], index: 6, kind: input, shape index: {}]   ;;  %s8581_s7 = inlined_call_operand.vmem [shape: f32[1,128], index: 7, kind: input, shape index: {}]   ;;  %s8582_s8 = inlined_call_operand.vmem [shape: f32[1,128], index: 8, kind: input, shape index: {}]   ;;  %s8583_s9 = inlined_call_operand.hbm [shape: bf16[2,16,16,128], index: 9, kind: output, shape index: {}]  }
   0x1   :  { %8604 = sst [smem:[#allocation45_spill]] %s8575_s1 }
   0x2   :  { %8605 = sst [smem:[#allocation46_spill]] %s8576_s2 }
   0x3   :  { %8606 = sst [smem:[#allocation47_spill]] %s8577_s3 }
   0x4   :  { %8607 = sst [smem:[#allocation48_spill]] %s8583_s9 }
   0x5   :  { %14 = vsyncpa [#allocation4], 0 }
   0x6   :  { %16 = vsyncpa [#allocation4 + $0x1], 0 }
   0x7   :  { %17 = vsyncpa [#allocation7], 0 }
   0x8   :  { %19 = vsyncpa [#allocation7 + $0x1], 0 }
   0x9   :  { %20 = vsyncpa [#allocation10], 0 }
   0xa   :  { %21 = vsyncpa [#allocation13], 0 }
   0xb   :  { %22 = vsyncpa [#allocation5], 0 }
   0xc   :  { %24 = vsyncpa [#allocation5 + $0x1], 0  ;;  %s7077_s30 = smov 0   ;;  %s7079_s10 = smov 0  }
   0xd   :  { %s7081_s11 = smov 0   ;;  %s7083_s12 = smov 0  }
   0xe   :  { %s7085_s13 = smov 0   ;;  %s7087_s14 = smov 0  }
   0xf LB: > { %8608 = sst [smem:[#allocation20_spill]] %s6995_s30  ;;  %s7108_s15 = sadd.s32 4294967295, %s7015_s14   ;;  %s7015_s14 = sphi %s7087_s14, %s30_s14   ;;  %s7011_s13 = sphi %s7085_s13, %s8696_s13   ;;  %s7007_s12 = sphi %s7083_s12, %s8695_s12   ;;  %s7003_s11 = sphi %s7081_s11, %s8691_s11   ;;  %s6999_s10 = sphi %s7079_s10, %s8694_s10   ;;  %s6995_s30 = sphi %s7077_s30, %s8693_s30  }
  0x10   : > { %8609 = sst [smem:[#allocation21_spill]] %s7003_s11  ;;  %s5414_s16 = sadd.s32 4294967294, %s7015_s14  }
  0x11   : > { %8610 = sst [smem:[#allocation22_spill]] %s7007_s12  ;;  %p64_p0 = scmp.ne.s32.totalorder %s6999_s10, %s6995_s30 }
  0x12   : > { %8611 = sst [smem:[#allocation23_spill]] %s7015_s14  ;;  %p65_p1 = scmp.eq.s32.totalorder %s7108_s15, 0 }
  0x13   : > { %p272_p2 = scmp.eq.s32.totalorder %s7108_s15, 1  ;;  %p278_p3 = scmp.eq.s32.totalorder %s5414_s16, 1 }
  0x14   : > { %p7117_p4 = por %p65_p1, %p64_p0  ;;  %p5415_p5 = scmp.ge.s32.totalorder %s7015_s14, 1 }
  0x15   : > { %p7122_p6 = por %p278_p3, %p64_p0  ;;  %p285_p7 = scmp.lt.s32.totalorder %s7015_s14, 3 }
  0x16   : > { %s8615_s3 = sld [smem:[#allocation47_spill]]  ;;  %s7017_s23 = smov [#allocation9]  }
  0x17   : > { %s8613_s18 = scalar_select %p7122_p6, 1, 0 }
  0x18   : > { %p7130_p8 = pnand %p5415_p5, %p285_p7  ;;  %s298_s24 = sshll.u32 %s7017_s23, 4  ;;  %s299_s24 = int_to_ptr.vmem [resolvable:$true] %s298_s24 }
  0x19   : > { %8614 = sst [smem:[#allocation24_spill]] %s8613_s18  ;;  %s7018_s26 = smov 128  }
  0x1a   : > { %p6575_p9 = pneg %p7130_p8  ;;  %s7019_s27 = smov 8  }
  0x1b   : > { %s42_s28 = sadd.s32 1, %s7011_s13  ;;  %s51_s29 = sadd.s32 1, %s7003_s11 }
  0x1c   : > { %s296_s21 = sshll.u32 %s8615_s3, 4  ;;  %p7138_p10 = pnand %p6575_p9, %p65_p1  ;;  %s297_s21 = int_to_ptr.hbm [resolvable:$true] %s296_s21 }
  0x1d   : > { %p44_p12 = scmp.ge.s32.totalorder %s42_s28, 2  ;;  %p58_p13 = scmp.ne.s32.totalorder %s7003_s11, %s6999_s10 }
  0x1e   : > { %6578 = dma.hbm_to_vmem [thread:$0]  (!%p7138_p10), %s297_s21, 2048, %s299_s24, [#allocation10], %s7018_s26, %s7018_s26, %s7019_s27  }
  0x1f   : > { %p59_p0 = scmp.eq.s32.totalorder %s7015_s14, 0  ;;  %s8698_s28 = smov (%p44_p12, %s42_s28), 0 }
  0x20   : > { %8618 = sst [smem:[#allocation25_spill]] %s8698_s28  ;;  %p7154_p5 = por %p272_p2, %p58_p13 }
  0x21   : > { %p60_p3 = por %p59_p0, %p58_p13  ;;  %s46_s19 = ssub.s32 %s7011_s13, %s8698_s28 }
  0x22   : > { %s8619_s16 = scalar_select %p7154_p5, 1, 0 }
  0x23   : > { %p49_p7 = scmp.eq.s32.totalorder %s46_s19, 0  ;;  %p6602_p9 = scmp.lt.s32.totalorder %s7015_s14, 2 }
  0x24   : > { %8620 = sst [smem:[#allocation26_spill]] %s8619_s16  ;;  %s7162_s20 = sand.u32 1, %s7003_s11  }
  0x25   : > { %s7165_s21 = scalar_select %p49_p7, %s7003_s11, %s51_s29  }
  0x26   : > { %p7167_p11 = pnand %p6602_p9, %p60_p3  ;;  %s374_s24 = sand.u32 1, %s7015_s14  }
  0x27   : > { %8621 = sst [smem:[#allocation27_spill]] %s7165_s21  ;;  %s5423_s26 = sshll.u32 %s7162_s20, 3 }
  0x28   : > { %s5963_s27 = sshll.u32 %s7011_s13, 3  ;;  %s378_s3 = scalar_lea.vmem [#allocation6], %s5423_s26 }
  0x29   : > { %s388_s18 = sshll.u32 %s378_s3, 4  ;;  %s8623_s1 = sld [smem:[#allocation45_spill]]  ;;  %s389_s18 = int_to_ptr.vmem [resolvable:$true] %s388_s18 }
  0x2a   : > { %s8624_s2 = sld [smem:[#allocation46_spill]]  ;;  %s7180_s11 = scalar_lea.sflag [#allocation7], %s374_s24 }
  0x2b   : > { %s7020_s14 = smov 64   ;;  %s7021_s12 = smov 4  }
  0x2c   : > { %s402_s30 = scalar_lea.vmem [#allocation8], %s5423_s26  ;;  %s310_s24 = sshll.u32 %s8578_s4, 4  ;;  %s311_s24 = int_to_ptr.hbm [resolvable:$true] %s310_s24 }
  0x2d   : > { %s412_s16 = sshll.u32 %s402_s30, 4  ;;  %s5420_s26 = sshll.u32 %s7162_s20, 7  ;;  %s413_s16 = int_to_ptr.vmem [resolvable:$true] %s412_s16 }
  0x2f   : > { %s385_s19 = scalar_lea.hbm %s8623_s1, %s5963_s27  ;;  %s5962_s1 = sshll.u32 %s7011_s13, 7 }
  0x30   : > { %s386_s28 = sshll.u32 %s385_s19, 4  ;;  %s409_s21 = scalar_lea.hbm %s8624_s2, %s5963_s27  ;;  %s387_s28 = int_to_ptr.hbm [resolvable:$true] %s386_s28 }
  0x31   : > { %6591 = dma.hbm_to_vmem [thread:$0]  (!%p7167_p11), %s387_s28, 128, %s389_s18, %s7180_s11, %s7020_s14, %s7020_s14, %s7021_s12  }
  0x32   : > { %s410_s3 = sshll.u32 %s409_s21, 4  ;;  %s7022_s19 = smov [#allocation11]   ;;  %s411_s3 = int_to_ptr.hbm [resolvable:$true] %s410_s3 }
  0x33   : > { %s312_s29 = sshll.u32 %s7022_s19, 4  ;;  %s324_s18 = sshll.u32 %s8579_s5, 4  ;;  %s313_s29 = int_to_ptr.vmem [resolvable:$true] %s312_s29  ;;  %s325_s18 = int_to_ptr.hbm [resolvable:$true] %s324_s18 }
  0x34   : > { %6581 = dma.hbm_to_vmem [thread:$0]  (!%p7138_p10), %s311_s24, 9216, %s313_s29, [#allocation10], %s7020_s14, %s7020_s14, %s7021_s12  }
  0x35   : > { %s7023_s28 = smov [#allocation12]   ;;  %s361_s9 = scalar_lea.hbm %s8574_s0, %s5962_s1 }
  0x36   : > { %s326_s21 = sshll.u32 %s7023_s28, 4  ;;  %s353_s27 = scalar_lea.vmem [#allocation3], %s5420_s26  ;;  %s327_s21 = int_to_ptr.vmem [resolvable:$true] %s326_s21 }
  0x37   : > { %6584 = dma.hbm_to_vmem [thread:$0]  (!%p7138_p10), %s325_s18, 1024, %s327_s21, [#allocation13], %s7020_s14, %s7020_s14, %s7021_s12  }
  0x38   : > { %s364_s19 = sshll.u32 %s353_s27, 4  ;;  %s362_s24 = sshll.u32 %s361_s9, 4  ;;  %s365_s19 = int_to_ptr.vmem [resolvable:$true] %s364_s19  ;;  %s363_s24 = int_to_ptr.hbm [resolvable:$true] %s362_s24 }
  0x39   : > { %s350_s29 = scalar_lea.sflag [#allocation4], %s7162_s20  ;;  %424 = sbr.rel (%p7130_p8) target bundleno = 1300 (0x514), region = 56 }
  0x3a   : > { %6588 = dma.hbm_to_vmem [thread:$0]  (!%p7167_p11), %s363_s24, 2048, %s365_s19, %s350_s29, %s7020_s14, %s7020_s14, %s7021_s12  }
  0x3b   : > { %6594 = dma.hbm_to_vmem [thread:$0]  (!%p7167_p11), %s411_s3, 128, %s413_s16, %s7180_s11, %s7020_s14, %s7020_s14, %s7021_s12  }
  0x3e   : > { %s7224_s25 = sand.u32 1, %s6999_s10  }
  0x3f   : > { %s5430_s20 = sshll.u32 %s7224_s25, 7  ;;  %s427_s18 = scalar_lea.sflag [#allocation4], %s7224_s25 }
  0x40   : > { %s7230_s28 = scalar_lea.vmem [#allocation3], %s5430_s20 }
  0x41   : > { %6968 = dma.done.wait (%p7117_p4), %s427_s18, 2048  }
  0x42   : > { %6970 = vsyncadd (%p7117_p4), %s427_s18, 4294965248  ;;  %s436_s11 = sand.u32 1, %s7108_s15  }
  0x43   : > { %s437_s12 = scalar_lea.sflag [#allocation7], %s436_s11 }
  0x44   : > { %6972 = dma.done.wait (%p7117_p4), %s437_s12, 256  }
  0x45   : > { %6974 = vsyncadd (%p7117_p4), %s437_s12, 4294967040 }
  0x46   : > { %6976 = dma.done.wait (%p65_p1), [#allocation10], 11264  }
  0x47   : > { %6978 = vsyncadd (%p65_p1), [#allocation10], 4294956032 }
  0x48   : > { %6980 = dma.done.wait (%p65_p1), [#allocation13], 1024  }
  0x49   : > { %6982 = vsyncadd (%p65_p1), [#allocation13], 4294966272  ;;  %v5559_v0 = vld [vmem:[#allocation9 + $0x70] sm:$0xf]  ;;  %v5996_v1 = vld [vmem:[#allocation9 + $0x74] sm:$0xf0] }
  0x4a   : > { %v5995_v2 = vld [vmem:[#allocation9 + $0x74] sm:$0xf]  ;;  %v5560_v3 = vor.u32 %v5996_v1, %v5559_v0  ;;  %v5561_v4 = vld [vmem:[#allocation9 + $0x78] sm:$0xf0]  ;;  %v5551_v5 = vld [vmem:[#allocation9 + $0x60] sm:$0xf] }
  0x4b   : > { %v5994_v6 = vld [vmem:[#allocation9 + $0x64] sm:$0xf0]  ;;  %v5564_v7 = vor.u32 %v5995_v2, %v5561_v4  ;;  %v5993_v8 = vld [vmem:[#allocation9 + $0x64] sm:$0xf]  ;;  %v5553_v9 = vld [vmem:[#allocation9 + $0x68] sm:$0xf0] }
  0x4c   : > { %744 = vmatpush.bf16.msra.mxu0 %v5560_v3  ;;  %v5552_v10 = vor.u32 %v5994_v6, %v5551_v5  ;;  %v5556_v11 = vor.u32 %v5993_v8, %v5553_v9  ;;  %v5543_v12 = vld [vmem:[#allocation9 + $0x50] sm:$0xf]  ;;  %v5992_v13 = vld [vmem:[#allocation9 + $0x54] sm:$0xf0]  ;;  %v5991_v14 = vld [vmem:[#allocation9 + $0x54] sm:$0xf] }
  0x4d   : > { %833 = vmatpush.bf16.msra.mxu1 %v5564_v7  ;;  %v5545_v15 = vld [vmem:[#allocation9 + $0x58] sm:$0xf0]  ;;  %v5544_v16 = vor.u32 %v5992_v13, %v5543_v12  ;;  %v5535_v18 = vld [vmem:[#allocation9 + $0x40] sm:$0xf]  ;;  %v5990_v19 = vld [vmem:[#allocation9 + $0x44] sm:$0xf0] }
  0x4e   : > { %v5548_v17 = vor.u32 %v5991_v14, %v5545_v15  ;;  %v5989_v20 = vld [vmem:[#allocation9 + $0x44] sm:$0xf]  ;;  %v5537_v21 = vld [vmem:[#allocation9 + $0x48] sm:$0xf0]  ;;  %v5536_v22 = vor.u32 %v5990_v19, %v5535_v18  ;;  %v5527_v24 = vld [vmem:[#allocation9 + $0x30] sm:$0xf] }
  0x4f   : > { %v5540_v23 = vor.u32 %v5989_v20, %v5537_v21  ;;  %v5988_v25 = vld [vmem:[#allocation9 + $0x34] sm:$0xf0]  ;;  %v5987_v26 = vld [vmem:[#allocation9 + $0x34] sm:$0xf]  ;;  %v5529_v27 = vld [vmem:[#allocation9 + $0x38] sm:$0xf0] }
  0x50   : > { %745 = vmatpush.bf16.msra.mxu0 %v5552_v10  ;;  %v5528_v28 = vor.u32 %v5988_v25, %v5527_v24  ;;  %v5532_v29 = vor.u32 %v5987_v26, %v5529_v27  ;;  %v5519_v30 = vld [vmem:[#allocation9 + $0x20] sm:$0xf]  ;;  %v5986_v31 = vld [vmem:[#allocation9 + $0x24] sm:$0xf0]  ;;  %v5985_v32 = vld [vmem:[#allocation9 + $0x24] sm:$0xf] }
  0x51   : > { %834 = vmatpush.bf16.msra.mxu1 %v5556_v11  ;;  %v5521_v33 = vld [vmem:[#allocation9 + $0x28] sm:$0xf0]  ;;  %v5520_v34 = vor.u32 %v5986_v31, %v5519_v30  ;;  %v5511_v36 = vld [vmem:[#allocation9 + $0x10] sm:$0xf]  ;;  %v5984_v37 = vld [vmem:[#allocation9 + $0x14] sm:$0xf0] }
  0x52   : > { %v5524_v35 = vor.u32 %v5985_v32, %v5521_v33  ;;  %v5983_v38 = vld [vmem:[#allocation9 + $0x14] sm:$0xf]  ;;  %v5513_v39 = vld [vmem:[#allocation9 + $0x18] sm:$0xf0]  ;;  %v5512_v40 = vor.u32 %v5984_v37, %v5511_v36  ;;  %v5503_v42 = vld [vmem:[#allocation9] sm:$0xf] }
  0x53   : > { %v5516_v41 = vor.u32 %v5983_v38, %v5513_v39  ;;  %v5982_v43 = vld [vmem:[#allocation9 + $0x4] sm:$0xf0]  ;;  %v5981_v44 = vld [vmem:[#allocation9 + $0x4] sm:$0xf]  ;;  %v5505_v45 = vld [vmem:[#allocation9 + $0x8] sm:$0xf0] }
  0x54   : > { %746 = vmatpush.bf16.msra.mxu0 %v5544_v16  ;;  %v5504_v46 = vor.u32 %v5982_v43, %v5503_v42  ;;  %v5508_v47 = vor.u32 %v5981_v44, %v5505_v45  ;;  %v5965_v48 = vld [vmem:[%s7230_s28] sm:$0xff]  ;;  %v5966_v49 = vld [vmem:[%s7230_s28 + $0x8] sm:$0xff]  ;;  %v5967_v50 = vld [vmem:[%s7230_s28 + $0x10] sm:$0xff]  ;;  %vm1050_vm0 = vsmask.f32 256  ;;  %vm1381_vm1 = vcmask 1040384  }
  0x55   : > { %835 = vmatpush.bf16.msra.mxu1 %v5548_v17  ;;  %v5968_v51 = vld [vmem:[%s7230_s28 + $0x18] sm:$0xff]  ;;  %v5969_v52 = vld [vmem:[%s7230_s28 + $0x20] sm:$0xff]  ;;  %v6021_v55 = vld [vmem:[#allocation11 + $0x30] sm:$0xff]  ;;  %v8625_v58 = vmov 0  ;;  %vm1374_vm3 = vcmask 1043456   ;;  %v8628_v1 = vmov 0 }
  0x56   : > { %v6022_v53 = vld [vmem:[#allocation11 + $0x38] sm:$0xff]  ;;  %v6029_v56 = vld [vmem:[#allocation11 + $0x70] sm:$0xff]  ;;  %v5970_v57 = vld [vmem:[%s7230_s28 + $0x28] sm:$0xff]  ;;  %vm1375_vm4 = vsmask.f32 7938  ;;  %v7024_v11 = vmov 0  }
  0x57   : > { %v6030_v54 = vld [vmem:[#allocation11 + $0x78] sm:$0xff]  ;;  %4031 = vmatpush.bf16.msra.mxu2 %v6022_v53  ;;  %vm7256_vm2 = vmand %vm1381_vm1, %vm1050_vm0  ;;  %v6020_v59 = vld [vmem:[#allocation11 + $0x28] sm:$0xff]  ;;  %1619 = vst [vmem:[#allocation2 + $0x4] sm:$0xf] %v7024_v11  ;;  %vm2201_vm6 = vsmask.f32 7424 }
  0x58   : > { %747 = vmatpush.bf16.msra.mxu0 %v5536_v22  ;;  %4120 = vmatpush.bf16.msra.mxu3 %v6030_v54  ;;  %v8626_v58 = vsel %vm7256_vm2, 4294967295, %v8625_v58  ;;  %v1620_v60 = vld [vmem:[#allocation2 + $0x8] sm:$0x1]  ;;  %v6028_v61 = vld [vmem:[#allocation11 + $0x68] sm:$0xff]  ;;  %v6019_v63 = vld [vmem:[#allocation11 + $0x20] sm:$0xff]  ;;  %s7294_s17 = scalar_lea.vmem [#allocation14], %s5430_s20 }
  0x59   : > { %836 = vmatpush.bf16.msra.mxu1 %v5540_v23  ;;  %8627 = vst [vmem:[#allocation28_spill] sm:$0xff] %v8626_v58  ;;  %v1621_v62 = vsel %vm7256_vm2, 0, %v1620_v60  ;;  %v6027_v0 = vld [vmem:[#allocation11 + $0x60] sm:$0xff]  ;;  %vm7262_vm5 = vmand %vm1374_vm3, %vm1375_vm4  ;;  %v1616_v2 = vld [vmem:[#allocation2] sm:$0xf]  ;;  %vm2458_vm9 = vcmask 1046528  }
  0x5a   : > { %1622 = vst [vmem:[#allocation2 + $0x8] sm:$0x1] %v1621_v62  ;;  %v8629_v1 = vsel %vm7262_vm5, 4294967295, %v8628_v1  ;;  %v1617_v3 = vsel %vm7262_vm5, 0, %v1616_v2  ;;  %v6018_v4 = vld [vmem:[#allocation11 + $0x18] sm:$0xff]  ;;  %v5971_v8 = vld [vmem:[%s7230_s28 + $0x30] sm:$0xff] }
  0x5b   : > { %4032 = vmatpush.bf16.msra.mxu2 %v6021_v55  ;;  %8630 = vst [vmem:[#allocation29_spill] sm:$0xff] %v8629_v1  ;;  %v6026_v5 = vld [vmem:[#allocation11 + $0x58] sm:$0xff]  ;;  %v6017_v9 = vld [vmem:[#allocation11 + $0x10] sm:$0xff]  ;;  %v6016_v14 = vld [vmem:[#allocation11 + $0x8] sm:$0xff]  ;;  %vm1051_vm7 = vsmask.f32 4368 }
  0x5c   : > { %748 = vmatpush.bf16.msra.mxu0 %v5528_v28  ;;  %4121 = vmatpush.bf16.msra.mxu3 %v6029_v56  ;;  %1618 = vst [vmem:[#allocation2] sm:$0xf] %v1617_v3  ;;  %v6025_v13 = vld [vmem:[#allocation11 + $0x50] sm:$0xff]  ;;  %v6024_v15 = vld [vmem:[#allocation11 + $0x48] sm:$0xff]  ;;  %v6015_v18 = vld [vmem:[#allocation11] sm:$0xff]  ;;  %s8683_s30 = sld [smem:[#allocation22_spill]] }
  0x5d   : > { %837 = vmatpush.bf16.msra.mxu1 %v5532_v29  ;;  %1752 = vst [vmem:[#allocation2 + $0xd0] sm:$0xf] %v7024_v11  ;;  %v6023_v21 = vld [vmem:[#allocation11 + $0x40] sm:$0xff]  ;;  %v5972_v28 = vld [vmem:[%s7230_s28 + $0x38] sm:$0xff]  ;;  %v514_v30 = vld [vmem:[%s8580_s6] sm:$0x3] }
  0x5e   : > { %v7281_v31 = vperm.slane %v514_v30, 0  ;;  %v5973_v32 = vld [vmem:[%s7230_s28 + $0x40] sm:$0xff]  ;;  %v7285_v37 = vperm.slane %v514_v30, 1  ;;  %v6046_v42 = vld [vmem:[#allocation11 + $0xf8] sm:$0xff]  ;;  %vm7300_vm8 = vmor %vm1050_vm0, %vm1051_vm7  ;;  %s8684_s24 = sld [smem:[#allocation48_spill]]  ;;  %s5245_s18 = sshll.u32 %s7294_s17, 4  ;;  %s5246_s18 = int_to_ptr.vmem [resolvable:$true] %s5245_s18 }
  0x5f   : > { %4033 = vmatpush.bf16.msra.mxu2 %v6020_v59  ;;  %v1383_v2 = vld [vmem:[#allocation2 + $0x14] sm:$0x1]  ;;  %s5230_s11 = scalar_lea.sflag [#allocation5], %s7224_s25 }
  0x60   : > { %749 = vmatpush.bf16.msra.mxu0 %v5520_v34  ;;  %4122 = vmatpush.bf16.msra.mxu3 %v6028_v61 }
  0x61   : > { %838 = vmatpush.bf16.msra.mxu1 %v5524_v35  ;;  %v1810_v6 = vld [vmem:[#allocation2 + $0x8] sm:$0xf] }
  0x62   : > { %v1811_v7 = vsel %vm7262_vm5, 0, %v1810_v6  ;;  %s6095_s9 = sshll.u32 %s8683_s30, 7 }
  0x63   : > { %4034 = vmatpush.bf16.msra.mxu2 %v6019_v63  ;;  %1812 = vst [vmem:[#allocation2 + $0x8] sm:$0xf] %v1811_v7  ;;  %v1756_v10 = vld [vmem:[#allocation2] sm:$0x1] }
  0x64   : > { %750 = vmatpush.bf16.msra.mxu0 %v5512_v40  ;;  %4123 = vmatpush.bf16.msra.mxu3 %v6027_v0  ;;  %v1757_v12 = vsel %vm7256_vm2, 0, %v1756_v10  ;;  %v6054_v40 = vld [vmem:[#allocation11 + $0x138] sm:$0xff]  ;;  %s5244_s29 = scalar_lea.hbm %s8684_s24, %s6095_s9  ;;  %s6935_s23 = scalar_lea.hbm %s8684_s24, 256 }
  0x65   : > { %839 = vmatpush.bf16.msra.mxu1 %v5516_v41  ;;  %1758 = vst [vmem:[#allocation2] sm:$0x1] %v1757_v12  ;;  %v6038_v41 = vld [vmem:[#allocation11 + $0xb8] sm:$0xff] }
  0x67   : > { %4035 = vmatpush.bf16.msra.mxu2 %v6018_v4 }
  0x68   : > { %751 = vmatpush.bf16.msra.mxu0 %v5504_v46  ;;  %4124 = vmatpush.bf16.msra.mxu3 %v6026_v5 }
  0x69   : > { %840 = vmatpush.bf16.msra.mxu1 %v5508_v47 }
  0x6a   : > { %v1896_v16 = vld [vmem:[#allocation2 + $0x8] sm:$0x1] }
  0x6b   : > { %752 = vmatmul.bf16.vlgmr.msra.gmra.mxu0 %v5965_v48  ;;  %4036 = vmatpush.bf16.msra.mxu2 %v6017_v9  ;;  %v2169_v17 = vunpack.c.l.b16 %v1896_v16 }
  0x6c   : > { %841 = vmatmul.bf16.vlgmr.msra.gmra.mxu1 %v5965_v48  ;;  %4125 = vmatpush.bf16.msra.mxu3 %v6025_v13  ;;  %v6177_v20 = vld [vmem:[#allocation2] sm:$0xff]  }
  0x6d   : > { %v7273_v19 = vpack.c.b16 %v2169_v17, %v2169_v17  ;;  %v2203_v22 = vshrl.u32 %v6177_v20, 16  ;;  %v2205_v23 = vshll.u32 %v6177_v20, 16  ;;  %4209 = vmatpush.bf16.msrb.mxu0 %v6038_v41  ;;  %4298 = vmatpush.bf16.msrb.mxu1 %v6046_v42 }
  0x6f   : > { %4037 = vmatpush.bf16.msra.mxu2 %v6016_v14  ;;  %v2210_v24 = vshll.u32 %v7273_v19, 16  ;;  %v2207_v25 = vrot.slane %v2205_v23, 1 }
  0x70   : > { %4126 = vmatpush.bf16.msra.mxu3 %v6024_v15 }
  0x71   : > { %v2212_v26 = vrot.slane %v2210_v24, 1  ;;  %v2208_v27 = vor.u32 %v2207_v25, %v2203_v22 }
  0x73   : > { %4038 = vmatpush.bf16.msra.mxu2 %v6015_v18  ;;  %v2213_v29 = vsel %vm2201_vm6, %v2208_v27, %v2212_v26 }
  0x74   : > { %4127 = vmatpush.bf16.msra.mxu3 %v6023_v21 }
  0x76   : > { %4039 = vmatmul.bf16.vlgmr.msra.gmra.mxu2 %v6177_v20  ;;  %v1386_v20 = vld [vmem:[#allocation2 + $0x18] sm:$0xf] }
  0x77   : > { %4128 = vmatmul.bf16.vlgmr.msra.gmra.mxu3 %v2213_v29  ;;  %4387 = vmatpush.bf16.msrb.mxu2 %v6054_v40  ;;  %v1390_v40 = vld [vmem:[#allocation2 + $0x20] sm:$0x1] }
  0x7b   : > { %757 = vmatmul.bf16.gmra.mxu0 %v5966_v49 }
  0x7c   : > { %846 = vmatmul.bf16.gmra.mxu1 %v5966_v49  ;;  %v1377_v49 = vld [vmem:[#allocation2 + $0xc] sm:$0xf] }
  0x8b   : > { %762 = vmatmul.bf16.gmra.mxu0 %v5967_v50 }
  0x8c   : > { %851 = vmatmul.bf16.gmra.mxu1 %v5967_v50 }
  0x9b   : > { %767 = vmatmul.bf16.gmra.mxu0 %v5968_v51 }
  0x9c   : > { %856 = vmatmul.bf16.gmra.mxu1 %v5968_v51 }
  0xab   : > { %772 = vmatmul.bf16.gmra.mxu0 %v5969_v52 }
  0xac   : > { %861 = vmatmul.bf16.gmra.mxu1 %v5969_v52 }
  0xbb   : > { %777 = vmatmul.bf16.gmra.mxu0 %v5970_v57 }
  0xbc   : > { %866 = vmatmul.bf16.gmra.mxu1 %v5970_v57  ;;  %v5974_v57 = vld [vmem:[%s7230_s28 + $0x48] sm:$0xff] }
  0xcb   : > { %782 = vmatmul.bf16.gmra.mxu0 %v5971_v8 }
  0xcc   : > { %871 = vmatmul.bf16.gmra.mxu1 %v5971_v8 }
  0xdb   : > { %787 = vmatmul.bf16.gmra.mxu0 %v5972_v28 }
  0xdc   : > { %876 = vmatmul.bf16.gmra.mxu1 %v5972_v28 }
  0xe8   : > { %v753_v33 = vpop.f32.mrf.mxu0 }
  0xe9   : > { %v754_v34 = vadd.f32 %v753_v33, %v7281_v31  ;;  %v842_v35 = vpop.f32.mrf.mxu1 }
  0xea   : > { %v843_v43 = vadd.f32 %v842_v35, %v7285_v37 }
  0xeb   : > { %v922_v36 = vmax.f32 %v754_v34, 0.0  ;;  %792 = vmatmul.bf16.gmra.mxu0 %v5973_v32 }
  0xec   : > { %881 = vmatmul.bf16.gmra.mxu1 %v5973_v32  ;;  %v5975_v32 = vld [vmem:[%s7230_s28 + $0x50] sm:$0xff] }
  0xed   : > { %v1018_v38 = vpack.c.bf16 %v922_v36, %v922_v36 }
  0xef   : > { %v1054_v39 = vshrl.u32 %v1018_v38, 16  ;;  %v1057_v46 = vshll.u32 %v1018_v38, 16 }
  0xf0   : > { %v755_v44 = vpop.f32.mrf.mxu0 }
  0xf1   : > { %v1056_v45 = vrot.slane %v1054_v39, 7  ;;  %v756_v47 = vadd.f32 %v755_v44, %v7281_v31  ;;  %v844_v48 = vpop.f32.mrf.mxu1 }
  0xf2   : > { %v845_v50 = vadd.f32 %v844_v48, %v7285_v37 }
  0xf3   : > { %v1059_v51 = vor.u32 %v1057_v46, %v1056_v45  ;;  %v923_v52 = vmax.f32 %v756_v47, 0.0  ;;  %v1060_v3 = vrot.slane %v1056_v45, 4 }
  0xf4   : > { %v6099_v53 = vpack.c.bf16 %v845_v50, %v843_v43 }
  0xf5   : > { %v1378_v54 = vsel %vm7262_vm5, %v1059_v51, %v1377_v49  ;;  %v1019_v55 = vpack.c.bf16 %v923_v52, %v923_v52 }
  0xf6   : > { %1379 = vst [vmem:[#allocation2 + $0xc] sm:$0xf] %v1378_v54  ;;  %v6037_v54 = vld [vmem:[#allocation11 + $0xb0] sm:$0xff] }
  0xf7   : > { %v1062_v56 = vshrl.u32 %v1019_v55, 16  ;;  %6100 = vst [vmem:[%s7294_s17] sm:$0xff] %v6099_v53   ;;  %v1065_v61 = vshll.u32 %v1019_v55, 16  ;;  %v6053_v53 = vld [vmem:[#allocation11 + $0x130] sm:$0xff]  ;;  %4210 = vmatpush.bf16.msrb.mxu0 %v6037_v54  ;;  %v1400_v54 = vld [vmem:[#allocation2 + $0x30] sm:$0xf] }
  0xf8   : > { %v758_v59 = vpop.f32.mrf.mxu0  ;;  %4388 = vmatpush.bf16.msrb.mxu2 %v6053_v53 }
  0xf9   : > { %v1064_v60 = vrot.slane %v1062_v56, 7  ;;  %v759_v62 = vadd.f32 %v758_v59, %v7281_v31  ;;  %v847_v63 = vpop.f32.mrf.mxu1  ;;  %v6045_v59 = vld [vmem:[#allocation11 + $0xf0] sm:$0xff] }
  0xfa   : > { %v848_v13 = vadd.f32 %v847_v63, %v7285_v37  ;;  %4299 = vmatpush.bf16.msrb.mxu1 %v6045_v59 }
  0xfb   : > { %v1067_v4 = vor.u32 %v1065_v61, %v1064_v60  ;;  %v1069_v5 = vrot.slane %v1064_v60, 4  ;;  %v924_v6 = vmax.f32 %v759_v62, 0.0  ;;  %797 = vmatmul.bf16.gmra.mxu0 %v5974_v57 }
  0xfc   : > { %886 = vmatmul.bf16.gmra.mxu1 %v5974_v57 }
  0xfd   : > { %v1759_v7 = vld [vmem:[#allocation2 + $0xc] sm:$0x1]  ;;  %v1068_v8 = vsel %vm7300_vm8, %v1060_v3, %v1067_v4  ;;  %v1384_v9 = vsel %vm7256_vm2, %v1069_v5, %v1383_v2  ;;  %v1020_v10 = vpack.c.bf16 %v924_v6, %v924_v6  ;;  %v6670_v45 = vld [vmem:[#allocation2 + $0xc] sm:$0xe]  ;;  %v1393_v4 = vld [vmem:[#allocation2 + $0x24] sm:$0xf] }
  0xfe   : > { %v1760_v11 = vsel %vm7256_vm2, 0, %v1759_v7  ;;  %1380 = vst [vmem:[#allocation2 + $0x10] sm:$0xf] %v1068_v8 }
  0xff   : > { %1761 = vst [vmem:[#allocation2 + $0xc] sm:$0x1] %v1760_v11  ;;  %v1071_v12 = vshrl.u32 %v1020_v10, 16  ;;  %v1074_v16 = vshll.u32 %v1020_v10, 16 }
 0x100   : > { %1385 = vst [vmem:[#allocation2 + $0x14] sm:$0x1] %v1384_v9  ;;  %v760_v14 = vpop.f32.mrf.mxu0 }
 0x101   : > { %v1073_v15 = vrot.slane %v1071_v12, 7  ;;  %v761_v17 = vadd.f32 %v760_v14, %v7281_v31  ;;  %v849_v18 = vpop.f32.mrf.mxu1 }
 0x102   : > { %v850_v21 = vadd.f32 %v849_v18, %v7285_v37 }
 0x103   : > { %v1076_v22 = vor.u32 %v1074_v16, %v1073_v15  ;;  %v925_v23 = vmax.f32 %v761_v17, 0.0  ;;  %v1077_v41 = vrot.slane %v1073_v15, 4 }
 0x104   : > { %v6104_v24 = vpack.c.bf16 %v850_v21, %v848_v13 }
 0x105   : > { %v1387_v25 = vsel %vm7262_vm5, %v1076_v22, %v1386_v20  ;;  %v1021_v26 = vpack.c.bf16 %v925_v23, %v925_v23  ;;  %v6669_v28 = vld [vmem:[#allocation2 + $0xc] sm:$0xf0] }
 0x106   : > { %1388 = vst [vmem:[#allocation2 + $0x18] sm:$0xf] %v1387_v25  ;;  %v7315_v27 = vld [vmem:[#allocation2 + $0xc] sm:$0xff]   ;;  %v6671_v60 = vor.u32 %v6670_v45, %v6669_v28 }
 0x107   : > { %v1813_v29 = vld [vmem:[#allocation2 + $0x14] sm:$0xf]  ;;  %v1079_v30 = vshrl.u32 %v1021_v26, 16  ;;  %6416 = vst [vmem:[%s7294_s17 + $0x8] sm:$0xff] %v6104_v24   ;;  %v1082_v36 = vshll.u32 %v1021_v26, 16  ;;  %4044 = vmatmul.bf16.gmra.mxu2 %v7315_v27  ;;  %v2217_v52 = vshll.u32 %v7315_v27, 16 }
 0x108   : > { %v1814_v33 = vsel %vm7262_vm5, 0, %v1813_v29  ;;  %v763_v34 = vpop.f32.mrf.mxu0  ;;  %v2215_v11 = vshrl.u32 %v7315_v27, 16  ;;  %v2462_v12 = vrot.slane %v6671_v60, 1  ;;  %v5976_v22 = vld [vmem:[%s7230_s28 + $0x58] sm:$0xff] }
 0x109   : > { %1815 = vst [vmem:[#allocation2 + $0x14] sm:$0xf] %v1814_v33  ;;  %v1081_v35 = vrot.slane %v1079_v30, 7  ;;  %v764_v38 = vadd.f32 %v763_v34, %v7281_v31  ;;  %v852_v39 = vpop.f32.mrf.mxu1  ;;  %v2219_v9 = vrot.slane %v2217_v52, 1 }
 0x10a   : > { %v853_v55 = vadd.f32 %v852_v39, %v7285_v37 }
 0x10b   : > { %v1084_v42 = vor.u32 %v1082_v36, %v1081_v35  ;;  %v1086_v43 = vrot.slane %v1081_v35, 4  ;;  %v926_v44 = vmax.f32 %v764_v38, 0.0  ;;  %802 = vmatmul.bf16.gmra.mxu0 %v5975_v32  ;;  %v2220_v20 = vor.u32 %v2219_v9, %v2215_v11 }
 0x10c   : > { %891 = vmatmul.bf16.gmra.mxu1 %v5975_v32  ;;  %v1397_v32 = vld [vmem:[#allocation2 + $0x2c] sm:$0x1] }
 0x10d   : > { %v1762_v46 = vld [vmem:[#allocation2 + $0x18] sm:$0x1]  ;;  %v1085_v47 = vsel %vm7300_vm8, %v1077_v41, %v1084_v42  ;;  %v1391_v48 = vsel %vm7256_vm2, %v1086_v43, %v1390_v40  ;;  %v1022_v49 = vpack.c.bf16 %v926_v44, %v926_v44 }
 0x10e   : > { %v1763_v50 = vsel %vm7256_vm2, 0, %v1762_v46  ;;  %1389 = vst [vmem:[#allocation2 + $0x1c] sm:$0xf] %v1085_v47 }
 0x10f   : > { %1764 = vst [vmem:[#allocation2 + $0x18] sm:$0x1] %v1763_v50  ;;  %v1088_v51 = vshrl.u32 %v1022_v49, 16  ;;  %v1091_v62 = vshll.u32 %v1022_v49, 16 }
 0x110   : > { %1392 = vst [vmem:[#allocation2 + $0x20] sm:$0x1] %v1391_v48  ;;  %v765_v56 = vpop.f32.mrf.mxu0  ;;  %v1897_v57 = vld [vmem:[#allocation2 + $0x14] sm:$0x1] }
 0x111   : > { %v1090_v61 = vrot.slane %v1088_v51, 7  ;;  %v766_v63 = vadd.f32 %v765_v56, %v7281_v31  ;;  %v854_v2 = vpop.f32.mrf.mxu1  ;;  %v2170_v3 = vunpack.c.l.b16 %v1897_v57 }
 0x112   : > { %v855_v5 = vadd.f32 %v854_v2, %v7285_v37 }
 0x113   : > { %v1093_v6 = vor.u32 %v1091_v62, %v1090_v61  ;;  %v927_v7 = vmax.f32 %v766_v63, 0.0  ;;  %v2186_v8 = vpack.c.b16 %v2170_v3, %v2170_v3  ;;  %v1094_v34 = vrot.slane %v1090_v61, 4 }
 0x114   : > { %v6109_v10 = vpack.c.bf16 %v855_v5, %v853_v55 }
 0x115   : > { %v1394_v13 = vsel %vm7262_vm5, %v1093_v6, %v1393_v4  ;;  %v1023_v14 = vpack.c.bf16 %v927_v7, %v927_v7  ;;  %v2222_v15 = vshll.u32 %v2186_v8, 16  ;;  %v2463_v16 = vrot.slane %v2186_v8, 1 }
 0x116   : > { %1395 = vst [vmem:[#allocation2 + $0x24] sm:$0xf] %v1394_v13  ;;  %v7345_v33 = vld [vmem:[#allocation2 + $0x18] sm:$0xff]  }
 0x117   : > { %v1816_v17 = vld [vmem:[#allocation2 + $0x20] sm:$0xf]  ;;  %v1096_v18 = vshrl.u32 %v1023_v14, 16  ;;  %6417 = vst [vmem:[%s7294_s17 + $0x10] sm:$0xff] %v6109_v10   ;;  %v2224_v21 = vrot.slane %v2222_v15, 1  ;;  %v7339_v23 = vsel %vm2458_vm9, %v2462_v12, %v2463_v16  ;;  %v1099_v27 = vshll.u32 %v1023_v14, 16  ;;  %4049 = vmatmul.bf16.gmra.mxu2 %v7345_v33 }
 0x118   : > { %v1817_v24 = vsel %vm7262_vm5, 0, %v1816_v17  ;;  %v768_v25 = vpop.f32.mrf.mxu0  ;;  %v2229_v45 = vshll.u32 %v7345_v33, 16  ;;  %v2227_v63 = vshrl.u32 %v7345_v33, 16  ;;  %v5977_v10 = vld [vmem:[%s7230_s28 + $0x60] sm:$0xff] }
 0x119   : > { %1818 = vst [vmem:[#allocation2 + $0x20] sm:$0xf] %v1817_v24  ;;  %v1098_v26 = vrot.slane %v1096_v18, 7  ;;  %v769_v28 = vadd.f32 %v768_v25, %v7281_v31  ;;  %v857_v29 = vpop.f32.mrf.mxu1  ;;  %v2225_v30 = vsel %vm2201_vm6, %v2220_v20, %v2224_v21  ;;  %v1404_v18 = vld [vmem:[#allocation2 + $0x38] sm:$0x1] }
 0x11a   : > { %4133 = vmatmul.bf16.gmra.mxu3 %v2225_v30  ;;  %v858_v46 = vadd.f32 %v857_v29, %v7285_v37  ;;  %v2231_v57 = vrot.slane %v2229_v45, 1 }
 0x11b   : > { %v1101_v35 = vor.u32 %v1099_v27, %v1098_v26  ;;  %v1103_v36 = vrot.slane %v1098_v26, 4  ;;  %v928_v38 = vmax.f32 %v769_v28, 0.0  ;;  %807 = vmatmul.bf16.gmra.mxu0 %v5976_v22 }
 0x11c   : > { %896 = vmatmul.bf16.gmra.mxu1 %v5976_v22  ;;  %v7367_v8 = vor.u32 %v2231_v57, %v2227_v63 }
 0x11d   : > { %v1765_v39 = vld [vmem:[#allocation2 + $0x24] sm:$0x1]  ;;  %v1102_v40 = vsel %vm7300_vm8, %v1094_v34, %v1101_v35  ;;  %v1398_v41 = vsel %vm7256_vm2, %v1103_v36, %v1397_v32  ;;  %v1024_v42 = vpack.c.bf16 %v928_v38, %v928_v38  ;;  %v6673_v25 = vld [vmem:[#allocation2 + $0x24] sm:$0xe] }
 0x11e   : > { %v1766_v43 = vsel %vm7256_vm2, 0, %v1765_v39  ;;  %1396 = vst [vmem:[#allocation2 + $0x28] sm:$0xf] %v1102_v40  ;;  %v6052_v35 = vld [vmem:[#allocation11 + $0x128] sm:$0xff] }
 0x11f   : > { %1767 = vst [vmem:[#allocation2 + $0x24] sm:$0x1] %v1766_v43  ;;  %v1105_v44 = vshrl.u32 %v1024_v42, 16  ;;  %v1108_v50 = vshll.u32 %v1024_v42, 16  ;;  %v6036_v36 = vld [vmem:[#allocation11 + $0xa8] sm:$0xff]  ;;  %4389 = vmatpush.bf16.msrb.mxu2 %v6052_v35 }
 0x120   : > { %1399 = vst [vmem:[#allocation2 + $0x2c] sm:$0x1] %v1398_v41  ;;  %v770_v47 = vpop.f32.mrf.mxu0  ;;  %v1898_v48 = vld [vmem:[#allocation2 + $0x20] sm:$0x1]  ;;  %4211 = vmatpush.bf16.msrb.mxu0 %v6036_v36 }
 0x121   : > { %v1107_v49 = vrot.slane %v1105_v44, 7  ;;  %v771_v51 = vadd.f32 %v770_v47, %v7281_v31  ;;  %v859_v52 = vpop.f32.mrf.mxu1  ;;  %v2171_v53 = vunpack.c.l.b16 %v1898_v48  ;;  %v6044_v41 = vld [vmem:[#allocation11 + $0xe8] sm:$0xff]  ;;  %v1407_v48 = vld [vmem:[#allocation2 + $0x3c] sm:$0xf] }
 0x122   : > { %v860_v55 = vadd.f32 %v859_v52, %v7285_v37  ;;  %4300 = vmatpush.bf16.msrb.mxu1 %v6044_v41  ;;  %v6041_v41 = vld [vmem:[#allocation11 + $0xd0] sm:$0xff] }
 0x123   : > { %v1110_v56 = vor.u32 %v1108_v50, %v1107_v49  ;;  %v929_v59 = vmax.f32 %v771_v51, 0.0  ;;  %v7358_v60 = vpack.c.b16 %v2171_v53, %v2171_v53  ;;  %v1111_v20 = vrot.slane %v1107_v49, 4 }
 0x124   : > { %v6114_v61 = vpack.c.bf16 %v860_v55, %v858_v46 }
 0x125   : > { %v1401_v62 = vsel %vm7262_vm5, %v1110_v56, %v1400_v54  ;;  %v1025_v2 = vpack.c.bf16 %v929_v59, %v929_v59  ;;  %v2234_v3 = vshll.u32 %v7358_v60, 16  ;;  %v6672_v5 = vld [vmem:[#allocation2 + $0x24] sm:$0xf0] }
 0x126   : > { %1402 = vst [vmem:[#allocation2 + $0x30] sm:$0xf] %v1401_v62  ;;  %v7364_v4 = vld [vmem:[#allocation2 + $0x24] sm:$0xff]   ;;  %v6674_v42 = vor.u32 %v6673_v25, %v6672_v5  ;;  %v6034_v25 = vld [vmem:[#allocation11 + $0x98] sm:$0xff] }
 0x127   : > { %v1819_v6 = vld [vmem:[#allocation2 + $0x2c] sm:$0xf]  ;;  %v1113_v7 = vshrl.u32 %v1025_v2, 16  ;;  %6418 = vst [vmem:[%s7294_s17 + $0x18] sm:$0xff] %v6114_v61   ;;  %v2236_v9 = vrot.slane %v2234_v3, 1  ;;  %v1116_v14 = vshll.u32 %v1025_v2, 16  ;;  %4054 = vmatmul.bf16.gmra.mxu2 %v7364_v4 }
 0x128   : > { %v1820_v11 = vsel %vm7262_vm5, 0, %v1819_v6  ;;  %v773_v12 = vpop.f32.mrf.mxu0  ;;  %v2241_v34 = vshll.u32 %v7364_v4, 16  ;;  %v2239_v55 = vshrl.u32 %v7364_v4, 16  ;;  %v2468_v56 = vrot.slane %v6674_v42, 1  ;;  %v5978_v6 = vld [vmem:[%s7230_s28 + $0x68] sm:$0xff] }
 0x129   : > { %1821 = vst [vmem:[#allocation2 + $0x2c] sm:$0xf] %v1820_v11  ;;  %v1115_v13 = vrot.slane %v1113_v7, 7  ;;  %v774_v15 = vadd.f32 %v773_v12, %v7281_v31  ;;  %v862_v16 = vpop.f32.mrf.mxu1  ;;  %v2237_v17 = vsel %vm2201_vm6, %v7367_v8, %v2236_v9  ;;  %v6043_v11 = vld [vmem:[#allocation11 + $0xe0] sm:$0xff] }
 0x12a   : > { %4138 = vmatmul.bf16.gmra.mxu3 %v2237_v17  ;;  %v863_v38 = vadd.f32 %v862_v16, %v7285_v37  ;;  %v2243_v53 = vrot.slane %v2241_v34, 1  ;;  %v1411_v17 = vld [vmem:[#allocation2 + $0x44] sm:$0x1]  ;;  %4301 = vmatpush.bf16.msrb.mxu1 %v6043_v11  ;;  %v6031_v11 = vld [vmem:[#allocation11 + $0x80] sm:$0xff] }
 0x12b   : > { %v1118_v21 = vor.u32 %v1116_v14, %v1115_v13  ;;  %v1120_v22 = vrot.slane %v1115_v13, 4  ;;  %v930_v24 = vmax.f32 %v774_v15, 0.0  ;;  %812 = vmatmul.bf16.gmra.mxu0 %v5977_v10 }
 0x12c   : > { %901 = vmatmul.bf16.gmra.mxu1 %v5977_v10  ;;  %v2244_v3 = vor.u32 %v2243_v53, %v2239_v55  ;;  %v6035_v10 = vld [vmem:[#allocation11 + $0xa0] sm:$0xff]  ;;  %v6040_v55 = vld [vmem:[#allocation11 + $0xc8] sm:$0xff] }
 0x12d   : > { %v1768_v26 = vld [vmem:[#allocation2 + $0x30] sm:$0x1]  ;;  %v1119_v27 = vsel %vm7300_vm8, %v1111_v20, %v1118_v21  ;;  %v1405_v28 = vsel %vm7256_vm2, %v1120_v22, %v1404_v18  ;;  %v1026_v29 = vpack.c.bf16 %v930_v24, %v930_v24  ;;  %4212 = vmatpush.bf16.msrb.mxu0 %v6035_v10 }
 0x12e   : > { %v1769_v30 = vsel %vm7256_vm2, 0, %v1768_v26  ;;  %1403 = vst [vmem:[#allocation2 + $0x34] sm:$0xf] %v1119_v27  ;;  %v6042_v26 = vld [vmem:[#allocation11 + $0xd8] sm:$0xff] }
 0x12f   : > { %1770 = vst [vmem:[#allocation2 + $0x30] sm:$0x1] %v1769_v30  ;;  %v1122_v32 = vshrl.u32 %v1026_v29, 16  ;;  %v1125_v44 = vshll.u32 %v1026_v29, 16  ;;  %4302 = vmatpush.bf16.msrb.mxu1 %v6042_v26 }
 0x130   : > { %1406 = vst [vmem:[#allocation2 + $0x38] sm:$0x1] %v1405_v28  ;;  %v775_v39 = vpop.f32.mrf.mxu0  ;;  %v1899_v40 = vld [vmem:[#allocation2 + $0x2c] sm:$0x1] }
 0x131   : > { %v1124_v43 = vrot.slane %v1122_v32, 7  ;;  %v776_v45 = vadd.f32 %v775_v39, %v7281_v31  ;;  %v864_v46 = vpop.f32.mrf.mxu1  ;;  %v2172_v47 = vunpack.c.l.b16 %v1899_v40  ;;  %4213 = vmatpush.bf16.msrb.mxu0 %v6034_v25  ;;  %v6033_v40 = vld [vmem:[#allocation11 + $0x90] sm:$0xff] }
 0x132   : > { %v865_v49 = vadd.f32 %v864_v46, %v7285_v37 }
 0x133   : > { %v1127_v50 = vor.u32 %v1125_v44, %v1124_v43  ;;  %v931_v51 = vmax.f32 %v776_v45, 0.0  ;;  %v2188_v52 = vpack.c.b16 %v2172_v47, %v2172_v47  ;;  %v1128_v18 = vrot.slane %v1124_v43, 4  ;;  %v1414_v47 = vld [vmem:[#allocation2 + $0x48] sm:$0xf]  ;;  %4303 = vmatpush.bf16.msrb.mxu1 %v6041_v41 }
 0x134   : > { %v6119_v54 = vpack.c.bf16 %v865_v49, %v863_v38 }
 0x135   : > { %v1408_v57 = vsel %vm7262_vm5, %v1127_v50, %v1407_v48  ;;  %v1027_v59 = vpack.c.bf16 %v931_v51, %v931_v51  ;;  %v2246_v61 = vshll.u32 %v2188_v52, 16  ;;  %v2469_v62 = vrot.slane %v2188_v52, 1  ;;  %4214 = vmatpush.bf16.msrb.mxu0 %v6033_v40 }
 0x136   : > { %1409 = vst [vmem:[#allocation2 + $0x3c] sm:$0xf] %v1408_v57  ;;  %v7398_v24 = vld [vmem:[#allocation2 + $0x30] sm:$0xff]  }
 0x137   : > { %v1822_v63 = vld [vmem:[#allocation2 + $0x38] sm:$0xf]  ;;  %v1130_v2 = vshrl.u32 %v1027_v59, 16  ;;  %6419 = vst [vmem:[%s7294_s17 + $0x20] sm:$0xff] %v6119_v54   ;;  %v2248_v5 = vrot.slane %v2246_v61, 1  ;;  %v7392_v7 = vsel %vm2458_vm9, %v2468_v56, %v2469_v62  ;;  %v1133_v13 = vshll.u32 %v1027_v59, 16  ;;  %4059 = vmatmul.bf16.gmra.mxu2 %v7398_v24  ;;  %4304 = vmatpush.bf16.msrb.mxu1 %v6040_v55 }
 0x138   : > { %v1823_v4 = vsel %vm7262_vm5, 0, %v1822_v63  ;;  %v778_v9 = vpop.f32.mrf.mxu0  ;;  %v2253_v35 = vshll.u32 %v7398_v24, 16  ;;  %v6032_v54 = vld [vmem:[#allocation11 + $0x88] sm:$0xff]  ;;  %v2251_v57 = vshrl.u32 %v7398_v24, 16 }
 0x139   : > { %1824 = vst [vmem:[#allocation2 + $0x38] sm:$0xf] %v1823_v4  ;;  %v1132_v12 = vrot.slane %v1130_v2, 7  ;;  %v779_v14 = vadd.f32 %v778_v9, %v7281_v31  ;;  %v867_v15 = vpop.f32.mrf.mxu1  ;;  %v2249_v16 = vsel %vm2201_vm6, %v2244_v3, %v2248_v5  ;;  %4215 = vmatpush.bf16.msrb.mxu0 %v6032_v54  ;;  %v5979_v4 = vld [vmem:[%s7230_s28 + $0x70] sm:$0xff] }
 0x13a   : > { %4143 = vmatmul.bf16.gmra.mxu3 %v2249_v16  ;;  %v868_v36 = vadd.f32 %v867_v15, %v7285_v37  ;;  %v2255_v50 = vrot.slane %v2253_v35, 1 }
 0x13b   : > { %v1135_v20 = vor.u32 %v1133_v13, %v1132_v12  ;;  %v1137_v21 = vrot.slane %v1132_v12, 4  ;;  %v932_v22 = vmax.f32 %v779_v14, 0.0  ;;  %817 = vmatmul.bf16.gmra.mxu0 %v5978_v6  ;;  %v6039_v12 = vld [vmem:[#allocation11 + $0xc0] sm:$0xff] }
 0x13c   : > { %906 = vmatmul.bf16.gmra.mxu1 %v5978_v6  ;;  %v7420_v5 = vor.u32 %v2255_v50, %v2251_v57 }
 0x13d   : > { %v1771_v27 = vld [vmem:[#allocation2 + $0x3c] sm:$0x1]  ;;  %v1136_v28 = vsel %vm7300_vm8, %v1128_v18, %v1135_v20  ;;  %v1412_v29 = vsel %vm7256_vm2, %v1137_v21, %v1411_v17  ;;  %v1028_v30 = vpack.c.bf16 %v932_v22, %v932_v22  ;;  %v1418_v18 = vld [vmem:[#allocation2 + $0x50] sm:$0x1]  ;;  %4216 = vmatpush.bf16.msrb.mxu0 %v6031_v11  ;;  %4305 = vmatpush.bf16.msrb.mxu1 %v6039_v12  ;;  %v6676_v26 = vld [vmem:[#allocation2 + $0x3c] sm:$0xe] }
 0x13e   : > { %v1772_v32 = vsel %vm7256_vm2, 0, %v1771_v27  ;;  %1410 = vst [vmem:[#allocation2 + $0x40] sm:$0xf] %v1136_v28 }
 0x13f   : > { %1773 = vst [vmem:[#allocation2 + $0x3c] sm:$0x1] %v1772_v32  ;;  %v1139_v34 = vshrl.u32 %v1028_v30, 16  ;;  %v1142_v43 = vshll.u32 %v1028_v30, 16 }
 0x140   : > { %1413 = vst [vmem:[#allocation2 + $0x44] sm:$0x1] %v1412_v29  ;;  %v780_v38 = vpop.f32.mrf.mxu0  ;;  %v1900_v39 = vld [vmem:[#allocation2 + $0x38] sm:$0x1] }
 0x141   : > { %v1141_v42 = vrot.slane %v1139_v34, 7  ;;  %v781_v44 = vadd.f32 %v780_v38, %v7281_v31  ;;  %v869_v45 = vpop.f32.mrf.mxu1  ;;  %v2173_v46 = vunpack.c.l.b16 %v1900_v39 }
 0x142   : > { %v870_v48 = vadd.f32 %v869_v45, %v7285_v37 }
 0x143   : > { %v1144_v49 = vor.u32 %v1142_v43, %v1141_v42  ;;  %v933_v51 = vmax.f32 %v781_v44, 0.0  ;;  %v7411_v52 = vpack.c.b16 %v2173_v46, %v2173_v46  ;;  %v1145_v20 = vrot.slane %v1141_v42, 4 }
 0x144   : > { %v6124_v53 = vpack.c.bf16 %v870_v48, %v868_v36  ;;  %v6051_v36 = vld [vmem:[#allocation11 + $0x120] sm:$0xff] }
 0x145   : > { %v1415_v56 = vsel %vm7262_vm5, %v1144_v49, %v1414_v47  ;;  %v1029_v59 = vpack.c.bf16 %v933_v51, %v933_v51  ;;  %v2258_v61 = vshll.u32 %v7411_v52, 16  ;;  %v6675_v63 = vld [vmem:[#allocation2 + $0x3c] sm:$0xf0]  ;;  %4390 = vmatpush.bf16.msrb.mxu2 %v6051_v36  ;;  %v1421_v47 = vld [vmem:[#allocation2 + $0x54] sm:$0xf] }
 0x146   : > { %1416 = vst [vmem:[#allocation2 + $0x48] sm:$0xf] %v1415_v56  ;;  %v7417_v62 = vld [vmem:[#allocation2 + $0x3c] sm:$0xff]   ;;  %v6677_v41 = vor.u32 %v6676_v26, %v6675_v63 }
 0x147   : > { %v1825_v2 = vld [vmem:[#allocation2 + $0x44] sm:$0xf]  ;;  %v1147_v3 = vshrl.u32 %v1029_v59, 16  ;;  %6420 = vst [vmem:[%s7294_s17 + $0x28] sm:$0xff] %v6124_v53   ;;  %v2260_v6 = vrot.slane %v2258_v61, 1  ;;  %v1150_v14 = vshll.u32 %v1029_v59, 16  ;;  %4064 = vmatmul.bf16.gmra.mxu2 %v7417_v62 }
 0x148   : > { %v1826_v9 = vsel %vm7262_vm5, 0, %v1825_v2  ;;  %v783_v10 = vpop.f32.mrf.mxu0  ;;  %v2265_v35 = vshll.u32 %v7417_v62, 16  ;;  %v2263_v55 = vshrl.u32 %v7417_v62, 16  ;;  %v2474_v56 = vrot.slane %v6677_v41, 1 }
 0x149   : > { %1827 = vst [vmem:[#allocation2 + $0x44] sm:$0xf] %v1826_v9  ;;  %v1149_v13 = vrot.slane %v1147_v3, 7  ;;  %v784_v15 = vadd.f32 %v783_v10, %v7281_v31  ;;  %v872_v16 = vpop.f32.mrf.mxu1  ;;  %v2261_v17 = vsel %vm2201_vm6, %v7420_v5, %v2260_v6  ;;  %v5980_v9 = vld [vmem:[%s7230_s28 + $0x78] sm:$0xff]  ;;  %s5247_s28 = sshll.u32 %s5244_s29, 4  ;;  %s5248_s28 = int_to_ptr.hbm [resolvable:$true] %s5247_s28 }
 0x14a   : > { %4148 = vmatmul.bf16.gmra.mxu3 %v2261_v17  ;;  %v873_v38 = vadd.f32 %v872_v16, %v7285_v37  ;;  %v2267_v53 = vrot.slane %v2265_v35, 1  ;;  %v1425_v17 = vld [vmem:[#allocation2 + $0x5c] sm:$0x1]  ;;  %s6929_s12 = sshra.s32 %s5248_s28, 4  ;;  %s6930_s12 = int_to_ptr.hbm [resolvable:$true] %s6929_s12 }
 0x14b   : > { %v1152_v21 = vor.u32 %v1150_v14, %v1149_v13  ;;  %v1154_v22 = vrot.slane %v1149_v13, 4  ;;  %v934_v25 = vmax.f32 %v784_v15, 0.0  ;;  %822 = vmatmul.bf16.gmra.mxu0 %v5979_v4  ;;  %s6931_s14 = scalar_lea.hbm %s6930_s12, 128  ;;  %p6936_p8 = scmp.lt.s32.totalorder %s6930_s12, %s8684_s24 }
 0x14c   : > { %911 = vmatmul.bf16.gmra.mxu1 %v5979_v4  ;;  %v2268_v6 = vor.u32 %v2267_v53, %v2263_v55  ;;  %p6932_p1 = scmp.ne.s32.totalorder %s6930_s12, %s6931_s14  ;;  %p6937_p10 = scmp.lt.s32.totalorder %s6935_s23, %s6931_s14 }
 0x14d   : > { %v1774_v27 = vld [vmem:[#allocation2 + $0x48] sm:$0x1]  ;;  %v1153_v28 = vsel %vm7300_vm8, %v1145_v20, %v1152_v21  ;;  %v1419_v29 = vsel %vm7256_vm2, %v1154_v22, %v1418_v18  ;;  %v1030_v30 = vpack.c.bf16 %v934_v25, %v934_v25 }
 0x14e   : > { %v1775_v32 = vsel %vm7256_vm2, 0, %v1774_v27  ;;  %1417 = vst [vmem:[#allocation2 + $0x4c] sm:$0xf] %v1153_v28  ;;  %p6933_p2 = pnand %p6932_p1, %p7154_p5  ;;  %p6938_p11 = por %p6937_p10, %p6936_p8 }
 0x14f   : > { %1776 = vst [vmem:[#allocation2 + $0x48] sm:$0x1] %v1775_v32  ;;  %v1156_v34 = vshrl.u32 %v1030_v30, 16  ;;  %v1159_v43 = vshll.u32 %v1030_v30, 16  ;;  %v6453_v30 = vld [vmem:[#allocation2] sm:$0xf0] }
 0x150   : > { %1420 = vst [vmem:[#allocation2 + $0x50] sm:$0x1] %v1419_v29  ;;  %v785_v39 = vpop.f32.mrf.mxu0  ;;  %v1901_v40 = vld [vmem:[#allocation2 + $0x44] sm:$0x1]  ;;  %v6454_v32 = vld [vmem:[#allocation2] sm:$0xe]  ;;  %p6934_p4 = pneg %p6933_p2 }
 0x151   : > { %v1158_v42 = vrot.slane %v1156_v34, 7  ;;  %v786_v44 = vadd.f32 %v785_v39, %v7281_v31  ;;  %v874_v45 = vpop.f32.mrf.mxu1  ;;  %v2174_v46 = vunpack.c.l.b16 %v1901_v40 }
 0x152   : > { %v875_v48 = vadd.f32 %v874_v45, %v7285_v37  ;;  %p6939_p12 = pnand %p6938_p11, %p6934_p4 }
 0x153   : > { %v1161_v49 = vor.u32 %v1159_v43, %v1158_v42  ;;  %v935_v50 = vmax.f32 %v786_v44, 0.0  ;;  %v2190_v51 = vpack.c.b16 %v2174_v46, %v2174_v46  ;;  %v1162_v18 = vrot.slane %v1158_v42, 4  ;;  %v4040_v44 = vpop.f32.mrf.mxu2 }
 0x154   : > { %v6129_v54 = vpack.c.bf16 %v875_v48, %v873_v38  ;;  %v7464_v38 = vld [vmem:[%s8581_s7] ss:$0 sm:$0xff]  ;;  %v6455_v43 = vor.u32 %v6454_v32, %v6453_v30 }
 0x155   : > { %v1422_v57 = vsel %vm7262_vm5, %v1161_v49, %v1421_v47  ;;  %v1031_v59 = vpack.c.bf16 %v935_v50, %v935_v50  ;;  %v2270_v61 = vshll.u32 %v2190_v51, 16  ;;  %v2475_v63 = vrot.slane %v2190_v51, 1  ;;  %v1428_v50 = vld [vmem:[#allocation2 + $0x60] sm:$0xf] }
 0x156   : > { %1423 = vst [vmem:[#allocation2 + $0x54] sm:$0xf] %v1422_v57  ;;  %v7451_v25 = vld [vmem:[#allocation2 + $0x48] sm:$0xff]   ;;  %v4041_v49 = vadd.f32 %v7464_v38, %v4040_v44 }
 0x157   : > { %v1828_v2 = vld [vmem:[#allocation2 + $0x50] sm:$0xf]  ;;  %v1164_v3 = vshrl.u32 %v1031_v59, 16  ;;  %6421 = vst [vmem:[%s7294_s17 + $0x30] sm:$0xff] %v6129_v54   ;;  %v2272_v4 = vrot.slane %v2270_v61, 1  ;;  %v7445_v10 = vsel %vm2458_vm9, %v2474_v56, %v2475_v63  ;;  %v1167_v13 = vshll.u32 %v1031_v59, 16  ;;  %4069 = vmatmul.bf16.gmra.mxu2 %v7451_v25  ;;  %v4129_v61 = vpop.f32.mrf.mxu3 }
 0x158   : > { %v1829_v62 = vsel %vm7262_vm5, 0, %v1828_v2  ;;  %v788_v11 = vpop.f32.mrf.mxu0  ;;  %v2277_v36 = vshll.u32 %v7451_v25, 16  ;;  %v7472_v57 = vld [vmem:[#allocation2 + $0xc] sm:$0xff]   ;;  %v2459_v2 = vrot.slane %v6455_v43, 1 }
 0x159   : > { %1830 = vst [vmem:[#allocation2 + $0x50] sm:$0xf] %v1829_v62  ;;  %v1166_v12 = vrot.slane %v1164_v3, 7  ;;  %v789_v14 = vadd.f32 %v788_v11, %v7281_v31  ;;  %v877_v15 = vpop.f32.mrf.mxu1  ;;  %v2273_v16 = vsel %vm2201_vm6, %v2268_v6, %v2272_v4  ;;  %v7474_v59 = vld [vmem:[#allocation2 + $0xc] sm:$0xf0]  ;;  %v2460_v3 = vrot.slane %v7273_v19, 1 }
 0x15a   : > { %4153 = vmatmul.bf16.gmra.mxu3 %v2273_v16  ;;  %v878_v40 = vadd.f32 %v877_v15, %v7285_v37  ;;  %v2279_v54 = vrot.slane %v2277_v36, 1  ;;  %v7477_v6 = vadd.f32 %v4129_v61, %v4041_v49 }
 0x15b   : > { %v1169_v20 = vor.u32 %v1167_v13, %v1166_v12  ;;  %v1171_v21 = vrot.slane %v1166_v12, 4  ;;  %v936_v22 = vmax.f32 %v789_v14, 0.0  ;;  %827 = vmatmul.bf16.gmra.mxu0 %v5980_v9 }
 0x15c   : > { %916 = vmatmul.bf16.gmra.mxu1 %v5980_v9  ;;  %v2275_v9 = vshrl.u32 %v7451_v25, 16 }
 0x15d   : > { %v1777_v26 = vld [vmem:[#allocation2 + $0x54] sm:$0x1]  ;;  %v1170_v27 = vsel %vm7300_vm8, %v1162_v18, %v1169_v20  ;;  %v1426_v28 = vsel %vm7256_vm2, %v1171_v21, %v1425_v17  ;;  %v1032_v29 = vpack.c.bf16 %v936_v22, %v936_v22  ;;  %v2461_v20 = vsel %vm2458_vm9, %v2459_v2, %v2460_v3  ;;  %v6679_v36 = vld [vmem:[#allocation2 + $0x54] sm:$0xe] }
 0x15e   : > { %v1778_v34 = vsel %vm7256_vm2, 0, %v1777_v26  ;;  %1424 = vst [vmem:[#allocation2 + $0x58] sm:$0xf] %v1170_v27  ;;  %v7486_v16 = vor.u32 %v2279_v54, %v2275_v9 }
 0x15f   : > { %1779 = vst [vmem:[#allocation2 + $0x54] sm:$0x1] %v1778_v34  ;;  %v1173_v35 = vshrl.u32 %v1032_v29, 16  ;;  %v1176_v39 = vshll.u32 %v1032_v29, 16  ;;  %v1432_v29 = vld [vmem:[#allocation2 + $0x68] sm:$0x1] }
 0x160   : > { %1427 = vst [vmem:[#allocation2 + $0x5c] sm:$0x1] %v1426_v28  ;;  %v790_v41 = vpop.f32.mrf.mxu0  ;;  %v1902_v42 = vld [vmem:[#allocation2 + $0x50] sm:$0x1] }
 0x161   : > { %v1175_v45 = vrot.slane %v1173_v35, 7  ;;  %v791_v46 = vadd.f32 %v790_v41, %v7281_v31  ;;  %v879_v47 = vpop.f32.mrf.mxu1  ;;  %v2175_v48 = vunpack.c.l.b16 %v1902_v42 }
 0x162   : > { %v880_v51 = vadd.f32 %v879_v47, %v7285_v37 }
 0x163   : > { %v1178_v53 = vor.u32 %v1176_v39, %v1175_v45  ;;  %v937_v55 = vmax.f32 %v791_v46, 0.0  ;;  %v7470_v56 = vpack.c.b16 %v2175_v48, %v2175_v48  ;;  %v1179_v30 = vrot.slane %v1175_v45, 4  ;;  %v6050_v46 = vld [vmem:[#allocation11 + $0x118] sm:$0xff] }
 0x164   : > { %v6134_v63 = vpack.c.bf16 %v880_v51, %v878_v40  ;;  %4391 = vmatpush.bf16.msrb.mxu2 %v6050_v46 }
 0x165   : > { %v1429_v4 = vsel %vm7262_vm5, %v1178_v53, %v1428_v50  ;;  %v1033_v62 = vpack.c.bf16 %v937_v55, %v937_v55  ;;  %v2282_v11 = vshll.u32 %v7470_v56, 16  ;;  %v6678_v13 = vld [vmem:[#allocation2 + $0x54] sm:$0xf0] }
 0x166   : > { %1430 = vst [vmem:[#allocation2 + $0x60] sm:$0xf] %v1429_v4  ;;  %v7483_v12 = vld [vmem:[#allocation2 + $0x54] sm:$0xff]   ;;  %v6680_v50 = vor.u32 %v6679_v36, %v6678_v13 }
 0x167   : > { %v1831_v14 = vld [vmem:[#allocation2 + $0x5c] sm:$0xf]  ;;  %v1181_v15 = vshrl.u32 %v1033_v62, 16  ;;  %6422 = vst [vmem:[%s7294_s17 + $0x38] sm:$0xff] %v6134_v63   ;;  %v2284_v19 = vrot.slane %v2282_v11, 1  ;;  %v1184_v22 = vshll.u32 %v1033_v62, 16  ;;  %4074 = vmatmul.bf16.gmra.mxu2 %v7483_v12 }
 0x168   : > { %v1832_v17 = vsel %vm7262_vm5, 0, %v1831_v14  ;;  %v793_v18 = vpop.f32.mrf.mxu0  ;;  %v2289_v45 = vshll.u32 %v7483_v12, 16  ;;  %v1435_v63 = vld [vmem:[#allocation2 + $0x6c] sm:$0xf]  ;;  %v2287_v14 = vshrl.u32 %v7483_v12, 16 }
 0x169   : > { %1833 = vst [vmem:[#allocation2 + $0x5c] sm:$0xf] %v1832_v17  ;;  %v1183_v21 = vrot.slane %v1181_v15, 7  ;;  %v794_v26 = vadd.f32 %v793_v18, %v7281_v31  ;;  %v882_v27 = vpop.f32.mrf.mxu1  ;;  %v2285_v28 = vsel %vm2201_vm6, %v7486_v16, %v2284_v19  ;;  %v2480_v15 = vrot.slane %v6680_v50, 1  ;;  %v1439_v36 = vld [vmem:[#allocation2 + $0x74] sm:$0x1] }
 0x16a   : > { %4158 = vmatmul.bf16.gmra.mxu3 %v2285_v28  ;;  %v883_v47 = vadd.f32 %v882_v27, %v7285_v37  ;;  %v2291_v62 = vrot.slane %v2289_v45, 1  ;;  %v6062_v50 = vld [vmem:[#allocation11 + $0x178] sm:$0xff] }
 0x16b   : > { %v1186_v32 = vor.u32 %v1184_v22, %v1183_v21  ;;  %v1188_v34 = vrot.slane %v1183_v21, 4  ;;  %v938_v35 = vmax.f32 %v794_v26, 0.0  ;;  %4217 = vmatmul.bf16.vlgmr.msrb.gmra.mxu0 %v2461_v20  ;;  %4476 = vmatpush.bf16.msrb.mxu3 %v6062_v50 }
 0x16c   : > { %4306 = vmatmul.bf16.vlgmr.msrb.gmra.mxu1 %v7472_v57  ;;  %v2292_v22 = vor.u32 %v2291_v62, %v2287_v14 }
 0x16d   : > { %v1780_v39 = vld [vmem:[#allocation2 + $0x60] sm:$0x1]  ;;  %v1187_v40 = vsel %vm7300_vm8, %v1179_v30, %v1186_v32  ;;  %v1433_v41 = vsel %vm7256_vm2, %v1188_v34, %v1432_v29  ;;  %v1034_v42 = vpack.c.bf16 %v938_v35, %v938_v35 }
 0x16e   : > { %v1781_v43 = vsel %vm7256_vm2, 0, %v1780_v39  ;;  %1431 = vst [vmem:[#allocation2 + $0x64] sm:$0xf] %v1187_v40 }
 0x16f   : > { %1782 = vst [vmem:[#allocation2 + $0x60] sm:$0x1] %v1781_v43  ;;  %v1190_v44 = vshrl.u32 %v1034_v42, 16  ;;  %v1193_v53 = vshll.u32 %v1034_v42, 16 }
 0x170   : > { %1434 = vst [vmem:[#allocation2 + $0x68] sm:$0x1] %v1433_v41  ;;  %v795_v48 = vpop.f32.mrf.mxu0  ;;  %v1903_v49 = vld [vmem:[#allocation2 + $0x5c] sm:$0x1] }
 0x171   : > { %v1192_v51 = vrot.slane %v1190_v44, 7  ;;  %v796_v54 = vadd.f32 %v795_v48, %v7281_v31  ;;  %v884_v55 = vpop.f32.mrf.mxu1  ;;  %v2176_v61 = vunpack.c.l.b16 %v1903_v49 }
 0x172   : > { %v885_v2 = vadd.f32 %v884_v55, %v7285_v37 }
 0x173   : > { %v1195_v3 = vor.u32 %v1193_v53, %v1192_v51  ;;  %v939_v4 = vmax.f32 %v796_v54, 0.0  ;;  %v2192_v9 = vpack.c.b16 %v2176_v61, %v2176_v61  ;;  %v1196_v39 = vrot.slane %v1192_v51, 4 }
 0x174   : > { %v6139_v11 = vpack.c.bf16 %v885_v2, %v883_v47 }
 0x175   : > { %v1436_v13 = vsel %vm7262_vm5, %v1195_v3, %v1435_v63  ;;  %v1035_v19 = vpack.c.bf16 %v939_v4, %v939_v4  ;;  %v2294_v17 = vshll.u32 %v2192_v9, 16  ;;  %v2481_v18 = vrot.slane %v2192_v9, 1  ;;  %v6456_v3 = vld [vmem:[#allocation2 + $0x18] sm:$0xf0]  ;;  %v1442_v4 = vld [vmem:[#allocation2 + $0x78] sm:$0xf] }
 0x176   : > { %1437 = vst [vmem:[#allocation2 + $0x6c] sm:$0xf] %v1436_v13  ;;  %v7517_v43 = vld [vmem:[#allocation2 + $0x60] sm:$0xff]   ;;  %v6457_v13 = vld [vmem:[#allocation2 + $0x18] sm:$0xe] }
 0x177   : > { %v1834_v20 = vld [vmem:[#allocation2 + $0x68] sm:$0xf]  ;;  %v1198_v21 = vshrl.u32 %v1035_v19, 16  ;;  %6423 = vst [vmem:[%s7294_s17 + $0x40] sm:$0xff] %v6139_v11   ;;  %v2296_v26 = vrot.slane %v2294_v17, 1  ;;  %v7511_v27 = vsel %vm2458_vm9, %v2480_v15, %v2481_v18  ;;  %v1201_v30 = vshll.u32 %v1035_v19, 16  ;;  %4079 = vmatmul.bf16.gmra.mxu2 %v7517_v43 }
 0x178   : > { %v1835_v28 = vsel %vm7262_vm5, 0, %v1834_v20  ;;  %v798_v12 = vpop.f32.mrf.mxu0  ;;  %v7534_v19 = vld [vmem:[#allocation2 + $0x24] sm:$0xff]   ;;  %v6458_v20 = vor.u32 %v6457_v13, %v6456_v3 }
 0x179   : > { %1836 = vst [vmem:[#allocation2 + $0x68] sm:$0xf] %v1835_v28  ;;  %v1200_v29 = vrot.slane %v1198_v21, 7  ;;  %v799_v32 = vadd.f32 %v798_v12, %v7281_v31  ;;  %v887_v34 = vpop.f32.mrf.mxu1  ;;  %v2297_v35 = vsel %vm2201_vm6, %v2292_v22, %v2296_v26  ;;  %v7536_v17 = vld [vmem:[#allocation2 + $0x24] sm:$0xf0]  ;;  %v2299_v22 = vshrl.u32 %v7517_v43, 16  ;;  %v7542_v12 = vpop.f32.mrf.mxu2 }
 0x17a   : > { %4163 = vmatmul.bf16.gmra.mxu3 %v2297_v35 }
 0x17b   : > { %v1203_v40 = vor.u32 %v1201_v30, %v1200_v29  ;;  %v1205_v41 = vrot.slane %v1200_v29, 4  ;;  %v940_v42 = vmax.f32 %v799_v32, 0.0  ;;  %4222 = vmatmul.bf16.gmra.mxu0 %v7339_v23  ;;  %v2301_v23 = vshll.u32 %v7517_v43, 16 }
 0x17c   : > { %4311 = vmatmul.bf16.gmra.mxu1 %v7345_v33  ;;  %v888_v33 = vadd.f32 %v887_v34, %v7285_v37  ;;  %v2466_v32 = vrot.slane %v7358_v60, 1 }
 0x17d   : > { %v1783_v44 = vld [vmem:[#allocation2 + $0x6c] sm:$0x1]  ;;  %v1204_v45 = vsel %vm7300_vm8, %v1196_v39, %v1203_v40  ;;  %v1440_v46 = vsel %vm7256_vm2, %v1205_v41, %v1439_v36  ;;  %v1036_v47 = vpack.c.bf16 %v940_v42, %v940_v42  ;;  %v2303_v11 = vrot.slane %v2301_v23, 1 }
 0x17e   : > { %v1784_v48 = vsel %vm7256_vm2, 0, %v1783_v44  ;;  %1438 = vst [vmem:[#allocation2 + $0x70] sm:$0xf] %v1204_v45  ;;  %v2465_v42 = vrot.slane %v6458_v20, 1 }
 0x17f   : > { %1785 = vst [vmem:[#allocation2 + $0x6c] sm:$0x1] %v1784_v48  ;;  %v1207_v49 = vshrl.u32 %v1036_v47, 16  ;;  %v1210_v55 = vshll.u32 %v1036_v47, 16  ;;  %v7550_v36 = vor.u32 %v2303_v11, %v2299_v22  ;;  %v1446_v48 = vld [vmem:[#allocation2 + $0x80] sm:$0x1] }
 0x180   : > { %1441 = vst [vmem:[#allocation2 + $0x74] sm:$0x1] %v1440_v46  ;;  %v800_v51 = vpop.f32.mrf.mxu0  ;;  %v1904_v53 = vld [vmem:[#allocation2 + $0x68] sm:$0x1] }
 0x181   : > { %v1209_v54 = vrot.slane %v1207_v49, 7  ;;  %v801_v61 = vadd.f32 %v800_v51, %v7281_v31  ;;  %v889_v63 = vpop.f32.mrf.mxu1  ;;  %v2177_v2 = vunpack.c.l.b16 %v1904_v53  ;;  %8633 = vst [vmem:[#allocation30_spill] sm:$0xff] %v7550_v36  ;;  %v2467_v49 = vsel %vm2458_vm9, %v2465_v42, %v2466_v32 }
 0x182   : > { %v890_v9 = vadd.f32 %v889_v63, %v7285_v37 }
 0x183   : > { %v1212_v62 = vor.u32 %v1210_v55, %v1209_v54  ;;  %v941_v14 = vmax.f32 %v801_v61, 0.0  ;;  %v7532_v15 = vpack.c.b16 %v2177_v2, %v2177_v2  ;;  %v1213_v23 = vrot.slane %v1209_v54, 4  ;;  %v6682_v2 = vld [vmem:[#allocation2 + $0x6c] sm:$0xe] }
 0x184   : > { %v6144_v18 = vpack.c.bf16 %v890_v9, %v888_v33 }
 0x185   : > { %v1443_v21 = vsel %vm7262_vm5, %v1212_v62, %v1442_v4  ;;  %v1037_v26 = vpack.c.bf16 %v941_v14, %v941_v14  ;;  %v2306_v28 = vshll.u32 %v7532_v15, 16  ;;  %v7546_v30 = vld [vmem:[#allocation2 + $0x6c] sm:$0xf0]  ;;  %v6049_v62 = vld [vmem:[#allocation11 + $0x110] sm:$0xff] }
 0x186   : > { %1444 = vst [vmem:[#allocation2 + $0x78] sm:$0xf] %v1443_v21  ;;  %v7544_v29 = vld [vmem:[#allocation2 + $0x6c] sm:$0xff]   ;;  %4392 = vmatpush.bf16.msrb.mxu2 %v6049_v62 }
 0x187   : > { %v1837_v34 = vld [vmem:[#allocation2 + $0x74] sm:$0xf]  ;;  %v1215_v35 = vshrl.u32 %v1037_v26, 16  ;;  %6424 = vst [vmem:[%s7294_s17 + $0x48] sm:$0xff] %v6144_v18   ;;  %v2308_v39 = vrot.slane %v2306_v28, 1  ;;  %v1218_v45 = vshll.u32 %v1037_v26, 16  ;;  %4084 = vmatmul.bf16.gmra.mxu2 %v7544_v29 }
 0x188   : > { %v1838_v40 = vsel %vm7262_vm5, 0, %v1837_v34  ;;  %v803_v41 = vpop.f32.mrf.mxu0  ;;  %v2313_v9 = vshll.u32 %v7544_v29, 16  ;;  %v1449_v28 = vld [vmem:[#allocation2 + $0x84] sm:$0xf]  ;;  %v6683_v34 = vor.u32 %v6682_v2, %v7546_v30 }
 0x189   : > { %1839 = vst [vmem:[#allocation2 + $0x74] sm:$0xf] %v1838_v40  ;;  %v1217_v44 = vrot.slane %v1215_v35, 7  ;;  %v804_v46 = vadd.f32 %v803_v41, %v7281_v31  ;;  %v892_v47 = vpop.f32.mrf.mxu1  ;;  %v2309_v60 = vsel %vm2201_vm6, %v7550_v36, %v2308_v39 }
 0x18a   : > { %4168 = vmatmul.bf16.gmra.mxu3 %v2309_v60  ;;  %v4045_v3 = vpop.f32.mrf.mxu2  ;;  %v893_v11 = vadd.f32 %v892_v47, %v7285_v37  ;;  %v2315_v41 = vrot.slane %v2313_v9, 1  ;;  %v1453_v9 = vld [vmem:[#allocation2 + $0x8c] sm:$0x1] }
 0x18b   : > { %v1220_v50 = vor.u32 %v1218_v45, %v1217_v44  ;;  %v1222_v33 = vrot.slane %v1217_v44, 4  ;;  %v942_v51 = vmax.f32 %v804_v46, 0.0  ;;  %4227 = vmatmul.bf16.gmra.mxu0 %v2467_v49  ;;  %v2311_v44 = vshrl.u32 %v7544_v29, 16  ;;  %v7572_v45 = vpop.f32.mrf.mxu3 }
 0x18c   : > { %4316 = vmatmul.bf16.gmra.mxu1 %v7534_v19 }
 0x18d   : > { %v1786_v53 = vld [vmem:[#allocation2 + $0x78] sm:$0x1]  ;;  %v1221_v55 = vsel %vm7300_vm8, %v1213_v23, %v1220_v50  ;;  %v1447_v61 = vsel %vm7256_vm2, %v1222_v33, %v1446_v48  ;;  %v1038_v63 = vpack.c.bf16 %v942_v51, %v942_v51  ;;  %v2486_v23 = vrot.slane %v6683_v34, 1 }
 0x18e   : > { %v1787_v54 = vsel %vm7256_vm2, 0, %v1786_v53  ;;  %1445 = vst [vmem:[#allocation2 + $0x7c] sm:$0xf] %v1221_v55  ;;  %v2316_v33 = vor.u32 %v2315_v41, %v2311_v44 }
 0x18f   : > { %1788 = vst [vmem:[#allocation2 + $0x78] sm:$0x1] %v1787_v54  ;;  %v1224_v4 = vshrl.u32 %v1038_v63, 16  ;;  %v1227_v20 = vshll.u32 %v1038_v63, 16 }
 0x190   : > { %1448 = vst [vmem:[#allocation2 + $0x80] sm:$0x1] %v1447_v61  ;;  %v805_v14 = vpop.f32.mrf.mxu0  ;;  %v1905_v13 = vld [vmem:[#allocation2 + $0x74] sm:$0x1] }
 0x191   : > { %v1226_v18 = vrot.slane %v1224_v4, 7  ;;  %v806_v21 = vadd.f32 %v805_v14, %v7281_v31  ;;  %v894_v22 = vpop.f32.mrf.mxu1  ;;  %v2178_v26 = vunpack.c.l.b16 %v1905_v13 }
 0x192   : > { %v895_v32 = vadd.f32 %v894_v22, %v7285_v37  ;;  %v4047_v49 = vpop.f32.mrf.mxu2 }
 0x193   : > { %v1229_v35 = vor.u32 %v1227_v20, %v1226_v18  ;;  %v943_v39 = vmax.f32 %v806_v21, 0.0  ;;  %v2194_v40 = vpack.c.b16 %v2178_v26, %v2178_v26  ;;  %v1230_v62 = vrot.slane %v1226_v18, 4 }
 0x194   : > { %v6149_v42 = vpack.c.bf16 %v895_v32, %v893_v11  ;;  %v4046_v21 = vadd.f32 %v7464_v38, %v4045_v3 }
 0x195   : > { %v1450_v46 = vsel %vm7262_vm5, %v1229_v35, %v1449_v28  ;;  %v1039_v47 = vpack.c.bf16 %v943_v39, %v943_v39  ;;  %v2318_v60 = vshll.u32 %v2194_v40, 16  ;;  %v2487_v48 = vrot.slane %v2194_v40, 1  ;;  %v6061_v39 = vld [vmem:[#allocation11 + $0x170] sm:$0xff] }
 0x196   : > { %1451 = vst [vmem:[#allocation2 + $0x84] sm:$0xf] %v1450_v46  ;;  %v7584_v20 = vld [vmem:[#allocation2 + $0x78] sm:$0xff]   ;;  %4477 = vmatpush.bf16.msrb.mxu3 %v6061_v39 }
 0x197   : > { %v1840_v30 = vld [vmem:[#allocation2 + $0x80] sm:$0xf]  ;;  %v1232_v50 = vshrl.u32 %v1039_v47, 16  ;;  %6425 = vst [vmem:[%s7294_s17 + $0x50] sm:$0xff] %v6149_v42   ;;  %v2320_v51 = vrot.slane %v2318_v60, 1  ;;  %v7580_v55 = vsel %vm2458_vm9, %v2486_v23, %v2487_v48  ;;  %v1235_v63 = vshll.u32 %v1039_v47, 16  ;;  %4089 = vmatmul.bf16.gmra.mxu2 %v7584_v20 }
 0x198   : > { %v1841_v53 = vsel %vm7262_vm5, 0, %v1840_v30  ;;  %v808_v29 = vpop.f32.mrf.mxu0  ;;  %v6459_v23 = vld [vmem:[#allocation2 + $0x30] sm:$0xf0]  ;;  %v1456_v30 = vld [vmem:[#allocation2 + $0x90] sm:$0xf] }
 0x199   : > { %1842 = vst [vmem:[#allocation2 + $0x80] sm:$0xf] %v1841_v53  ;;  %v1234_v61 = vrot.slane %v1232_v50, 7  ;;  %v809_v2 = vadd.f32 %v808_v29, %v7281_v31  ;;  %v897_v54 = vpop.f32.mrf.mxu1  ;;  %v2321_v4 = vsel %vm2201_vm6, %v2316_v33, %v2320_v51 }
 0x19a   : > { %4173 = vmatmul.bf16.gmra.mxu3 %v2321_v4  ;;  %v4050_v3 = vpop.f32.mrf.mxu2  ;;  %v898_v40 = vadd.f32 %v897_v54, %v7285_v37  ;;  %v4048_v54 = vadd.f32 %v7464_v38, %v4047_v49  ;;  %v2472_v49 = vrot.slane %v7411_v52, 1 }
 0x19b   : > { %v1237_v11 = vor.u32 %v1235_v63, %v1234_v61  ;;  %v1239_v14 = vrot.slane %v1234_v61, 4  ;;  %v944_v13 = vmax.f32 %v809_v2, 0.0  ;;  %4232 = vmatmul.bf16.gmra.mxu0 %v7392_v7  ;;  %v6460_v61 = vld [vmem:[#allocation2 + $0x30] sm:$0xe]  ;;  %v7604_v63 = vld [vmem:[#allocation2 + $0x3c] sm:$0xff]  }
 0x19c   : > { %4321 = vmatmul.bf16.gmra.mxu1 %v7398_v24  ;;  %v2325_v24 = vshll.u32 %v7584_v20, 16  ;;  %v7606_v2 = vld [vmem:[#allocation2 + $0x3c] sm:$0xf0] }
 0x19d   : > { %v1789_v22 = vld [vmem:[#allocation2 + $0x84] sm:$0x1]  ;;  %v1238_v26 = vsel %vm7300_vm8, %v1230_v62, %v1237_v11  ;;  %v1454_v18 = vsel %vm7256_vm2, %v1239_v14, %v1453_v9  ;;  %v1040_v28 = vpack.c.bf16 %v944_v13, %v944_v13  ;;  %v4134_v32 = vpop.f32.mrf.mxu3  ;;  %v6461_v9 = vor.u32 %v6460_v61, %v6459_v23 }
 0x19e   : > { %v1790_v34 = vsel %vm7256_vm2, 0, %v1789_v22  ;;  %1452 = vst [vmem:[#allocation2 + $0x88] sm:$0xf] %v1238_v26  ;;  %v7596_v7 = vadd.f32 %v4134_v32, %v4046_v21  ;;  %v2327_v51 = vrot.slane %v2325_v24, 1  ;;  %v2323_v11 = vshrl.u32 %v7584_v20, 16 }
 0x19f   : > { %1791 = vst [vmem:[#allocation2 + $0x84] sm:$0x1] %v1790_v34  ;;  %v1241_v35 = vshrl.u32 %v1040_v28, 16  ;;  %v1244_v46 = vshll.u32 %v1040_v28, 16  ;;  %v4051_v61 = vadd.f32 %v7464_v38, %v4050_v3 }
 0x1a0   : > { %1455 = vst [vmem:[#allocation2 + $0x8c] sm:$0x1] %v1454_v18  ;;  %v810_v41 = vpop.f32.mrf.mxu0  ;;  %v1906_v42 = vld [vmem:[#allocation2 + $0x80] sm:$0x1] }
 0x1a1   : > { %v1243_v44 = vrot.slane %v1241_v35, 7  ;;  %v811_v47 = vadd.f32 %v810_v41, %v7281_v31  ;;  %v899_v60 = vpop.f32.mrf.mxu1  ;;  %v2179_v48 = vunpack.c.l.b16 %v1906_v42  ;;  %v7619_v35 = vor.u32 %v2327_v51, %v2323_v11 }
 0x1a2   : > { %v900_v50 = vadd.f32 %v899_v60, %v7285_v37  ;;  %v4052_v26 = vpop.f32.mrf.mxu2  ;;  %v2471_v41 = vrot.slane %v6461_v9, 1 }
 0x1a3   : > { %v1246_v33 = vor.u32 %v1244_v46, %v1243_v44  ;;  %v945_v53 = vmax.f32 %v811_v47, 0.0  ;;  %v7602_v29 = vpack.c.b16 %v2179_v48, %v2179_v48  ;;  %8634 = vst [vmem:[#allocation31_spill] sm:$0xff] %v7619_v35  ;;  %v1460_v48 = vld [vmem:[#allocation2 + $0x98] sm:$0x1] }
 0x1a4   : > { %v6154_v4 = vpack.c.bf16 %v900_v50, %v898_v40  ;;  %v2473_v23 = vsel %vm2458_vm9, %v2471_v41, %v2472_v49  ;;  %v6048_v49 = vld [vmem:[#allocation11 + $0x108] sm:$0xff] }
 0x1a5   : > { %v1457_v62 = vsel %vm7262_vm5, %v1246_v33, %v1456_v30  ;;  %v1041_v14 = vpack.c.bf16 %v945_v53, %v945_v53  ;;  %v4136_v13 = vpop.f32.mrf.mxu3  ;;  %v2330_v21 = vshll.u32 %v7602_v29, 16  ;;  %v6684_v28 = vld [vmem:[#allocation2 + $0x84] sm:$0xf0]  ;;  %v1247_v30 = vrot.slane %v1243_v44, 4  ;;  %v6685_v53 = vld [vmem:[#allocation2 + $0x84] sm:$0xe]  ;;  %4393 = vmatpush.bf16.msrb.mxu2 %v6048_v49 }
 0x1a6   : > { %1458 = vst [vmem:[#allocation2 + $0x90] sm:$0xf] %v1457_v62  ;;  %v7613_v22 = vadd.f32 %v4136_v13, %v4048_v54  ;;  %v7615_v18 = vld [vmem:[#allocation2 + $0x84] sm:$0xff]  }
 0x1a7   : > { %v1843_v32 = vld [vmem:[#allocation2 + $0x8c] sm:$0xf]  ;;  %v1249_v34 = vshrl.u32 %v1041_v14, 16  ;;  %6426 = vst [vmem:[%s7294_s17 + $0x58] sm:$0xff] %v6154_v4   ;;  %v2332_v24 = vrot.slane %v2330_v21, 1  ;;  %v1252_v46 = vshll.u32 %v1041_v14, 16  ;;  %4094 = vmatmul.bf16.gmra.mxu2 %v7615_v18 }
 0x1a8   : > { %v1844_v39 = vsel %vm7262_vm5, 0, %v1843_v32  ;;  %v813_v40 = vpop.f32.mrf.mxu0  ;;  %v2337_v21 = vshll.u32 %v7615_v18, 16 }
 0x1a9   : > { %1845 = vst [vmem:[#allocation2 + $0x8c] sm:$0xf] %v1844_v39  ;;  %v1251_v42 = vrot.slane %v1249_v34, 7  ;;  %v814_v47 = vadd.f32 %v813_v40, %v7281_v31  ;;  %v902_v60 = vpop.f32.mrf.mxu1  ;;  %v2333_v52 = vsel %vm2201_vm6, %v7619_v35, %v2332_v24  ;;  %v6686_v39 = vor.u32 %v6685_v53, %v6684_v28 }
 0x1aa   : > { %4178 = vmatmul.bf16.gmra.mxu3 %v2333_v52  ;;  %v4055_v13 = vpop.f32.mrf.mxu2  ;;  %v903_v32 = vadd.f32 %v902_v60, %v7285_v37  ;;  %v1463_v52 = vld [vmem:[#allocation2 + $0x9c] sm:$0xf]  ;;  %v4053_v60 = vadd.f32 %v7464_v38, %v4052_v26  ;;  %v2335_v28 = vshrl.u32 %v7615_v18, 16 }
 0x1ab   : > { %v1254_v50 = vor.u32 %v1252_v46, %v1251_v42  ;;  %v1256_v33 = vrot.slane %v1251_v42, 4  ;;  %v946_v51 = vmax.f32 %v814_v47, 0.0  ;;  %4237 = vmatmul.bf16.gmra.mxu0 %v2473_v23  ;;  %v2492_v53 = vrot.slane %v6686_v39, 1 }
 0x1ac   : > { %4326 = vmatmul.bf16.gmra.mxu1 %v7604_v63 }
 0x1ad   : > { %v1792_v54 = vld [vmem:[#allocation2 + $0x90] sm:$0x1]  ;;  %v1255_v4 = vsel %vm7300_vm8, %v1247_v30, %v1254_v50  ;;  %v1461_v9 = vsel %vm7256_vm2, %v1256_v33, %v1460_v48  ;;  %v1042_v62 = vpack.c.bf16 %v946_v51, %v946_v51  ;;  %v4139_v44 = vpop.f32.mrf.mxu3  ;;  %v2339_v33 = vrot.slane %v2337_v21, 1 }
 0x1ae   : > { %v1793_v11 = vsel %vm7256_vm2, 0, %v1792_v54  ;;  %1459 = vst [vmem:[#allocation2 + $0x94] sm:$0xf] %v1255_v4  ;;  %v7636_v14 = vadd.f32 %v4139_v44, %v4051_v61 }
 0x1af   : > { %1794 = vst [vmem:[#allocation2 + $0x90] sm:$0x1] %v1793_v11  ;;  %v1258_v3 = vshrl.u32 %v1042_v62, 16  ;;  %v1261_v41 = vshll.u32 %v1042_v62, 16  ;;  %v2340_v49 = vor.u32 %v2339_v33, %v2335_v28  ;;  %v4056_v33 = vadd.f32 %v7464_v38, %v4055_v13 }
 0x1b0   : > { %1462 = vst [vmem:[#allocation2 + $0x98] sm:$0x1] %v1461_v9  ;;  %v815_v34 = vpop.f32.mrf.mxu0  ;;  %v1907_v24 = vld [vmem:[#allocation2 + $0x8c] sm:$0x1] }
 0x1b1   : > { %v1260_v40 = vrot.slane %v1258_v3, 7  ;;  %v816_v42 = vadd.f32 %v815_v34, %v7281_v31  ;;  %v904_v46 = vpop.f32.mrf.mxu1  ;;  %v2180_v47 = vunpack.c.l.b16 %v1907_v24 }
 0x1b2   : > { %v905_v48 = vadd.f32 %v904_v46, %v7285_v37  ;;  %v4057_v21 = vpop.f32.mrf.mxu2 }
 0x1b3   : > { %v1263_v23 = vor.u32 %v1261_v41, %v1260_v40  ;;  %v947_v30 = vmax.f32 %v816_v42, 0.0  ;;  %v2196_v50 = vpack.c.b16 %v2180_v47, %v2180_v47  ;;  %v1467_v47 = vld [vmem:[#allocation2 + $0xa4] sm:$0x1] }
 0x1b4   : > { %v6159_v51 = vpack.c.bf16 %v905_v48, %v903_v32 }
 0x1b5   : > { %v1464_v61 = vsel %vm7262_vm5, %v1263_v23, %v1463_v52  ;;  %v1043_v54 = vpack.c.bf16 %v947_v30, %v947_v30  ;;  %v4141_v4 = vpop.f32.mrf.mxu3  ;;  %v2342_v9 = vshll.u32 %v2196_v50, 16  ;;  %v2493_v62 = vrot.slane %v2196_v50, 1 }
 0x1b6   : > { %1465 = vst [vmem:[#allocation2 + $0x9c] sm:$0xf] %v1464_v61  ;;  %v7646_v44 = vadd.f32 %v4141_v4, %v4053_v60  ;;  %v1264_v52 = vrot.slane %v1260_v40, 4  ;;  %v7656_v50 = vld [vmem:[#allocation2 + $0x90] sm:$0xff]   ;;  %v6060_v4 = vld [vmem:[#allocation11 + $0x168] sm:$0xff] }
 0x1b7   : > { %v1846_v11 = vld [vmem:[#allocation2 + $0x98] sm:$0xf]  ;;  %v1266_v3 = vshrl.u32 %v1043_v54, 16  ;;  %6427 = vst [vmem:[%s7294_s17 + $0x60] sm:$0xff] %v6159_v51   ;;  %v2344_v26 = vrot.slane %v2342_v9, 1  ;;  %v7650_v32 = vsel %vm2458_vm9, %v2492_v53, %v2493_v62  ;;  %v1269_v39 = vshll.u32 %v1043_v54, 16  ;;  %4099 = vmatmul.bf16.gmra.mxu2 %v7656_v50  ;;  %4478 = vmatpush.bf16.msrb.mxu3 %v6060_v4 }
 0x1b8   : > { %v1847_v18 = vsel %vm7262_vm5, 0, %v1846_v11  ;;  %v818_v34 = vpop.f32.mrf.mxu0  ;;  %v2349_v54 = vshll.u32 %v7656_v50, 16 }
 0x1b9   : > { %1848 = vst [vmem:[#allocation2 + $0x98] sm:$0xf] %v1847_v18  ;;  %v1268_v24 = vrot.slane %v1266_v3, 7  ;;  %v819_v41 = vadd.f32 %v818_v34, %v7281_v31  ;;  %v907_v42 = vpop.f32.mrf.mxu1  ;;  %v2345_v46 = vsel %vm2201_vm6, %v2340_v49, %v2344_v26 }
 0x1ba   : > { %4183 = vmatmul.bf16.gmra.mxu3 %v2345_v46  ;;  %v908_v9 = vadd.f32 %v907_v42, %v7285_v37  ;;  %v7676_v42 = vld [vmem:[#allocation2 + $0x54] sm:$0xff]  }
 0x1bb   : > { %v1271_v48 = vor.u32 %v1269_v39, %v1268_v24  ;;  %v1273_v23 = vrot.slane %v1268_v24, 4  ;;  %v948_v30 = vmax.f32 %v819_v41, 0.0  ;;  %4242 = vmatmul.bf16.gmra.mxu0 %v7445_v10  ;;  %v6462_v24 = vld [vmem:[#allocation2 + $0x48] sm:$0xf0]  ;;  %v1470_v39 = vld [vmem:[#allocation2 + $0xa8] sm:$0xf] }
 0x1bc   : > { %4331 = vmatmul.bf16.gmra.mxu1 %v7451_v25  ;;  %v4060_v25 = vpop.f32.mrf.mxu2 }
 0x1bd   : > { %v1795_v60 = vld [vmem:[#allocation2 + $0x9c] sm:$0x1]  ;;  %v1272_v51 = vsel %vm7300_vm8, %v1264_v52, %v1271_v48  ;;  %v1468_v40 = vsel %vm7256_vm2, %v1273_v23, %v1467_v47  ;;  %v1044_v28 = vpack.c.bf16 %v948_v30, %v948_v30  ;;  %v4144_v53 = vpop.f32.mrf.mxu3  ;;  %v2351_v47 = vrot.slane %v2349_v54, 1  ;;  %v6463_v23 = vld [vmem:[#allocation2 + $0x48] sm:$0xe] }
 0x1be   : > { %v1796_v61 = vsel %vm7256_vm2, 0, %v1795_v60  ;;  %1466 = vst [vmem:[#allocation2 + $0xa0] sm:$0xf] %v1272_v51  ;;  %v7668_v10 = vadd.f32 %v4144_v53, %v4056_v33  ;;  %v7678_v30 = vld [vmem:[#allocation2 + $0x54] sm:$0xf0]  ;;  %v4058_v33 = vadd.f32 %v7464_v38, %v4057_v21  ;;  %v6464_v51 = vor.u32 %v6463_v23, %v6462_v24 }
 0x1bf   : > { %1797 = vst [vmem:[#allocation2 + $0x9c] sm:$0x1] %v1796_v61  ;;  %v1275_v13 = vshrl.u32 %v1044_v28, 16  ;;  %v1278_v49 = vshll.u32 %v1044_v28, 16  ;;  %v2347_v28 = vshrl.u32 %v7656_v50, 16  ;;  %v2478_v21 = vrot.slane %v7470_v56, 1 }
 0x1c0   : > { %1469 = vst [vmem:[#allocation2 + $0xa4] sm:$0x1] %v1468_v40  ;;  %v820_v62 = vpop.f32.mrf.mxu0  ;;  %v1908_v11 = vld [vmem:[#allocation2 + $0x98] sm:$0x1] }
 0x1c1   : > { %v1277_v3 = vrot.slane %v1275_v13, 7  ;;  %v821_v26 = vadd.f32 %v820_v62, %v7281_v31  ;;  %v909_v18 = vpop.f32.mrf.mxu1  ;;  %v2181_v34 = vunpack.c.l.b16 %v1908_v11 }
 0x1c2   : > { %v910_v41 = vadd.f32 %v909_v18, %v7285_v37 }
 0x1c3   : > { %v1280_v46 = vor.u32 %v1278_v49, %v1277_v3  ;;  %v949_v52 = vmax.f32 %v821_v26, 0.0  ;;  %v7674_v48 = vpack.c.b16 %v2181_v34, %v2181_v34 }
 0x1c4   : > { %v6164_v60 = vpack.c.bf16 %v910_v41, %v908_v9  ;;  %v7690_v9 = vor.u32 %v2351_v47, %v2347_v28  ;;  %v4062_v26 = vpop.f32.mrf.mxu2  ;;  %v1474_v47 = vld [vmem:[#allocation2 + $0xb0] sm:$0x1] }
 0x1c5   : > { %v1471_v40 = vsel %vm7262_vm5, %v1280_v46, %v1470_v39  ;;  %v1045_v53 = vpack.c.bf16 %v949_v52, %v949_v52  ;;  %v4146_v61 = vpop.f32.mrf.mxu3  ;;  %v2354_v13 = vshll.u32 %v7674_v48, 16  ;;  %v6687_v62 = vld [vmem:[#allocation2 + $0x9c] sm:$0xf0]  ;;  %v2477_v39 = vrot.slane %v6464_v51, 1 }
 0x1c6   : > { %1472 = vst [vmem:[#allocation2 + $0xa8] sm:$0xf] %v1471_v40  ;;  %v7685_v54 = vadd.f32 %v4146_v61, %v4058_v33  ;;  %v7687_v4 = vld [vmem:[#allocation2 + $0x9c] sm:$0xff]   ;;  %v4061_v51 = vadd.f32 %v7464_v38, %v4060_v25 }
 0x1c7   : > { %v1849_v11 = vld [vmem:[#allocation2 + $0xa4] sm:$0xf]  ;;  %8635 = vst [vmem:[#allocation32_spill] sm:$0xff] %v7690_v9  ;;  %v1283_v49 = vshrl.u32 %v1045_v53, 16  ;;  %v2356_v18 = vrot.slane %v2354_v13, 1  ;;  %v1286_v46 = vshll.u32 %v1045_v53, 16  ;;  %v2479_v33 = vsel %vm2458_vm9, %v2477_v39, %v2478_v21  ;;  %4104 = vmatmul.bf16.gmra.mxu2 %v7687_v4 }
 0x1c8   : > { %6428 = vst [vmem:[%s7294_s17 + $0x68] sm:$0xff] %v6164_v60   ;;  %v1850_v34 = vsel %vm7262_vm5, 0, %v1849_v11  ;;  %v823_v24 = vpop.f32.mrf.mxu0  ;;  %v1281_v60 = vrot.slane %v1277_v3, 4  ;;  %v6688_v13 = vld [vmem:[#allocation2 + $0x9c] sm:$0xe] }
 0x1c9   : > { %1851 = vst [vmem:[#allocation2 + $0xa4] sm:$0xf] %v1850_v34  ;;  %v1285_v41 = vrot.slane %v1283_v49, 7  ;;  %v824_v52 = vadd.f32 %v823_v24, %v7281_v31  ;;  %v912_v23 = vpop.f32.mrf.mxu1  ;;  %v2357_v56 = vsel %vm2201_vm6, %v7690_v9, %v2356_v18  ;;  %v2361_v24 = vshll.u32 %v7687_v4, 16 }
 0x1ca   : > { %4188 = vmatmul.bf16.gmra.mxu3 %v2357_v56 }
 0x1cb   : > { %v1288_v40 = vor.u32 %v1286_v46, %v1285_v41  ;;  %v1290_v28 = vrot.slane %v1285_v41, 4  ;;  %v950_v61 = vmax.f32 %v824_v52, 0.0  ;;  %4247 = vmatmul.bf16.gmra.mxu0 %v2479_v33  ;;  %v6047_v41 = vld [vmem:[#allocation11 + $0x100] sm:$0xff]  ;;  %v913_v46 = vadd.f32 %v912_v23, %v7285_v37 }
 0x1cc   : > { %4336 = vmatmul.bf16.gmra.mxu1 %v7676_v42  ;;  %v4065_v39 = vpop.f32.mrf.mxu2  ;;  %4394 = vmatpush.bf16.msrb.mxu2 %v6047_v41  ;;  %v4063_v23 = vadd.f32 %v7464_v38, %v4062_v26 }
 0x1cd   : > { %v1798_v53 = vld [vmem:[#allocation2 + $0xa8] sm:$0x1]  ;;  %v1289_v11 = vsel %vm7300_vm8, %v1281_v60, %v1288_v40  ;;  %v1475_v49 = vsel %vm7256_vm2, %v1290_v28, %v1474_v47  ;;  %v1046_v21 = vpack.c.bf16 %v950_v61, %v950_v61  ;;  %v4149_v3 = vpop.f32.mrf.mxu3  ;;  %v6689_v47 = vor.u32 %v6688_v13, %v6687_v62 }
 0x1ce   : > { %v1799_v18 = vsel %vm7256_vm2, 0, %v1798_v53  ;;  %1473 = vst [vmem:[#allocation2 + $0xac] sm:$0xf] %v1289_v11  ;;  %v7708_v34 = vadd.f32 %v4149_v3, %v4061_v51  ;;  %v1477_v51 = vld [vmem:[#allocation2 + $0xb4] sm:$0xf]  ;;  %v2359_v62 = vshrl.u32 %v7687_v4, 16 }
 0x1cf   : > { %1800 = vst [vmem:[#allocation2 + $0xa8] sm:$0x1] %v1799_v18  ;;  %v1292_v25 = vshrl.u32 %v1046_v21, 16  ;;  %v1295_v60 = vshll.u32 %v1046_v21, 16  ;;  %v2498_v13 = vrot.slane %v6689_v47, 1 }
 0x1d0   : > { %1476 = vst [vmem:[#allocation2 + $0xb0] sm:$0x1] %v1475_v49  ;;  %v825_v52 = vpop.f32.mrf.mxu0  ;;  %v1909_v56 = vld [vmem:[#allocation2 + $0xa4] sm:$0x1]  ;;  %v2363_v49 = vrot.slane %v2361_v24, 1 }
 0x1d1   : > { %v1294_v33 = vrot.slane %v1292_v25, 7  ;;  %v826_v40 = vadd.f32 %v825_v52, %v7281_v31  ;;  %v914_v28 = vpop.f32.mrf.mxu1  ;;  %v2182_v61 = vunpack.c.l.b16 %v1909_v56 }
 0x1d2   : > { %v915_v53 = vadd.f32 %v914_v28, %v7285_v37  ;;  %v2364_v38 = vor.u32 %v2363_v49, %v2359_v62 }
 0x1d3   : > { %v1297_v11 = vor.u32 %v1295_v60, %v1294_v33  ;;  %v951_v3 = vmax.f32 %v826_v40, 0.0  ;;  %v2198_v18 = vpack.c.b16 %v2182_v61, %v2182_v61  ;;  %v6059_v61 = vld [vmem:[#allocation11 + $0x160] sm:$0xff]  ;;  %v1298_v49 = vrot.slane %v1294_v33, 4 }
 0x1d4   : > { %v6169_v9 = vpack.c.bf16 %v915_v53, %v913_v46  ;;  %v7721_v24 = vpop.f32.mrf.mxu2  ;;  %4479 = vmatpush.bf16.msrb.mxu3 %v6059_v61 }
 0x1d5   : > { %v1478_v21 = vsel %vm7262_vm5, %v1297_v11, %v1477_v51  ;;  %v1047_v25 = vpack.c.bf16 %v951_v3, %v951_v3  ;;  %v4151_v52 = vpop.f32.mrf.mxu3  ;;  %v2366_v41 = vshll.u32 %v2198_v18, 16  ;;  %v2499_v56 = vrot.slane %v2198_v18, 1  ;;  %v1481_v18 = vld [vmem:[#allocation2 + $0xbc] sm:$0x1] }
 0x1d6   : > { %1479 = vst [vmem:[#allocation2 + $0xb4] sm:$0xf] %v1478_v21  ;;  %v7718_v28 = vadd.f32 %v4151_v52, %v4063_v23  ;;  %v7730_v21 = vld [vmem:[#allocation2 + $0xa8] sm:$0xff]   ;;  %v6058_v52 = vld [vmem:[#allocation11 + $0x158] sm:$0xff] }
 0x1d7   : > { %v1852_v60 = vld [vmem:[#allocation2 + $0xb0] sm:$0xf]  ;;  %v1300_v40 = vshrl.u32 %v1047_v25, 16  ;;  %6429 = vst [vmem:[%s7294_s17 + $0x70] sm:$0xff] %v6169_v9   ;;  %v2368_v26 = vrot.slane %v2366_v41, 1  ;;  %v7724_v4 = vsel %vm2458_vm9, %v2498_v13, %v2499_v56  ;;  %v1303_v53 = vshll.u32 %v1047_v25, 16  ;;  %4109 = vmatmul.bf16.gmra.mxu2 %v7730_v21 }
 0x1d8   : > { %v1853_v46 = vsel %vm7262_vm5, 0, %v1852_v60  ;;  %v828_v47 = vpop.f32.mrf.mxu0  ;;  %v7736_v25 = vld [vmem:[%s8581_s7] ss:$0 sm:$0xff]  ;;  %4480 = vmatpush.bf16.msrb.mxu3 %v6058_v52 }
 0x1d9   : > { %1854 = vst [vmem:[#allocation2 + $0xb0] sm:$0xf] %v1853_v46  ;;  %v1302_v51 = vrot.slane %v1300_v40, 7  ;;  %v829_v11 = vadd.f32 %v828_v47, %v7281_v31  ;;  %v917_v3 = vpop.f32.mrf.mxu1  ;;  %v2369_v9 = vsel %vm2201_vm6, %v2364_v38, %v2368_v26  ;;  %v4066_v41 = vadd.f32 %v7736_v25, %v4065_v39  ;;  %v6086_v46 = vld [vmem:[#allocation11 + $0x238] sm:$0xff] }
 0x1da   : > { %4193 = vmatmul.bf16.gmra.mxu3 %v2369_v9  ;;  %v2373_v26 = vshll.u32 %v7730_v21, 16  ;;  %v6070_v47 = vld [vmem:[#allocation11 + $0x1b8] sm:$0xff]  ;;  %4743 = vmatpush.bf16.msra.mxu2 %v6086_v46 }
 0x1db   : > { %v1305_v23 = vor.u32 %v1303_v53, %v1302_v51  ;;  %v1307_v62 = vrot.slane %v1302_v51, 4  ;;  %v952_v13 = vmax.f32 %v829_v11, 0.0  ;;  %4252 = vmatmul.bf16.gmra.mxu0 %v7511_v27  ;;  %v6057_v53 = vld [vmem:[#allocation11 + $0x150] sm:$0xff]  ;;  %v918_v11 = vadd.f32 %v917_v3, %v7285_v37 }
 0x1dc   : > { %4341 = vmatmul.bf16.gmra.mxu1 %v7517_v43  ;;  %v7750_v51 = vpop.f32.mrf.mxu2  ;;  %4565 = vmatpush.bf16.msra.mxu0 %v6070_v47  ;;  %v7760_v46 = vld [vmem:[#allocation2 + $0x6c] sm:$0xff]  }
 0x1dd   : > { %v1801_v33 = vld [vmem:[#allocation2 + $0xb4] sm:$0x1]  ;;  %v1306_v56 = vsel %vm7300_vm8, %v1298_v49, %v1305_v23  ;;  %v1482_v27 = vsel %vm7256_vm2, %v1307_v62, %v1481_v18  ;;  %v1048_v60 = vpack.c.bf16 %v952_v13, %v952_v13  ;;  %v4154_v40 = vpop.f32.mrf.mxu3  ;;  %v7762_v47 = vld [vmem:[#allocation2 + $0x6c] sm:$0xf0]  ;;  %4481 = vmatpush.bf16.msrb.mxu3 %v6057_v53 }
 0x1de   : > { %v1802_v38 = vsel %vm7256_vm2, 0, %v1801_v33  ;;  %1480 = vst [vmem:[#allocation2 + $0xb8] sm:$0xf] %v1306_v56  ;;  %v7748_v39 = vadd.f32 %v4154_v40, %v4066_v41  ;;  %v6078_v49 = vld [vmem:[#allocation11 + $0x1f8] sm:$0xff]  ;;  %v6465_v33 = vld [vmem:[#allocation2 + $0x60] sm:$0xf0] }
 0x1df   : > { %1803 = vst [vmem:[#allocation2 + $0xb4] sm:$0x1] %v1802_v38  ;;  %v1309_v43 = vshrl.u32 %v1048_v60, 16  ;;  %v1312_v61 = vshll.u32 %v1048_v60, 16  ;;  %v1484_v56 = vld [vmem:[#allocation2 + $0xc0] sm:$0xf]  ;;  %4654 = vmatpush.bf16.msra.mxu1 %v6078_v49 }
 0x1e0   : > { %1483 = vst [vmem:[#allocation2 + $0xbc] sm:$0x1] %v1482_v27  ;;  %v830_v9 = vpop.f32.mrf.mxu0  ;;  %v1910_v18 = vld [vmem:[#allocation2 + $0xb0] sm:$0x1]  ;;  %v2375_v60 = vrot.slane %v2373_v26, 1  ;;  %v2371_v26 = vshrl.u32 %v7730_v21, 16 }
 0x1e1   : > { %v7753_v23 = vrot.slane %v1309_v43, 7  ;;  %v831_v62 = vadd.f32 %v830_v9, %v7281_v31  ;;  %v919_v13 = vpop.f32.mrf.mxu1  ;;  %v2183_v41 = vunpack.c.l.b16 %v1910_v18  ;;  %v6466_v38 = vld [vmem:[#allocation2 + $0x60] sm:$0xe]  ;;  %8636 = vst [vmem:[#allocation33_spill] sm:$0xff] %v7762_v47  ;;  %v4068_v43 = vadd.f32 %v7736_v25, %v7721_v24 }
 0x1e2   : > { %v920_v52 = vadd.f32 %v919_v13, %v7285_v37  ;;  %v6056_v31 = vld [vmem:[#allocation11 + $0x148] sm:$0xff]  ;;  %v6467_v37 = vor.u32 %v6466_v38, %v6465_v33  ;;  %v2484_v13 = vrot.slane %v7532_v15, 1  ;;  %v7771_v53 = vor.u32 %v2375_v60, %v2371_v26  ;;  %v6055_v33 = vld [vmem:[#allocation11 + $0x140] sm:$0xff] }
 0x1e3   : > { %v1314_v27 = vor.u32 %v1312_v61, %v7753_v23  ;;  %v953_v3 = vmax.f32 %v831_v62, 0.0  ;;  %v7758_v40 = vpack.c.b16 %v2183_v41, %v2183_v41  ;;  %4482 = vmatpush.bf16.msrb.mxu3 %v6056_v31 }
 0x1e4   : > { %v6174_v9 = vpack.c.bf16 %v920_v52, %v918_v11  ;;  %v1960_v11 = vld [vmem:[#allocation2 + $0x14] sm:$0x1]  ;;  %v2483_v60 = vrot.slane %v6467_v37, 1 }
 0x1e5   : > { %v1485_v61 = vsel %vm7262_vm5, %v1314_v27, %v1484_v56  ;;  %v1049_v18 = vpack.c.bf16 %v953_v3, %v953_v3  ;;  %v4156_v49 = vpop.f32.mrf.mxu3  ;;  %v2378_v62 = vshll.u32 %v7758_v40, 16  ;;  %v6690_v35 = vld [vmem:[#allocation2 + $0xb4] sm:$0xf0]  ;;  %v4072_v56 = vpop.f32.mrf.mxu2  ;;  %v2635_v31 = vunpack.c.l.b16 %v1960_v11 }
 0x1e6   : > { %1486 = vst [vmem:[#allocation2 + $0xc0] sm:$0xf] %v1485_v61  ;;  %v7773_v41 = vadd.f32 %v4156_v49, %v4068_v43  ;;  %v7775_v24 = vld [vmem:[#allocation2 + $0xb4] sm:$0xff]   ;;  %v1315_v43 = vrot.slane %v7753_v23, 4  ;;  %v4071_v23 = vadd.f32 %v7736_v25, %v7750_v51 }
 0x1e7   : > { %v1855_v52 = vld [vmem:[#allocation2 + $0xbc] sm:$0xf]  ;;  %v1317_v38 = vshrl.u32 %v1049_v18, 16  ;;  %v1320_v47 = vshll.u32 %v1049_v18, 16  ;;  %6430 = vst [vmem:[%s7294_s17 + $0x78] sm:$0xff] %v6174_v9   ;;  %v2380_v27 = vrot.slane %v2378_v62, 1  ;;  %v2485_v9 = vsel %vm2458_vm9, %v2483_v60, %v2484_v13  ;;  %4483 = vmatpush.bf16.msrb.mxu3 %v6055_v33  ;;  %4114 = vmatmul.bf16.gmra.mxu2 %v7775_v24 }
 0x1e8   : > { %v1856_v15 = vsel %vm7262_vm5, 0, %v1855_v52  ;;  %v4218_v3 = vpop.f32.mrf.mxu0  ;;  %v1488_v18 = vld [vmem:[#allocation2 + $0xc8] sm:$0x1]  ;;  %v4043_v62 = vadd.f32 %v7736_v25, %v7542_v12  ;;  %v2385_v33 = vshll.u32 %v7775_v24, 16 }
 0x1e9   : > { %1857 = vst [vmem:[#allocation2 + $0xbc] sm:$0xf] %v1856_v15  ;;  %v1319_v26 = vrot.slane %v1317_v38, 7  ;;  %v2381_v61 = vsel %vm2201_vm6, %v7771_v53, %v2380_v27  ;;  %v4219_v49 = vadd.f32 %v4218_v3, %v7477_v6  ;;  %v4307_v36 = vpop.f32.mrf.mxu1  ;;  %v6691_v6 = vld [vmem:[#allocation2 + $0xb4] sm:$0xe]  ;;  %v7803_v3 = vpack.c.b16 %v2635_v31, %v2635_v31 }
 0x1ea   : > { %4198 = vmatmul.bf16.gmra.mxu3 %v2381_v61  ;;  %v4132_v51 = vadd.f32 %v7572_v45, %v4043_v62  ;;  %v4073_v62 = vadd.f32 %v7736_v25, %v4072_v56 }
 0x1eb   : > { %v1322_v52 = vor.u32 %v1320_v47, %v1319_v26  ;;  %v1324_v37 = vrot.slane %v1319_v26, 4  ;;  %v7787_v15 = vadd.f32 %v4307_v36, %v4219_v49  ;;  %4257 = vmatmul.bf16.gmra.mxu0 %v2485_v9  ;;  %v2675_v45 = vshll.u32 %v7803_v3, 16 }
 0x1ec   : > { %4346 = vmatmul.bf16.gmra.mxu1 %v7760_v46 }
 0x1ed   : > { %v1804_v38 = vld [vmem:[#allocation2 + $0xc0] sm:$0x1]  ;;  %v1323_v13 = vsel %vm7300_vm8, %v1315_v43, %v1322_v52  ;;  %v1489_v12 = vsel %vm7256_vm2, %v1324_v37, %v1488_v18  ;;  %v4159_v47 = vpop.f32.mrf.mxu3  ;;  %v4075_v27 = vpop.f32.mrf.mxu2  ;;  %v2670_v43 = vshll.u32 %v7472_v57, 16  ;;  %v6692_v18 = vor.u32 %v6691_v6, %v6690_v35 }
 0x1ee   : > { %v1805_v36 = vsel %vm7256_vm2, 0, %v1804_v38  ;;  %1487 = vst [vmem:[#allocation2 + $0xc4] sm:$0xf] %v1323_v13  ;;  %v7799_v11 = vadd.f32 %v4159_v47, %v4071_v23  ;;  %v2387_v37 = vrot.slane %v2385_v33, 1  ;;  %v2383_v38 = vshrl.u32 %v7775_v24, 16 }
 0x1ef   : > { %1806 = vst [vmem:[#allocation2 + $0xc0] sm:$0x1] %v1805_v36  ;;  %v2672_v23 = vrot.slane %v2670_v43, 1  ;;  %v2677_v33 = vrot.slane %v2675_v45, 1  ;;  %v1961_v24 = vld [vmem:[#allocation2 + $0x20] sm:$0x1] }
 0x1f0   : > { %1490 = vst [vmem:[#allocation2 + $0xc8] sm:$0x1] %v1489_v12  ;;  %v4220_v0 = vpop.f32.mrf.mxu0  ;;  %v1911_v60 = vld [vmem:[#allocation2 + $0xbc] sm:$0x1]  ;;  %v2504_v12 = vrot.slane %v6692_v18, 1  ;;  %v2636_v45 = vunpack.c.l.b16 %v1961_v24 }
 0x1f1   : > { %v4221_v26 = vadd.f32 %v4220_v0, %v4132_v51  ;;  %v4309_v61 = vpop.f32.mrf.mxu1  ;;  %v2184_v49 = vunpack.c.l.b16 %v1911_v60  ;;  %v2668_v51 = vshrl.u32 %v7472_v57, 16  ;;  %v2388_v0 = vor.u32 %v2387_v37, %v2383_v38 }
 0x1f3   : > { %v7806_v9 = vadd.f32 %v4309_v61, %v4221_v26  ;;  %v2200_v52 = vpack.c.b16 %v2184_v49, %v2184_v49  ;;  %v2673_v57 = vor.u32 %v2672_v23, %v2668_v51 }
 0x1f5   : > { %v4161_v31 = vpop.f32.mrf.mxu3  ;;  %v2390_v13 = vshll.u32 %v2200_v52, 16  ;;  %v2505_v47 = vrot.slane %v2200_v52, 1  ;;  %v4077_v6 = vpop.f32.mrf.mxu2  ;;  %v2678_v37 = vsel %vm2201_vm6, %v2673_v57, %v2677_v33  ;;  %v6469_v33 = vld [vmem:[#allocation2 + $0x78] sm:$0xe] }
 0x1f6   : > { %v7811_v36 = vadd.f32 %v4161_v31, %v4073_v62  ;;  %v4076_v62 = vadd.f32 %v7736_v25, %v4075_v27  ;;  %v6468_v27 = vld [vmem:[#allocation2 + $0x78] sm:$0xf0] }
 0x1f7   : > { %v1858_v35 = vld [vmem:[#allocation2 + $0xc8] sm:$0xf]  ;;  %v2392_v60 = vrot.slane %v2390_v13, 1  ;;  %v7815_v26 = vsel %vm2458_vm9, %v2504_v12, %v2505_v47  ;;  %4395 = vmatmul.bf16.vlgmr.msrb.gmra.mxu2 %v2678_v37  ;;  %v6694_v13 = vld [vmem:[#allocation2 + $0xc] sm:$0xe]  ;;  %v7829_v47 = vpack.c.b16 %v2636_v45, %v2636_v45  ;;  %v2490_v37 = vrot.slane %v7602_v29, 1 }
 0x1f8   : > { %v1859_v56 = vsel %vm7262_vm5, 0, %v1858_v35  ;;  %v4223_v43 = vpop.f32.mrf.mxu0  ;;  %v6069_v12 = vld [vmem:[#allocation11 + $0x1b0] sm:$0xff] }
 0x1f9   : > { %1860 = vst [vmem:[#allocation2 + $0xc8] sm:$0xf] %v1859_v56  ;;  %v2393_v61 = vsel %vm2201_vm6, %v2388_v0, %v2392_v60  ;;  %v4224_v49 = vadd.f32 %v4223_v43, %v7596_v7  ;;  %v4312_v18 = vpop.f32.mrf.mxu1  ;;  %v6085_v7 = vld [vmem:[#allocation11 + $0x230] sm:$0xff]  ;;  %4566 = vmatpush.bf16.msra.mxu0 %v6069_v12  ;;  %v6695_v60 = vor.u32 %v6694_v13, %v7474_v59  ;;  %v2687_v24 = vshll.u32 %v7829_v47, 16 }
 0x1fa   : > { %4203 = vmatmul.bf16.gmra.mxu3 %v2393_v61  ;;  %4744 = vmatpush.bf16.msra.mxu2 %v6085_v7  ;;  %v7835_v56 = vld [vmem:[#allocation2 + $0x84] sm:$0xff]   ;;  %v4078_v61 = vadd.f32 %v7736_v25, %v4077_v6  ;;  %v1962_v7 = vld [vmem:[#allocation2 + $0x2c] sm:$0x1] }
 0x1fb   : > { %v7821_v52 = vadd.f32 %v4312_v18, %v4224_v49  ;;  %4262 = vmatmul.bf16.gmra.mxu0 %v7580_v55  ;;  %v6077_v55 = vld [vmem:[#allocation11 + $0x1f0] sm:$0xff]  ;;  %v6470_v49 = vor.u32 %v6469_v33, %v6468_v27  ;;  %v2689_v59 = vrot.slane %v2687_v24, 1 }
 0x1fc   : > { %4351 = vmatmul.bf16.gmra.mxu1 %v7584_v20  ;;  %v7837_v43 = vld [vmem:[#allocation2 + $0x84] sm:$0xf0] }
 0x1fd   : > { %v4164_v31 = vpop.f32.mrf.mxu3  ;;  %v4080_v23 = vpop.f32.mrf.mxu2  ;;  %4655 = vmatpush.bf16.msra.mxu1 %v6077_v55  ;;  %v2489_v13 = vrot.slane %v6470_v49, 1  ;;  %v2690_v29 = vsel %vm2201_vm6, %v7367_v8, %v2689_v59  ;;  %v2694_v49 = vshll.u32 %v7534_v19, 16  ;;  %v6478_v8 = vld [vmem:[#allocation2 + $0x18] sm:$0xe] }
 0x1fe   : > { %v7827_v38 = vadd.f32 %v4164_v31, %v4076_v62  ;;  %v2923_v62 = vrot.slane %v6695_v60, 1 }
 0x1ff   : > { %v2491_v6 = vsel %vm2458_vm9, %v2489_v13, %v2490_v37  ;;  %v2927_v13 = vrot.slane %v7829_v47, 1 }
 0x200   : > { %v4225_v51 = vpop.f32.mrf.mxu0 }
 0x201   : > { %v4226_v35 = vadd.f32 %v4225_v51, %v7613_v22  ;;  %v4314_v0 = vpop.f32.mrf.mxu1  ;;  %v2924_v22 = vrot.slane %v7803_v3, 1  ;;  %v2637_v3 = vunpack.c.l.b16 %v1962_v7  ;;  %v2696_v7 = vrot.slane %v2694_v49, 1 }
 0x203   : > { %v7832_v20 = vadd.f32 %v4314_v0, %v4226_v35  ;;  %v2925_v55 = vsel %vm2458_vm9, %v2923_v62, %v2924_v22  ;;  %v4081_v0 = vadd.f32 %v7736_v25, %v4080_v23  ;;  %v7856_v33 = vpack.c.b16 %v2637_v3, %v2637_v3  ;;  %v1963_v3 = vld [vmem:[#allocation2 + $0x38] sm:$0x1] }
 0x204   : > { %v2638_v49 = vunpack.c.l.b16 %v1963_v3 }
 0x205   : > { %v4166_v18 = vpop.f32.mrf.mxu3  ;;  %v4082_v45 = vpop.f32.mrf.mxu2  ;;  %v2699_v62 = vshll.u32 %v7856_v33, 16 }
 0x206   : > { %v7842_v57 = vadd.f32 %v4166_v18, %v4078_v61  ;;  %v6477_v61 = vld [vmem:[#allocation2 + $0x18] sm:$0xf0]  ;;  %v4083_v59 = vadd.f32 %v7736_v25, %v4082_v45 }
 0x207   : > { %4400 = vmatmul.bf16.gmra.mxu2 %v2690_v29  ;;  %v6479_v23 = vor.u32 %v6478_v8, %v6477_v61  ;;  %v6084_v8 = vld [vmem:[#allocation11 + $0x228] sm:$0xff] }
 0x208   : > { %v4228_v31 = vpop.f32.mrf.mxu0  ;;  %4745 = vmatpush.bf16.msra.mxu2 %v6084_v8  ;;  %v1964_v8 = vld [vmem:[#allocation2 + $0x44] sm:$0x1] }
 0x209   : > { %v4229_v12 = vadd.f32 %v4228_v31, %v7636_v14  ;;  %v4317_v51 = vpop.f32.mrf.mxu1 }
 0x20a   : > { %4484 = vmatmul.bf16.vlgmr.msrb.gmra.mxu3 %v2925_v55  ;;  %v2926_v55 = vrot.slane %v6479_v23, 1  ;;  %v6068_v23 = vld [vmem:[#allocation11 + $0x1a8] sm:$0xff] }
 0x20b   : > { %v7848_v35 = vadd.f32 %v4317_v51, %v4229_v12  ;;  %4267 = vmatmul.bf16.gmra.mxu0 %v2491_v6  ;;  %v2692_v6 = vshrl.u32 %v7534_v19, 16 }
 0x20c   : > { %4356 = vmatmul.bf16.gmra.mxu1 %v7835_v56  ;;  %4567 = vmatpush.bf16.msra.mxu0 %v6068_v23 }
 0x20d   : > { %v4169_v27 = vpop.f32.mrf.mxu3  ;;  %v4085_v60 = vpop.f32.mrf.mxu2  ;;  %v2697_v61 = vor.u32 %v2696_v7, %v2692_v6  ;;  %v6472_v6 = vld [vmem:[#allocation2 + $0x90] sm:$0xe] }
 0x20e   : > { %v7854_v14 = vadd.f32 %v4169_v27, %v4081_v0 }
 0x210   : > { %v4230_v24 = vpop.f32.mrf.mxu0 }
 0x211   : > { %v4231_v18 = vadd.f32 %v4230_v24, %v7646_v44  ;;  %v4319_v22 = vpop.f32.mrf.mxu1  ;;  %v2701_v44 = vrot.slane %v2699_v62, 1  ;;  %v2928_v24 = vsel %vm2458_vm9, %v2926_v55, %v2927_v13 }
 0x213   : > { %v7860_v37 = vadd.f32 %v4319_v22, %v4231_v18  ;;  %v2702_v47 = vsel %vm2201_vm6, %v2697_v61, %v2701_v44  ;;  %v4086_v18 = vadd.f32 %v7736_v25, %v4085_v60  ;;  %v6471_v60 = vld [vmem:[#allocation2 + $0x90] sm:$0xf0]  ;;  %v7884_v44 = vld [vmem:[#allocation2 + $0x9c] sm:$0xff]  }
 0x215   : > { %v4171_v31 = vpop.f32.mrf.mxu3  ;;  %v4087_v51 = vpop.f32.mrf.mxu2 }
 0x216   : > { %v7865_v12 = vadd.f32 %v4171_v31, %v4083_v59  ;;  %v7878_v59 = vpack.c.b16 %v2638_v49, %v2638_v49 }
 0x217   : > { %4405 = vmatmul.bf16.gmra.mxu2 %v2702_v47  ;;  %v2496_v47 = vrot.slane %v7674_v48, 1 }
 0x218   : > { %v4233_v29 = vpop.f32.mrf.mxu0  ;;  %v2711_v3 = vshll.u32 %v7878_v59, 16 }
 0x219   : > { %v4234_v0 = vadd.f32 %v4233_v29, %v7668_v10  ;;  %v4322_v27 = vpop.f32.mrf.mxu1  ;;  %v6697_v10 = vld [vmem:[#allocation2 + $0x24] sm:$0xe]  ;;  %v7886_v29 = vld [vmem:[#allocation2 + $0x9c] sm:$0xf0] }
 0x21a   : > { %4489 = vmatmul.bf16.gmra.mxu3 %v2928_v24  ;;  %v6698_v55 = vor.u32 %v6697_v10, %v7536_v17  ;;  %v2713_v17 = vrot.slane %v2711_v3, 1 }
 0x21b   : > { %v7870_v45 = vadd.f32 %v4322_v27, %v4234_v0  ;;  %4272 = vmatmul.bf16.gmra.mxu0 %v7650_v32  ;;  %v6076_v32 = vld [vmem:[#allocation11 + $0x1e8] sm:$0xff]  ;;  %v4088_v0 = vadd.f32 %v7736_v25, %v4087_v51  ;;  %v6473_v27 = vor.u32 %v6472_v6, %v6471_v60 }
 0x21c   : > { %4361 = vmatmul.bf16.gmra.mxu1 %v7656_v50  ;;  %v2714_v48 = vsel %vm2201_vm6, %v7420_v5, %v2713_v17  ;;  %v6481_v5 = vld [vmem:[#allocation2 + $0x30] sm:$0xe] }
 0x21d   : > { %v4174_v19 = vpop.f32.mrf.mxu3  ;;  %v4090_v62 = vpop.f32.mrf.mxu2  ;;  %4656 = vmatpush.bf16.msra.mxu1 %v6076_v32  ;;  %v2495_v10 = vrot.slane %v6473_v27, 1  ;;  %v2718_v27 = vshll.u32 %v7604_v63, 16 }
 0x21e   : > { %v7876_v22 = vadd.f32 %v4174_v19, %v4086_v18  ;;  %v2929_v18 = vrot.slane %v6698_v55, 1 }
 0x21f   : > { %v2497_v51 = vsel %vm2458_vm9, %v2495_v10, %v2496_v47  ;;  %v2933_v10 = vrot.slane %v7878_v59, 1 }
 0x220   : > { %v4235_v31 = vpop.f32.mrf.mxu0 }
 0x221   : > { %v4236_v13 = vadd.f32 %v4235_v31, %v7685_v54  ;;  %v4324_v7 = vpop.f32.mrf.mxu1  ;;  %v2930_v54 = vrot.slane %v7856_v33, 1  ;;  %v2639_v33 = vunpack.c.l.b16 %v1964_v8  ;;  %v2720_v8 = vrot.slane %v2718_v27, 1 }
 0x223   : > { %v7881_v50 = vadd.f32 %v4324_v7, %v4236_v13  ;;  %v2931_v32 = vsel %vm2458_vm9, %v2929_v18, %v2930_v54  ;;  %v4091_v7 = vadd.f32 %v7736_v25, %v4090_v62  ;;  %v7905_v6 = vpack.c.b16 %v2639_v33, %v2639_v33  ;;  %v1965_v33 = vld [vmem:[#allocation2 + $0x50] sm:$0x1] }
 0x224   : > { %v2640_v27 = vunpack.c.l.b16 %v1965_v33  ;;  %v7933_v33 = vld [vmem:[#allocation2 + $0xb4] sm:$0xff]  }
 0x225   : > { %v4176_v24 = vpop.f32.mrf.mxu3  ;;  %v4092_v49 = vpop.f32.mrf.mxu2  ;;  %v2723_v18 = vshll.u32 %v7905_v6, 16 }
 0x226   : > { %v7891_v61 = vadd.f32 %v4176_v24, %v4088_v0  ;;  %v6480_v0 = vld [vmem:[#allocation2 + $0x30] sm:$0xf0]  ;;  %v4093_v17 = vadd.f32 %v7736_v25, %v4092_v49 }
 0x227   : > { %4410 = vmatmul.bf16.gmra.mxu2 %v2714_v48  ;;  %v6482_v62 = vor.u32 %v6481_v5, %v6480_v0 }
 0x228   : > { %v4238_v19 = vpop.f32.mrf.mxu0 }
 0x229   : > { %v4239_v23 = vadd.f32 %v4238_v19, %v7708_v34  ;;  %v4327_v31 = vpop.f32.mrf.mxu1 }
 0x22a   : > { %4494 = vmatmul.bf16.gmra.mxu3 %v2931_v32  ;;  %v2932_v32 = vrot.slane %v6482_v62, 1  ;;  %v6700_v62 = vld [vmem:[#allocation2 + $0x3c] sm:$0xe] }
 0x22b   : > { %v7897_v13 = vadd.f32 %v4327_v31, %v4239_v23  ;;  %4277 = vmatmul.bf16.gmra.mxu0 %v2497_v51  ;;  %v2716_v51 = vshrl.u32 %v7604_v63, 16 }
 0x22c   : > { %4366 = vmatmul.bf16.gmra.mxu1 %v7884_v44 }
 0x22d   : > { %v4179_v60 = vpop.f32.mrf.mxu3  ;;  %v4095_v55 = vpop.f32.mrf.mxu2  ;;  %v2721_v0 = vor.u32 %v2720_v8, %v2716_v51  ;;  %v6474_v51 = vld [vmem:[#allocation2 + $0xa8] sm:$0xf0] }
 0x22e   : > { %v7903_v34 = vadd.f32 %v4179_v60, %v4091_v7  ;;  %v4096_v63 = vadd.f32 %v7736_v25, %v4095_v55 }
 0x230   : > { %v4240_v3 = vpop.f32.mrf.mxu0 }
 0x231   : > { %v4241_v24 = vadd.f32 %v4240_v3, %v7718_v28  ;;  %v4329_v54 = vpop.f32.mrf.mxu1  ;;  %v2725_v28 = vrot.slane %v2723_v18, 1  ;;  %v2934_v3 = vsel %vm2458_vm9, %v2932_v32, %v2933_v10  ;;  %v6083_v18 = vld [vmem:[#allocation11 + $0x220] sm:$0xff]  ;;  %v6074_v10 = vld [vmem:[#allocation11 + $0x1d8] sm:$0xff] }
 0x232   : > { %4746 = vmatpush.bf16.msra.mxu2 %v6083_v18 }
 0x233   : > { %v7909_v47 = vadd.f32 %v4329_v54, %v4241_v24  ;;  %v2726_v59 = vsel %vm2201_vm6, %v2721_v0, %v2725_v28  ;;  %v6067_v24 = vld [vmem:[#allocation11 + $0x1a0] sm:$0xff]  ;;  %v6073_v0 = vld [vmem:[#allocation11 + $0x1d0] sm:$0xff] }
 0x234   : > { %v6075_v54 = vld [vmem:[#allocation11 + $0x1e0] sm:$0xff]  ;;  %4568 = vmatpush.bf16.msra.mxu0 %v6067_v24  ;;  %v2936_v24 = vrot.slane %v7905_v6, 1 }
 0x235   : > { %v4181_v19 = vpop.f32.mrf.mxu3  ;;  %v4097_v31 = vpop.f32.mrf.mxu2  ;;  %4657 = vmatpush.bf16.msra.mxu1 %v6075_v54 }
 0x236   : > { %v7914_v23 = vadd.f32 %v4181_v19, %v4093_v17  ;;  %v6066_v17 = vld [vmem:[#allocation11 + $0x198] sm:$0xff] }
 0x237   : > { %4415 = vmatmul.bf16.gmra.mxu2 %v2726_v59  ;;  %v4098_v59 = vadd.f32 %v7736_v25, %v4097_v31 }
 0x238   : > { %v4243_v48 = vpop.f32.mrf.mxu0  ;;  %4569 = vmatpush.bf16.msra.mxu0 %v6066_v17 }
 0x239   : > { %v4244_v7 = vadd.f32 %v4243_v48, %v7748_v39  ;;  %v4332_v60 = vpop.f32.mrf.mxu1  ;;  %4658 = vmatpush.bf16.msra.mxu1 %v6074_v10  ;;  %v6701_v48 = vor.u32 %v6700_v62, %v7606_v2  ;;  %v2502_v2 = vrot.slane %v7758_v40, 1 }
 0x23a   : > { %4499 = vmatmul.bf16.gmra.mxu3 %v2934_v3  ;;  %v6065_v3 = vld [vmem:[#allocation11 + $0x190] sm:$0xff] }
 0x23b   : > { %v7919_v49 = vadd.f32 %v4332_v60, %v4244_v7  ;;  %4282 = vmatmul.bf16.gmra.mxu0 %v7724_v4  ;;  %v7927_v4 = vpack.c.b16 %v2640_v27, %v2640_v27  ;;  %v7935_v7 = vld [vmem:[#allocation2 + $0xb4] sm:$0xf0]  ;;  %v2935_v18 = vrot.slane %v6701_v48, 1 }
 0x23c   : > { %4371 = vmatmul.bf16.gmra.mxu1 %v7730_v21  ;;  %v6475_v21 = vld [vmem:[#allocation2 + $0xa8] sm:$0xe]  ;;  %4570 = vmatpush.bf16.msra.mxu0 %v6065_v3  ;;  %v6071_v3 = vld [vmem:[#allocation11 + $0x1c0] sm:$0xff] }
 0x23d   : > { %v4184_v39 = vpop.f32.mrf.mxu3  ;;  %v4100_v19 = vpop.f32.mrf.mxu2  ;;  %v2735_v60 = vshll.u32 %v7927_v4, 16  ;;  %4659 = vmatpush.bf16.msra.mxu1 %v6073_v0 }
 0x23e   : > { %v7925_v5 = vadd.f32 %v4184_v39, %v4096_v63  ;;  %v6064_v63 = vld [vmem:[#allocation11 + $0x188] sm:$0xff]  ;;  %v4101_v0 = vadd.f32 %v7736_v25, %v4100_v19 }
 0x23f   : > { %v6072_v39 = vld [vmem:[#allocation11 + $0x1c8] sm:$0xff]  ;;  %v2737_v17 = vrot.slane %v2735_v60, 1  ;;  %v6063_v60 = vld [vmem:[#allocation11 + $0x180] sm:$0xff] }
 0x240   : > { %v4245_v8 = vpop.f32.mrf.mxu0  ;;  %4571 = vmatpush.bf16.msra.mxu0 %v6064_v63 }
 0x241   : > { %v4246_v32 = vadd.f32 %v4245_v8, %v7773_v41  ;;  %v4334_v55 = vpop.f32.mrf.mxu1  ;;  %v6476_v41 = vor.u32 %v6475_v21, %v6474_v51  ;;  %v2937_v51 = vsel %vm2458_vm9, %v2935_v18, %v2936_v24  ;;  %4660 = vmatpush.bf16.msra.mxu1 %v6072_v39  ;;  %v2738_v40 = vsel %vm2201_vm6, %v7486_v16, %v2737_v17  ;;  %v6484_v18 = vld [vmem:[#allocation2 + $0x48] sm:$0xe] }
 0x242   : > { %v2742_v16 = vshll.u32 %v7676_v42, 16 }
 0x243   : > { %v7930_v28 = vadd.f32 %v4334_v55, %v4246_v32  ;;  %v2501_v8 = vrot.slane %v6476_v41, 1  ;;  %v1966_v32 = vld [vmem:[#allocation2 + $0x5c] sm:$0x1] }
 0x244   : > { %v2641_v48 = vunpack.c.l.b16 %v1966_v32  ;;  %4572 = vmatpush.bf16.msra.mxu0 %v6063_v60 }
 0x245   : > { %v4186_v27 = vpop.f32.mrf.mxu3  ;;  %v4102_v62 = vpop.f32.mrf.mxu2  ;;  %v2503_v6 = vsel %vm2458_vm9, %v2501_v8, %v2502_v2  ;;  %4661 = vmatpush.bf16.msra.mxu1 %v6071_v3  ;;  %v6483_v2 = vld [vmem:[#allocation2 + $0x48] sm:$0xf0]  ;;  %v1967_v3 = vld [vmem:[#allocation2 + $0x68] sm:$0x1] }
 0x246   : > { %v7940_v54 = vadd.f32 %v4186_v27, %v4098_v59  ;;  %v7954_v27 = vpack.c.b16 %v2641_v48, %v2641_v48  ;;  %v6485_v17 = vor.u32 %v6484_v18, %v6483_v2  ;;  %v4103_v8 = vadd.f32 %v7736_v25, %v4102_v62  ;;  %v7968_v62 = vld [vmem:[#allocation2 + $0xc0] sm:$0xff]  }
 0x247   : > { %4420 = vmatmul.bf16.gmra.mxu2 %v2738_v40  ;;  %v2740_v48 = vshrl.u32 %v7676_v42, 16  ;;  %v2642_v42 = vunpack.c.l.b16 %v1967_v3 }
 0x248   : > { %v4248_v10 = vpop.f32.mrf.mxu0  ;;  %v2938_v40 = vrot.slane %v6485_v17, 1 }
 0x249   : > { %v4249_v31 = vadd.f32 %v4248_v10, %v7799_v11  ;;  %v4337_v55 = vpop.f32.mrf.mxu1  ;;  %v2747_v10 = vshll.u32 %v7954_v27, 16 }
 0x24a   : > { %4504 = vmatmul.bf16.gmra.mxu3 %v2937_v51 }
 0x24b   : > { %v7946_v21 = vadd.f32 %v4337_v55, %v4249_v31  ;;  %4287 = vmatmul.bf16.gmra.mxu0 %v2503_v6  ;;  %v2939_v31 = vrot.slane %v7927_v4, 1  ;;  %v2744_v55 = vrot.slane %v2742_v16, 1 }
 0x24c   : > { %4376 = vmatmul.bf16.gmra.mxu1 %v7933_v33 }
 0x24d   : > { %v4189_v11 = vpop.f32.mrf.mxu3  ;;  %v4105_v41 = vpop.f32.mrf.mxu2  ;;  %v2940_v2 = vsel %vm2458_vm9, %v2938_v40, %v2939_v31 }
 0x24e   : > { %v7952_v59 = vadd.f32 %v4189_v11, %v4101_v0  ;;  %v2025_v0 = vld [vmem:[#allocation2 + $0x20] sm:$0x1]  ;;  %v4106_v18 = vadd.f32 %v7736_v25, %v4105_v41 }
 0x250   : > { %v4250_v24 = vpop.f32.mrf.mxu0 }
 0x251   : > { %v4251_v63 = vadd.f32 %v4250_v24, %v7811_v36  ;;  %v4339_v39 = vpop.f32.mrf.mxu1  ;;  %v2749_v36 = vrot.slane %v2747_v10, 1  ;;  %v6703_v10 = vld [vmem:[#allocation2 + $0x54] sm:$0xe] }
 0x252   : > { %v6704_v3 = vor.u32 %v6703_v10, %v7678_v30 }
 0x253   : > { %v7958_v19 = vadd.f32 %v4339_v39, %v4251_v63  ;;  %v2745_v63 = vor.u32 %v2744_v55, %v2740_v48  ;;  %v3099_v39 = vunpack.c.l.b16 %v2025_v0  ;;  %v7978_v55 = vpack.c.b16 %v2642_v42, %v2642_v42  ;;  %v7990_v42 = vld [vmem:[#allocation2 + $0x24] sm:$0xff]  }
 0x255   : > { %v4191_v32 = vpop.f32.mrf.mxu3  ;;  %v4107_v6 = vpop.f32.mrf.mxu2  ;;  %v2750_v16 = vsel %vm2201_vm6, %v2745_v63, %v2749_v36  ;;  %v7980_v40 = vpack.c.b16 %v3099_v39, %v3099_v39  ;;  %v2759_v0 = vshll.u32 %v7978_v55, 16  ;;  %v2942_v63 = vrot.slane %v7954_v27, 1  ;;  %v7992_v39 = vld [vmem:[#allocation2 + $0x24] sm:$0xf0] }
 0x256   : > { %v7963_v51 = vadd.f32 %v4191_v32, %v4103_v8  ;;  %v6241_v8 = vld [vmem:[#allocation2 + $0x18] sm:$0xff]   ;;  %v6082_v32 = vld [vmem:[#allocation11 + $0x218] sm:$0xff]  ;;  %8638 = vst [vmem:[#allocation35_spill] sm:$0xff] %v7992_v39 }
 0x257   : > { %4425 = vmatmul.bf16.gmra.mxu2 %v2750_v16  ;;  %v3134_v41 = vshll.u32 %v6241_v8, 16  ;;  %v3132_v30 = vshrl.u32 %v6241_v8, 16 }
 0x258   : > { %v4253_v60 = vpop.f32.mrf.mxu0  ;;  %4747 = vmatpush.bf16.msra.mxu2 %v6082_v32  ;;  %v2761_v32 = vrot.slane %v2759_v0, 1 }
 0x259   : > { %v4254_v11 = vadd.f32 %v4253_v60, %v7827_v38  ;;  %v4342_v24 = vpop.f32.mrf.mxu1  ;;  %v3136_v16 = vrot.slane %v3134_v41, 1 }
 0x25a   : > { %4509 = vmatmul.bf16.gmra.mxu3 %v2940_v2 }
 0x25b   : > { %v7970_v4 = vadd.f32 %v4342_v24, %v4254_v11  ;;  %4292 = vmatmul.bf16.gmra.mxu0 %v7815_v26  ;;  %v3139_v11 = vshll.u32 %v7980_v40, 16  ;;  %v4108_v24 = vadd.f32 %v7736_v25, %v4107_v6  ;;  %v3137_v41 = vor.u32 %v3136_v16, %v3132_v30  ;;  %v6094_v16 = vld [vmem:[#allocation12 + $0x38] sm:$0xff] }
 0x25c   : > { %4381 = vmatmul.bf16.gmra.mxu1 %v7968_v62  ;;  %4948 = vmatpush.bf16.msra.mxu3 %v6094_v16 }
 0x25d   : > { %v4194_v38 = vpop.f32.mrf.mxu3  ;;  %v4110_v31 = vpop.f32.mrf.mxu2  ;;  %v3141_v10 = vrot.slane %v3139_v11, 1 }
 0x25e   : > { %v7976_v17 = vadd.f32 %v4194_v38, %v4106_v18  ;;  %v2941_v38 = vrot.slane %v6704_v3, 1  ;;  %v4111_v11 = vadd.f32 %v7736_v25, %v4110_v31 }
 0x25f   : > { %v3142_v3 = vsel %vm2201_vm6, %v3137_v41, %v3141_v10 }
 0x260   : > { %v4255_v26 = vpop.f32.mrf.mxu0  ;;  %v2943_v27 = vsel %vm2458_vm9, %v2941_v38, %v2942_v63 }
 0x261   : > { %v4256_v48 = vadd.f32 %v4255_v26, %v7842_v57  ;;  %v4344_v36 = vpop.f32.mrf.mxu1  ;;  %v2026_v26 = vld [vmem:[#allocation2 + $0x2c] sm:$0x1] }
 0x262   : > { %v3100_v1 = vunpack.c.l.b16 %v2026_v26  ;;  %v6486_v26 = vld [vmem:[#allocation2 + $0x60] sm:$0xf0] }
 0x263   : > { %v7983_v60 = vadd.f32 %v4344_v36, %v4256_v48  ;;  %v1968_v36 = vld [vmem:[#allocation2 + $0x74] sm:$0x1] }
 0x264   : > { %v2643_v0 = vunpack.c.l.b16 %v1968_v36  ;;  %v8006_v63 = vpack.c.b16 %v3100_v1, %v3100_v1  ;;  %v6487_v36 = vld [vmem:[#allocation2 + $0x60] sm:$0xe] }
 0x265   : > { %8637 = vst [vmem:[#allocation34_spill] sm:$0xff] %v7983_v60  ;;  %v4196_v2 = vpop.f32.mrf.mxu3  ;;  %v4112_v18 = vpop.f32.mrf.mxu2  ;;  %v6488_v1 = vor.u32 %v6487_v36, %v6486_v26 }
 0x266   : > { %v7994_v57 = vadd.f32 %v4196_v2, %v4108_v24  ;;  %v8639_v24 = vld [vmem:[#allocation30_spill] sm:$0xff] }
 0x267   : > { %v2762_v2 = vsel %vm2201_vm6, %v8639_v24, %v2761_v32  ;;  %8640 = vst [vmem:[#allocation30_spill] sm:$0xff] %v8006_v63  ;;  %v2766_v32 = vshll.u32 %v7760_v46, 16  ;;  %v4113_v24 = vadd.f32 %v7736_v25, %v4112_v18  ;;  %v2944_v39 = vrot.slane %v6488_v1, 1 }
 0x268   : > { %v4258_v48 = vpop.f32.mrf.mxu0  ;;  %4430 = vmatmul.bf16.gmra.mxu2 %v2762_v2 }
 0x269   : > { %v4259_v6 = vadd.f32 %v4258_v48, %v7854_v14  ;;  %v4347_v58 = vpop.f32.mrf.mxu1 }
 0x26a   : > { %4514 = vmatmul.bf16.gmra.mxu3 %v2943_v27 }
 0x26b   : > { %v7998_v60 = vadd.f32 %v4347_v58, %v4259_v6  ;;  %4573 = vmatmul.bf16.vlgmr.msra.gmra.mxu0 %v6241_v8  ;;  %v8008_v58 = vpack.c.b16 %v2643_v0, %v2643_v0  ;;  %v3146_v8 = vshll.u32 %v7990_v42, 16  ;;  %v3151_v6 = vshll.u32 %v8006_v63, 16  ;;  %v2027_v63 = vld [vmem:[#allocation2 + $0x38] sm:$0x1] }
 0x26c   : > { %4662 = vmatmul.bf16.vlgmr.msra.gmra.mxu1 %v3142_v3  ;;  %v2945_v0 = vrot.slane %v7978_v55, 1  ;;  %v3101_v1 = vunpack.c.l.b16 %v2027_v63  ;;  %v6987_v63 = vld [vmem:[#allocation2 + $0x9c] sm:$0xf0] }
 0x26d   : > { %v4199_v14 = vpop.f32.mrf.mxu3  ;;  %v4115_v38 = vpop.f32.mrf.mxu2  ;;  %v2771_v41 = vshll.u32 %v8008_v58, 16  ;;  %v3148_v2 = vrot.slane %v3146_v8, 1  ;;  %v3153_v16 = vrot.slane %v3151_v6, 1 }
 0x26e   : > { %v8004_v48 = vadd.f32 %v4199_v14, %v4111_v11  ;;  %v2768_v11 = vrot.slane %v2766_v32, 1  ;;  %v2946_v55 = vsel %vm2458_vm9, %v2944_v39, %v2945_v0  ;;  %v6446_v0 = vld [vmem:[#allocation2 + $0x30] sm:$0xff]  }
 0x270   : > { %v4260_v30 = vpop.f32.mrf.mxu0 }
 0x271   : > { %v4261_v31 = vadd.f32 %v4260_v30, %v7865_v12  ;;  %v4349_v10 = vpop.f32.mrf.mxu1  ;;  %v3144_v12 = vshrl.u32 %v7990_v42, 16 }
 0x273   : > { %v8014_v27 = vadd.f32 %v4349_v10, %v4261_v31  ;;  %v2764_v31 = vshrl.u32 %v7760_v46, 16  ;;  %v2773_v10 = vrot.slane %v2771_v41, 1  ;;  %v3149_v36 = vor.u32 %v3148_v2, %v3144_v12  ;;  %v6668_v41 = vld [vmem:[%s8581_s7] ss:$0 sm:$0xff] }
 0x275   : > { %8641 = vst [vmem:[#allocation36_spill] sm:$0xff] %v8014_v27  ;;  %v4201_v3 = vpop.f32.mrf.mxu3  ;;  %v4117_v30 = vpop.f32.mrf.mxu2  ;;  %v1969_v27 = vld [vmem:[#allocation2 + $0x80] sm:$0x1]  ;;  %v2769_v8 = vor.u32 %v2768_v11, %v2764_v31  ;;  %v3154_v32 = vsel %vm2201_vm6, %v3149_v36, %v3153_v16  ;;  %v6081_v11 = vld [vmem:[#allocation11 + $0x210] sm:$0xff]  ;;  %v8037_v31 = vpack.c.b16 %v3101_v1, %v3101_v1  ;;  %v3158_v36 = vshll.u32 %v6446_v0, 16 }
 0x276   : > { %v8019_v14 = vadd.f32 %v4201_v3, %v4113_v24  ;;  %v2644_v46 = vunpack.c.l.b16 %v1969_v27  ;;  %v6706_v3 = vld [vmem:[#allocation2 + $0x6c] sm:$0xe]  ;;  %4748 = vmatpush.bf16.msra.mxu2 %v6081_v11  ;;  %v8051_v11 = vld [vmem:[#allocation2 + $0x3c] sm:$0xf0] }
 0x277   : > { %v2774_v6 = vsel %vm2201_vm6, %v2769_v8, %v2773_v10  ;;  %8643 = vst [vmem:[#allocation38_spill] sm:$0xff] %v8037_v31 }
 0x278   : > { %v4263_v26 = vpop.f32.mrf.mxu0  ;;  %4435 = vmatmul.bf16.gmra.mxu2 %v2774_v6  ;;  %v8035_v16 = vpack.c.b16 %v2644_v46, %v2644_v46  ;;  %v3163_v6 = vshll.u32 %v8037_v31, 16  ;;  %v4118_v46 = vadd.f32 %v6668_v41, %v4117_v30  ;;  %v2028_v31 = vld [vmem:[#allocation2 + $0x44] sm:$0x1] }
 0x279   : > { %v4264_v25 = vadd.f32 %v4263_v26, %v7876_v22  ;;  %v4352_v18 = vpop.f32.mrf.mxu1  ;;  %v4116_v22 = vadd.f32 %v6668_v41, %v4115_v38 }
 0x27a   : > { %4519 = vmatmul.bf16.gmra.mxu3 %v2946_v55  ;;  %v8646_v55 = vld [vmem:[#allocation33_spill] sm:$0xff] }
 0x27b   : > { %v8026_v24 = vadd.f32 %v4352_v18, %v4264_v25  ;;  %4578 = vmatmul.bf16.gmra.mxu0 %v7990_v42  ;;  %v8039_v42 = vld [vmem:[#allocation2 + $0x9c] sm:$0xff]   ;;  %v6707_v8 = vor.u32 %v6706_v3, %v8646_v55  ;;  %8647 = vst [vmem:[#allocation33_spill] sm:$0xff] %v8051_v11 }
 0x27c   : > { %4667 = vmatmul.bf16.gmra.mxu1 %v3154_v32  ;;  %8644 = vst [vmem:[#allocation39_spill] sm:$0xff] %v8039_v42  ;;  %v6988_v25 = vld [vmem:[#allocation2 + $0x9c] sm:$0xe]  ;;  %v2783_v32 = vshll.u32 %v8035_v16, 16  ;;  %v3165_v42 = vrot.slane %v3163_v6, 1  ;;  %v8648_v6 = vld [vmem:[#allocation31_spill] sm:$0xff] }
 0x27d   : > { %8642 = vst [vmem:[#allocation37_spill] sm:$0xff] %v8026_v24  ;;  %v4204_v39 = vpop.f32.mrf.mxu3  ;;  %v4396_v12 = vpop.f32.mrf.mxu2  ;;  %v2947_v3 = vrot.slane %v6707_v8, 1 }
 0x27e   : > { %v8033_v2 = vadd.f32 %v4204_v39, %v4116_v22  ;;  %v4397_v27 = vadd.f32 %v4396_v12, %v7787_v15  ;;  %v2948_v22 = vrot.slane %v8008_v58, 1  ;;  %v3160_v15 = vrot.slane %v3158_v36, 1  ;;  %v8049_v39 = vld [vmem:[#allocation2 + $0x3c] sm:$0xff]   ;;  %v1970_v58 = vld [vmem:[#allocation2 + $0x8c] sm:$0x1] }
 0x27f   : > { %v2785_v55 = vrot.slane %v2783_v32, 1 }
 0x280   : > { %v4265_v10 = vpop.f32.mrf.mxu0 }
 0x281   : > { %v4266_v38 = vadd.f32 %v4265_v10, %v7891_v61  ;;  %v4354_v26 = vpop.f32.mrf.mxu1  ;;  %v2036_v61 = vld [vmem:[#allocation2 + $0xa4] sm:$0x1] }
 0x282   : > { %v3110_v10 = vunpack.c.l.b16 %v2036_v61 }
 0x283   : > { %v8043_v18 = vadd.f32 %v4354_v26, %v4266_v38  ;;  %v6989_v38 = vor.u32 %v6988_v25, %v6987_v63  ;;  %v3102_v63 = vunpack.c.l.b16 %v2028_v31  ;;  %v6093_v31 = vld [vmem:[#allocation12 + $0x30] sm:$0xff] }
 0x284   : > { %v8056_v36 = vpack.c.b16 %v3110_v10, %v3110_v10  ;;  %v2645_v10 = vunpack.c.l.b16 %v1970_v58  ;;  %4949 = vmatpush.bf16.msra.mxu3 %v6093_v31 }
 0x285   : > { %8645 = vst [vmem:[#allocation40_spill] sm:$0xff] %v8043_v18  ;;  %v4206_v1 = vpop.f32.mrf.mxu3  ;;  %v4398_v26 = vpop.f32.mrf.mxu2  ;;  %v3156_v18 = vshrl.u32 %v6446_v0, 16  ;;  %v3420_v25 = vrot.slane %v6989_v38, 1 }
 0x286   : > { %v8053_v12 = vadd.f32 %v4206_v1, %v4118_v46  ;;  %v4399_v30 = vadd.f32 %v4398_v26, %v7806_v9  ;;  %v2949_v46 = vsel %vm2458_vm9, %v2947_v3, %v2948_v22  ;;  %v3421_v8 = vrot.slane %v8056_v36, 1  ;;  %v6489_v26 = vld [vmem:[#allocation2 + $0x78] sm:$0xf0] }
 0x287   : > { %v3161_v1 = vor.u32 %v3160_v15, %v3156_v18  ;;  %v2786_v9 = vsel %vm2201_vm6, %v8648_v6, %v2785_v55  ;;  %v8071_v38 = vpack.c.b16 %v2645_v10, %v2645_v10 }
 0x288   : > { %v4268_v41 = vpop.f32.mrf.mxu0  ;;  %4440 = vmatmul.bf16.gmra.mxu2 %v2786_v9 }
 0x289   : > { %v4269_v24 = vadd.f32 %v4268_v41, %v7903_v34  ;;  %v4357_v11 = vpop.f32.mrf.mxu1  ;;  %v3166_v61 = vsel %vm2201_vm6, %v3161_v1, %v3165_v42  ;;  %v8067_v34 = vsel %vm2458_vm9, %v3420_v25, %v3421_v8  ;;  %v2790_v42 = vshll.u32 %v7835_v56, 16 }
 0x28a   : > { %4524 = vmatmul.bf16.gmra.mxu3 %v2949_v46  ;;  %8649 = vst [vmem:[#allocation31_spill] sm:$0xff] %v8067_v34  ;;  %v3170_v41 = vshll.u32 %v8049_v39, 16  ;;  %v2795_v1 = vshll.u32 %v8071_v38, 16 }
 0x28b   : > { %v8061_v32 = vadd.f32 %v4357_v11, %v4269_v24  ;;  %4583 = vmatmul.bf16.gmra.mxu0 %v6446_v0  ;;  %v8073_v24 = vpack.c.b16 %v3102_v63, %v3102_v63  ;;  %v2792_v8 = vrot.slane %v2790_v42, 1 }
 0x28c   : > { %4672 = vmatmul.bf16.gmra.mxu1 %v3166_v61  ;;  %v3172_v6 = vrot.slane %v3170_v41, 1  ;;  %v2797_v31 = vrot.slane %v2795_v1, 1 }
 0x28d   : > { %v4485_v18 = vpop.f32.mrf.mxu3  ;;  %v4401_v15 = vpop.f32.mrf.mxu2  ;;  %v3175_v63 = vshll.u32 %v8073_v24, 16 }
 0x28e   : > { %v8069_v22 = vadd.f32 %v4485_v18, %v4397_v27  ;;  %v4402_v11 = vadd.f32 %v4401_v15, %v7821_v52  ;;  %v6490_v27 = vld [vmem:[#allocation2 + $0x78] sm:$0xe]  ;;  %v2951_v52 = vrot.slane %v8035_v16, 1  ;;  %v2788_v18 = vshrl.u32 %v7835_v56, 16 }
 0x28f   : > { %v6491_v46 = vor.u32 %v6490_v27, %v6489_v26  ;;  %v3177_v15 = vrot.slane %v3175_v63, 1  ;;  %v6709_v63 = vld [vmem:[#allocation2 + $0x84] sm:$0xe] }
 0x290   : > { %v4270_v0 = vpop.f32.mrf.mxu0 }
 0x291   : > { %v4271_v3 = vadd.f32 %v4270_v0, %v7914_v23  ;;  %v4359_v55 = vpop.f32.mrf.mxu1  ;;  %v3168_v23 = vshrl.u32 %v8049_v39, 16  ;;  %v2950_v10 = vrot.slane %v6491_v46, 1  ;;  %v2029_v0 = vld [vmem:[#allocation2 + $0x50] sm:$0x1] }
 0x293   : > { %v8079_v58 = vadd.f32 %v4359_v55, %v4271_v3  ;;  %v1971_v55 = vld [vmem:[#allocation2 + $0x98] sm:$0x1]  ;;  %v2952_v42 = vsel %vm2458_vm9, %v2950_v10, %v2951_v52  ;;  %v3173_v41 = vor.u32 %v3172_v6, %v3168_v23  ;;  %v6447_v52 = vld [vmem:[#allocation2 + $0x48] sm:$0xff]  }
 0x294   : > { %v8102_v10 = vld [vmem:[#allocation2 + $0xb4] sm:$0xff]  }
 0x295   : > { %v4487_v25 = vpop.f32.mrf.mxu3  ;;  %v4403_v61 = vpop.f32.mrf.mxu2  ;;  %v3178_v46 = vsel %vm2201_vm6, %v3173_v41, %v3177_v15  ;;  %v2954_v41 = vrot.slane %v8071_v38, 1  ;;  %v1972_v38 = vld [vmem:[#allocation2 + $0xa4] sm:$0x1] }
 0x296   : > { %v8084_v9 = vadd.f32 %v4487_v25, %v4399_v30  ;;  %v4404_v26 = vadd.f32 %v4403_v61, %v7832_v20  ;;  %v2793_v30 = vor.u32 %v2792_v8, %v2788_v18  ;;  %v3103_v25 = vunpack.c.l.b16 %v2029_v0  ;;  %v6080_v8 = vld [vmem:[#allocation11 + $0x208] sm:$0xff]  ;;  %v6990_v18 = vld [vmem:[#allocation2 + $0xb4] sm:$0xf0] }
 0x297   : > { %v2646_v20 = vunpack.c.l.b16 %v1971_v55  ;;  %4749 = vmatpush.bf16.msra.mxu2 %v6080_v8 }
 0x298   : > { %v4273_v3 = vpop.f32.mrf.mxu0  ;;  %v2798_v56 = vsel %vm2201_vm6, %v2793_v30, %v2797_v31  ;;  %v8100_v61 = vpack.c.b16 %v3103_v25, %v3103_v25 }
 0x299   : > { %v4274_v27 = vadd.f32 %v4273_v3, %v7925_v5  ;;  %v4362_v16 = vpop.f32.mrf.mxu1  ;;  %4445 = vmatmul.bf16.gmra.mxu2 %v2798_v56  ;;  %v8098_v23 = vpack.c.b16 %v2646_v20, %v2646_v20  ;;  %v6991_v3 = vld [vmem:[#allocation2 + $0xb4] sm:$0xe]  ;;  %v8114_v56 = vld [vmem:[#allocation2 + $0x54] sm:$0xf0] }
 0x29a   : > { %4529 = vmatmul.bf16.gmra.mxu3 %v2952_v42  ;;  %8650 = vst [vmem:[#allocation41_spill] sm:$0xff] %v8100_v61  ;;  %v3187_v42 = vshll.u32 %v8100_v61, 16 }
 0x29b   : > { %v8091_v34 = vadd.f32 %v4362_v16, %v4274_v27  ;;  %4588 = vmatmul.bf16.gmra.mxu0 %v8049_v39  ;;  %v6710_v27 = vor.u32 %v6709_v63, %v7837_v43  ;;  %v2807_v16 = vshll.u32 %v8098_v23, 16  ;;  %8652 = vst [vmem:[#allocation43_spill] sm:$0xff] %v8114_v56  ;;  %v3180_v63 = vshrl.u32 %v6447_v52, 16 }
 0x29c   : > { %4677 = vmatmul.bf16.gmra.mxu1 %v3178_v46 }
 0x29d   : > { %v4490_v1 = vpop.f32.mrf.mxu3  ;;  %v4406_v6 = vpop.f32.mrf.mxu2  ;;  %v2809_v43 = vrot.slane %v2807_v16, 1 }
 0x29e   : > { %v8096_v5 = vadd.f32 %v4490_v1, %v4402_v11  ;;  %v4407_v39 = vadd.f32 %v4406_v6, %v7848_v35  ;;  %v3182_v11 = vshll.u32 %v6447_v52, 16  ;;  %v8112_v35 = vld [vmem:[#allocation2 + $0x54] sm:$0xff]   ;;  %v6992_v1 = vor.u32 %v6991_v3, %v6990_v18 }
 0x29f   : > { %v2953_v6 = vrot.slane %v6710_v27, 1 }
 0x2a0   : > { %v4275_v31 = vpop.f32.mrf.mxu0  ;;  %v3184_v25 = vrot.slane %v3182_v11, 1  ;;  %v3426_v3 = vrot.slane %v6992_v1, 1 }
 0x2a1   : > { %v4276_v15 = vadd.f32 %v4275_v31, %v7940_v54  ;;  %v4364_v0 = vpop.f32.mrf.mxu1  ;;  %v2038_v54 = vld [vmem:[#allocation2 + $0xbc] sm:$0x1]  ;;  %v3189_v31 = vrot.slane %v3187_v42, 1 }
 0x2a2   : > { %v3112_v20 = vunpack.c.l.b16 %v2038_v54  ;;  %v8653_v42 = vld [vmem:[#allocation32_spill] sm:$0xff] }
 0x2a3   : > { %v8106_v55 = vadd.f32 %v4364_v0, %v4276_v15  ;;  %v2030_v15 = vld [vmem:[#allocation2 + $0x5c] sm:$0x1] }
 0x2a4   : > { %v8119_v11 = vpack.c.b16 %v3112_v20, %v3112_v20  ;;  %v3104_v18 = vunpack.c.l.b16 %v2030_v15  ;;  %v2647_v20 = vunpack.c.l.b16 %v1972_v38  ;;  %v3194_v15 = vshll.u32 %v8112_v35, 16 }
 0x2a5   : > { %8651 = vst [vmem:[#allocation42_spill] sm:$0xff] %v8106_v55  ;;  %v4492_v30 = vpop.f32.mrf.mxu3  ;;  %v4408_v8 = vpop.f32.mrf.mxu2 }
 0x2a6   : > { %v8116_v46 = vadd.f32 %v4492_v30, %v4404_v26  ;;  %v4409_v0 = vadd.f32 %v4408_v8, %v7860_v37  ;;  %v2955_v26 = vsel %vm2458_vm9, %v2953_v6, %v2954_v41  ;;  %v3185_v30 = vor.u32 %v3184_v25, %v3180_v63  ;;  %v6092_v25 = vld [vmem:[#allocation12 + $0x28] sm:$0xff]  ;;  %v6492_v6 = vld [vmem:[#allocation2 + $0x90] sm:$0xf0] }
 0x2a7   : > { %v3427_v27 = vrot.slane %v8119_v11, 1  ;;  %v2810_v37 = vsel %vm2201_vm6, %v8653_v42, %v2809_v43  ;;  %v8134_v8 = vpack.c.b16 %v2647_v20, %v2647_v20  ;;  %4950 = vmatpush.bf16.msra.mxu3 %v6092_v25  ;;  %v2814_v43 = vshll.u32 %v7884_v44, 16 }
 0x2a8   : > { %v4278_v55 = vpop.f32.mrf.mxu0  ;;  %v3190_v54 = vsel %vm2201_vm6, %v3185_v30, %v3189_v31  ;;  %v3196_v42 = vrot.slane %v3194_v15, 1 }
 0x2a9   : > { %v4279_v61 = vadd.f32 %v4278_v55, %v7952_v59  ;;  %v4367_v56 = vpop.f32.mrf.mxu1  ;;  %4450 = vmatmul.bf16.gmra.mxu2 %v2810_v37  ;;  %v8130_v59 = vsel %vm2458_vm9, %v3426_v3, %v3427_v27  ;;  %v2819_v30 = vshll.u32 %v8134_v8, 16  ;;  %v2816_v27 = vrot.slane %v2814_v43, 1 }
 0x2aa   : > { %4534 = vmatmul.bf16.gmra.mxu3 %v2955_v26  ;;  %8654 = vst [vmem:[#allocation32_spill] sm:$0xff] %v8130_v59 }
 0x2ab   : > { %v8124_v16 = vadd.f32 %v4367_v56, %v4279_v61  ;;  %4593 = vmatmul.bf16.gmra.mxu0 %v6447_v52  ;;  %v8136_v61 = vpack.c.b16 %v3104_v18, %v3104_v18  ;;  %v2821_v25 = vrot.slane %v2819_v30, 1 }
 0x2ac   : > { %4682 = vmatmul.bf16.gmra.mxu1 %v3190_v54 }
 0x2ad   : > { %v4495_v55 = vpop.f32.mrf.mxu3  ;;  %v4411_v1 = vpop.f32.mrf.mxu2  ;;  %v3199_v18 = vshll.u32 %v8136_v61, 16 }
 0x2ae   : > { %v8132_v41 = vadd.f32 %v4495_v55, %v4407_v39  ;;  %v4412_v56 = vadd.f32 %v4411_v1, %v7870_v45  ;;  %v6493_v39 = vld [vmem:[#allocation2 + $0x90] sm:$0xe]  ;;  %v2957_v45 = vrot.slane %v8098_v23, 1  ;;  %v2812_v55 = vshrl.u32 %v7884_v44, 16 }
 0x2af   : > { %v6494_v26 = vor.u32 %v6493_v39, %v6492_v6  ;;  %v3201_v1 = vrot.slane %v3199_v18, 1  ;;  %v6712_v18 = vld [vmem:[#allocation2 + $0x9c] sm:$0xe] }
 0x2b0   : > { %v4280_v52 = vpop.f32.mrf.mxu0 }
 0x2b1   : > { %v4281_v63 = vadd.f32 %v4280_v52, %v7963_v51  ;;  %v4369_v31 = vpop.f32.mrf.mxu1  ;;  %v3192_v51 = vshrl.u32 %v8112_v35, 16  ;;  %v2956_v20 = vrot.slane %v6494_v26, 1  ;;  %v2031_v52 = vld [vmem:[#allocation2 + $0x68] sm:$0x1] }
 0x2b3   : > { %v8142_v38 = vadd.f32 %v4369_v31, %v4281_v63  ;;  %v1973_v31 = vld [vmem:[#allocation2 + $0xb0] sm:$0x1]  ;;  %v2958_v43 = vsel %vm2458_vm9, %v2956_v20, %v2957_v45  ;;  %v3197_v15 = vor.u32 %v3196_v42, %v3192_v51  ;;  %v6448_v45 = vld [vmem:[#allocation2 + $0x60] sm:$0xff]  }
 0x2b5   : > { %v4497_v3 = vpop.f32.mrf.mxu3  ;;  %v4413_v54 = vpop.f32.mrf.mxu2  ;;  %v3202_v26 = vsel %vm2201_vm6, %v3197_v15, %v3201_v1  ;;  %v3206_v1 = vshll.u32 %v6448_v45, 16 }
 0x2b6   : > { %v8147_v37 = vadd.f32 %v4497_v3, %v4409_v0  ;;  %v4414_v6 = vadd.f32 %v4413_v54, %v7881_v50  ;;  %v2817_v0 = vor.u32 %v2816_v27, %v2812_v55  ;;  %v3105_v3 = vunpack.c.l.b16 %v2031_v52  ;;  %v6079_v27 = vld [vmem:[#allocation11 + $0x200] sm:$0xff] }
 0x2b7   : > { %v2648_v50 = vunpack.c.l.b16 %v1973_v31  ;;  %4750 = vmatpush.bf16.msra.mxu2 %v6079_v27  ;;  %v1974_v27 = vld [vmem:[#allocation2 + $0xbc] sm:$0x1] }
 0x2b8   : > { %v4283_v63 = vpop.f32.mrf.mxu0  ;;  %v2822_v44 = vsel %vm2201_vm6, %v2817_v0, %v2821_v25  ;;  %v8163_v54 = vpack.c.b16 %v3105_v3, %v3105_v3  ;;  %v8173_v0 = vld [vmem:[#allocation2 + $0x6c] sm:$0xff]  }
 0x2b9   : > { %v4284_v39 = vadd.f32 %v4283_v63, %v7976_v17  ;;  %v4372_v23 = vpop.f32.mrf.mxu1  ;;  %4455 = vmatmul.bf16.gmra.mxu2 %v2822_v44  ;;  %v8161_v51 = vpack.c.b16 %v2648_v50, %v2648_v50 }
 0x2ba   : > { %4539 = vmatmul.bf16.gmra.mxu3 %v2958_v43  ;;  %v3211_v31 = vshll.u32 %v8163_v54, 16  ;;  %v3208_v43 = vrot.slane %v3206_v1, 1 }
 0x2bb   : > { %v8154_v59 = vadd.f32 %v4372_v23, %v4284_v39  ;;  %4598 = vmatmul.bf16.gmra.mxu0 %v8112_v35  ;;  %v2831_v63 = vshll.u32 %v8161_v51, 16  ;;  %v2960_v23 = vrot.slane %v8134_v8, 1 }
 0x2bc   : > { %4687 = vmatmul.bf16.gmra.mxu1 %v3202_v26  ;;  %v3204_v26 = vshrl.u32 %v6448_v45, 16  ;;  %v3213_v50 = vrot.slane %v3211_v31, 1 }
 0x2bd   : > { %v4500_v30 = vpop.f32.mrf.mxu3  ;;  %v4416_v42 = vpop.f32.mrf.mxu2  ;;  %v2833_v44 = vrot.slane %v2831_v63, 1 }
 0x2be   : > { %v8159_v17 = vadd.f32 %v4500_v30, %v4412_v56  ;;  %v4417_v20 = vadd.f32 %v4416_v42, %v7897_v13  ;;  %v6713_v56 = vor.u32 %v6712_v18, %v7886_v29  ;;  %v8175_v13 = vld [vmem:[#allocation2 + $0x6c] sm:$0xf0]  ;;  %v2032_v29 = vld [vmem:[#allocation2 + $0x74] sm:$0x1] }
 0x2bf   : > { %v2834_v1 = vsel %vm2201_vm6, %v7771_v53, %v2833_v44  ;;  %v2838_v53 = vshll.u32 %v7933_v33, 16 }
 0x2c0   : > { %v4285_v55 = vpop.f32.mrf.mxu0  ;;  %v2959_v3 = vrot.slane %v6713_v56, 1 }
 0x2c1   : > { %v4286_v35 = vadd.f32 %v4285_v55, %v7994_v57  ;;  %v4374_v25 = vpop.f32.mrf.mxu1 }
 0x2c2   : > { %v2961_v55 = vsel %vm2458_vm9, %v2959_v3, %v2960_v23 }
 0x2c3   : > { %v8167_v52 = vadd.f32 %v4374_v25, %v4286_v35  ;;  %v3209_v35 = vor.u32 %v3208_v43, %v3204_v26  ;;  %v6495_v26 = vld [vmem:[#allocation2 + $0xa8] sm:$0xf0] }
 0x2c5   : > { %v4502_v39 = vpop.f32.mrf.mxu3  ;;  %v4418_v57 = vpop.f32.mrf.mxu2  ;;  %v3214_v56 = vsel %vm2201_vm6, %v3209_v35, %v3213_v50  ;;  %v3218_v50 = vshll.u32 %v8173_v0, 16 }
 0x2c6   : > { %v8177_v15 = vadd.f32 %v4502_v39, %v4414_v6  ;;  %v8180_v30 = vadd.f32 %v4418_v57, %v7909_v47  ;;  %v3106_v6 = vunpack.c.l.b16 %v2032_v29  ;;  %v2649_v47 = vunpack.c.l.b16 %v1974_v27 }
 0x2c7   : > { %v3220_v35 = vrot.slane %v3218_v50, 1 }
 0x2c8   : > { %v4288_v18 = vpop.f32.mrf.mxu0  ;;  %v8191_v23 = vpack.c.b16 %v2649_v47, %v2649_v47  ;;  %v8193_v43 = vpack.c.b16 %v3106_v6, %v3106_v6  ;;  %v3216_v6 = vshrl.u32 %v8173_v0, 16 }
 0x2c9   : > { %v4289_v8 = vadd.f32 %v4288_v18, %v8004_v48  ;;  %v4377_v42 = vpop.f32.mrf.mxu1  ;;  %4460 = vmatmul.bf16.gmra.mxu2 %v2834_v1  ;;  %v6091_v48 = vld [vmem:[#allocation12 + $0x20] sm:$0xff] }
 0x2ca   : > { %4544 = vmatmul.bf16.gmra.mxu3 %v2961_v55  ;;  %v2843_v27 = vshll.u32 %v8191_v23, 16  ;;  %v2840_v55 = vrot.slane %v2838_v53, 1  ;;  %v3221_v50 = vor.u32 %v3220_v35, %v3216_v6  ;;  %v2850_v35 = vshll.u32 %v7968_v62, 16 }
 0x2cb   : > { %v8184_v25 = vadd.f32 %v4377_v42, %v4289_v8  ;;  %4603 = vmatmul.bf16.gmra.mxu0 %v6448_v45  ;;  %4951 = vmatpush.bf16.msra.mxu3 %v6091_v48  ;;  %v3223_v8 = vshll.u32 %v8193_v43, 16  ;;  %v2033_v48 = vld [vmem:[#allocation2 + $0x80] sm:$0x1] }
 0x2cc   : > { %4692 = vmatmul.bf16.gmra.mxu1 %v3214_v56  ;;  %v2836_v56 = vshrl.u32 %v7933_v33, 16  ;;  %v2845_v47 = vrot.slane %v2843_v27, 1 }
 0x2cd   : > { %v4505_v63 = vpop.f32.mrf.mxu3  ;;  %v4421_v39 = vpop.f32.mrf.mxu2 }
 0x2ce   : > { %v8189_v31 = vadd.f32 %v4505_v63, %v4417_v20  ;;  %v4422_v57 = vadd.f32 %v4421_v39, %v7919_v49  ;;  %v6496_v20 = vld [vmem:[#allocation2 + $0xa8] sm:$0xe]  ;;  %v2963_v49 = vrot.slane %v8161_v51, 1  ;;  %v3225_v63 = vrot.slane %v3223_v8, 1 }
 0x2cf   : > { %v6497_v18 = vor.u32 %v6496_v20, %v6495_v26  ;;  %v1975_v26 = vld [vmem:[#allocation2 + $0xc8] sm:$0x1]  ;;  %v2841_v53 = vor.u32 %v2840_v55, %v2836_v56  ;;  %v3107_v20 = vunpack.c.l.b16 %v2033_v48 }
 0x2d0   : > { %v4290_v3 = vpop.f32.mrf.mxu0  ;;  %v2650_v27 = vunpack.c.l.b16 %v1975_v26  ;;  %v2848_v26 = vshrl.u32 %v7968_v62, 16 }
 0x2d1   : > { %v4291_v45 = vadd.f32 %v4290_v3, %v8019_v14  ;;  %v4379_v44 = vpop.f32.mrf.mxu1  ;;  %v2962_v1 = vrot.slane %v6497_v18, 1  ;;  %v2846_v33 = vsel %vm2201_vm6, %v2841_v53, %v2845_v47  ;;  %v8220_v55 = vpack.c.b16 %v3107_v20, %v3107_v20  ;;  %v2011_v20 = vld [vmem:[#allocation2 + $0x84] sm:$0xff]  }
 0x2d3   : > { %v8199_v29 = vadd.f32 %v4379_v44, %v4291_v45  ;;  %v2964_v51 = vsel %vm2458_vm9, %v2962_v1, %v2963_v49  ;;  %v6449_v49 = vld [vmem:[#allocation2 + $0x78] sm:$0xff]   ;;  %v8223_v1 = vpack.c.b16 %v2650_v27, %v2650_v27 }
 0x2d4   : > { %v3230_v48 = vshll.u32 %v6449_v49, 16 }
 0x2d5   : > { %v8203_v42 = vpop.f32.mrf.mxu3  ;;  %v4423_v14 = vpop.f32.mrf.mxu2 }
 0x2d6   : > { %v8209_v39 = vadd.f32 %v4423_v14, %v7930_v28  ;;  %v3226_v28 = vsel %vm2201_vm6, %v3221_v50, %v3225_v63  ;;  %v3232_v50 = vrot.slane %v3230_v48, 1 }
 0x2d8   : > { %v4293_v3 = vpop.f32.mrf.mxu0 }
 0x2d9   : > { %v4294_v45 = vadd.f32 %v4293_v3, %v8033_v2  ;;  %v4382_v44 = vpop.f32.mrf.mxu1  ;;  %4465 = vmatmul.bf16.gmra.mxu2 %v2846_v33  ;;  %v6715_v2 = vld [vmem:[#allocation2 + $0xb4] sm:$0xe]  ;;  %v3228_v33 = vshrl.u32 %v6449_v49, 16 }
 0x2da   : > { %4549 = vmatmul.bf16.gmra.mxu3 %v2964_v51  ;;  %v6716_v3 = vor.u32 %v6715_v2, %v7935_v7  ;;  %v2855_v51 = vshll.u32 %v8223_v1, 16 }
 0x2db   : > { %v8213_v18 = vadd.f32 %v4382_v44, %v4294_v45  ;;  %4608 = vmatmul.bf16.gmra.mxu0 %v8173_v0  ;;  %v2852_v45 = vrot.slane %v2850_v35, 1 }
 0x2dc   : > { %4697 = vmatmul.bf16.gmra.mxu1 %v3226_v28  ;;  %v2965_v27 = vrot.slane %v6716_v3, 1 }
 0x2dd   : > { %v4510_v8 = vpop.f32.mrf.mxu3  ;;  %v4426_v6 = vpop.f32.mrf.mxu2  ;;  %v2853_v28 = vor.u32 %v2852_v45, %v2848_v26 }
 0x2de   : > { %v8218_v14 = vadd.f32 %v4510_v8, %v4422_v57  ;;  %v4427_v56 = vadd.f32 %v4426_v6, %v7946_v21  ;;  %v3235_v57 = vshll.u32 %v8220_v55, 16  ;;  %v2966_v21 = vrot.slane %v8191_v23, 1  ;;  %v2034_v6 = vld [vmem:[#allocation2 + $0x8c] sm:$0x1] }
 0x2df   : > { %v2857_v8 = vrot.slane %v2855_v51, 1  ;;  %v6498_v51 = vld [vmem:[#allocation2 + $0xc0] sm:$0xf0] }
 0x2e0   : > { %v4295_v0 = vpop.f32.mrf.mxu0  ;;  %v3237_v2 = vrot.slane %v3235_v57, 1  ;;  %v3108_v57 = vunpack.c.l.b16 %v2034_v6 }
 0x2e1   : > { %v4296_v47 = vadd.f32 %v4295_v0, %v8053_v12  ;;  %v4384_v63 = vpop.f32.mrf.mxu1  ;;  %v8236_v12 = vld [vmem:[#allocation2 + $0x84] sm:$0xf0]  ;;  %v2967_v0 = vsel %vm2458_vm9, %v2965_v27, %v2966_v21  ;;  %v2858_v26 = vsel %vm2201_vm6, %v2853_v28, %v2857_v8  ;;  %v6499_v21 = vld [vmem:[#allocation2 + $0xc0] sm:$0xe] }
 0x2e2   : > { %v8249_v27 = vpack.c.b16 %v3108_v57, %v3108_v57  ;;  %v6500_v8 = vor.u32 %v6499_v21, %v6498_v51  ;;  %v3240_v57 = vshrl.u32 %v2011_v20, 16  ;;  %v8656_v51 = vld [vmem:[#allocation34_spill] sm:$0xff] }
 0x2e3   : > { %v8230_v44 = vadd.f32 %v4384_v63, %v4296_v47  ;;  %v3233_v63 = vor.u32 %v3232_v50, %v3228_v33 }
 0x2e5   : > { %v8233_v53 = vpop.f32.mrf.mxu3  ;;  %v4428_v7 = vpop.f32.mrf.mxu2  ;;  %v3238_v3 = vsel %vm2201_vm6, %v3233_v63, %v3237_v2  ;;  %v3242_v2 = vshll.u32 %v2011_v20, 16  ;;  %v2969_v63 = vrot.slane %v8223_v1, 1 }
 0x2e6   : > { %v8239_v62 = vadd.f32 %v4428_v7, %v7958_v19  ;;  %v6090_v7 = vld [vmem:[#allocation12 + $0x18] sm:$0xff] }
 0x2e7   : > { %4952 = vmatpush.bf16.msra.mxu3 %v6090_v7 }
 0x2e8   : > { %v4574_v35 = vpop.f32.mrf.mxu0 }
 0x2e9   : > { %v4575_v47 = vadd.f32 %v4574_v35, %v8069_v22  ;;  %v4663_v23 = vpop.f32.mrf.mxu1  ;;  %4470 = vmatmul.bf16.gmra.mxu2 %v2858_v26  ;;  %v6501_v35 = vld [vmem:[#allocation2 + $0x18] sm:$0xf0]  ;;  %v3244_v26 = vrot.slane %v3242_v2, 1 }
 0x2ea   : > { %4554 = vmatmul.bf16.gmra.mxu3 %v2967_v0  ;;  %v6502_v0 = vld [vmem:[#allocation2 + $0x18] sm:$0xe] }
 0x2eb   : > { %v8243_v48 = vadd.f32 %v4663_v23, %v4575_v47  ;;  %4613 = vmatmul.bf16.gmra.mxu0 %v6449_v49  ;;  %v2968_v23 = vrot.slane %v6500_v8, 1  ;;  %v3245_v8 = vor.u32 %v3244_v26, %v3240_v57 }
 0x2ec   : > { %4702 = vmatmul.bf16.gmra.mxu1 %v3238_v3 }
 0x2ed   : > { %v4515_v19 = vpop.f32.mrf.mxu3  ;;  %v4431_v22 = vpop.f32.mrf.mxu2 }
 0x2ee   : > { %v8247_v45 = vadd.f32 %v4515_v19, %v4427_v56  ;;  %v4432_v50 = vadd.f32 %v4431_v22, %v7970_v4  ;;  %v3247_v56 = vshll.u32 %v8249_v27, 16  ;;  %v6503_v4 = vor.u32 %v6502_v0, %v6501_v35  ;;  %v2035_v22 = vld [vmem:[#allocation2 + $0x98] sm:$0x1] }
 0x2ef   : > { %v3109_v35 = vunpack.c.l.b16 %v2035_v22 }
 0x2f0   : > { %8655 = vst [vmem:[#allocation44_spill] sm:$0xff] %v8247_v45  ;;  %v4576_v33 = vpop.f32.mrf.mxu0  ;;  %v3249_v19 = vrot.slane %v3247_v56, 1  ;;  %v3387_v45 = vrot.slane %v6503_v4, 1 }
 0x2f1   : > { %v4577_v49 = vadd.f32 %v4576_v33, %v8084_v9  ;;  %v4665_v28 = vpop.f32.mrf.mxu1  ;;  %v3388_v9 = vrot.slane %v7980_v40, 1  ;;  %v2970_v33 = vsel %vm2458_vm9, %v2968_v23, %v2969_v63  ;;  %v6450_v23 = vld [vmem:[#allocation2 + $0x90] sm:$0xff]  }
 0x2f2   : > { %v3250_v2 = vsel %vm2201_vm6, %v3245_v8, %v3249_v19  ;;  %v3254_v19 = vshll.u32 %v6450_v23, 16  ;;  %v8658_v8 = vld [vmem:[#allocation30_spill] sm:$0xff] }
 0x2f3   : > { %v8253_v6 = vadd.f32 %v4665_v28, %v4577_v49  ;;  %v3389_v40 = vsel %vm2458_vm9, %v3387_v45, %v3388_v9 }
 0x2f5   : > { %v8256_v47 = vpop.f32.mrf.mxu3  ;;  %v4433_v3 = vpop.f32.mrf.mxu2 }
 0x2f6   : > { %v8261_v21 = vadd.f32 %v4433_v3, %v8656_v51  ;;  %v6718_v3 = vld [vmem:[#allocation2 + $0x24] sm:$0xe] }
 0x2f8   : > { %v4579_v7 = vpop.f32.mrf.mxu0 }
 0x2f9   : > { %v4580_v49 = vadd.f32 %v4579_v7, %v8096_v5  ;;  %v4668_v28 = vpop.f32.mrf.mxu1  ;;  %4751 = vmatmul.bf16.vlgmr.msra.gmra.mxu2 %v3389_v40  ;;  %v8271_v5 = vpack.c.b16 %v3109_v35, %v3109_v35  ;;  %v8657_v7 = vld [vmem:[#allocation35_spill] sm:$0xff] }
 0x2fa   : > { %4559 = vmatmul.bf16.gmra.mxu3 %v2970_v33  ;;  %v6719_v22 = vor.u32 %v6718_v3, %v8657_v7  ;;  %v6089_v7 = vld [vmem:[#allocation12 + $0x10] sm:$0xff] }
 0x2fb   : > { %v8265_v1 = vadd.f32 %v4668_v28, %v4580_v49  ;;  %4618 = vmatmul.bf16.gmra.mxu0 %v2011_v20  ;;  %v3259_v45 = vshll.u32 %v8271_v5, 16  ;;  %v3252_v49 = vshrl.u32 %v6450_v23, 16  ;;  %4953 = vmatpush.bf16.msra.mxu3 %v6089_v7 }
 0x2fc   : > { %4707 = vmatmul.bf16.gmra.mxu1 %v3250_v2  ;;  %v8659_v2 = vld [vmem:[#allocation36_spill] sm:$0xff] }
 0x2fd   : > { %v4520_v56 = vpop.f32.mrf.mxu3  ;;  %v4436_v63 = vpop.f32.mrf.mxu2  ;;  %v3261_v28 = vrot.slane %v3259_v45, 1 }
 0x2fe   : > { %v8269_v0 = vadd.f32 %v4520_v56, %v4432_v50  ;;  %v4437_v26 = vadd.f32 %v4436_v63, %v7998_v60  ;;  %v3256_v50 = vrot.slane %v3254_v19, 1  ;;  %v3391_v60 = vrot.slane %v8658_v8, 1  ;;  %v8662_v8 = vld [vmem:[#allocation37_spill] sm:$0xff] }
 0x300   : > { %v4581_v4 = vpop.f32.mrf.mxu0  ;;  %v3257_v63 = vor.u32 %v3256_v50, %v3252_v49  ;;  %v8663_v49 = vld [vmem:[#allocation39_spill] sm:$0xff] }
 0x301   : > { %v4582_v20 = vadd.f32 %v4581_v4, %v8116_v46  ;;  %v4670_v57 = vpop.f32.mrf.mxu1  ;;  %v3390_v4 = vrot.slane %v6719_v22, 1 }
 0x303   : > { %v8275_v51 = vadd.f32 %v4670_v57, %v4582_v20  ;;  %v3262_v57 = vsel %vm2201_vm6, %v3257_v63, %v3261_v28  ;;  %v3392_v3 = vsel %vm2458_vm9, %v3390_v4, %v3391_v60  ;;  %v3271_v60 = vshll.u32 %v8056_v36, 16 }
 0x305   : > { %v8278_v9 = vpop.f32.mrf.mxu3  ;;  %v4438_v33 = vpop.f32.mrf.mxu2 }
 0x306   : > { %v8283_v40 = vadd.f32 %v4438_v33, %v8659_v2 }
 0x308   : > { %8660 = vst [vmem:[#allocation34_spill] sm:$0xff] %v8283_v40  ;;  %v4584_v46 = vpop.f32.mrf.mxu0 }
 0x309   : > { %v4585_v35 = vadd.f32 %v4584_v46, %v8132_v41  ;;  %v4673_v56 = vpop.f32.mrf.mxu1  ;;  %4756 = vmatmul.bf16.gmra.mxu2 %v3392_v3  ;;  %v6504_v46 = vld [vmem:[#allocation2 + $0x30] sm:$0xf0]  ;;  %v3273_v3 = vrot.slane %v3271_v60, 1 }
 0x30b   : > { %v8286_v20 = vadd.f32 %v4673_v56, %v4585_v35  ;;  %4623 = vmatmul.bf16.gmra.mxu0 %v6450_v23  ;;  %v3266_v23 = vshll.u32 %v8663_v49, 16  ;;  %v6505_v35 = vld [vmem:[#allocation2 + $0x30] sm:$0xe] }
 0x30c   : > { %4712 = vmatmul.bf16.gmra.mxu1 %v3262_v57  ;;  %v6506_v63 = vor.u32 %v6505_v35, %v6504_v46  ;;  %v3264_v57 = vshrl.u32 %v8663_v49, 16 }
 0x30d   : > { %v4525_v19 = vpop.f32.mrf.mxu3  ;;  %v4441_v33 = vpop.f32.mrf.mxu2 }
 0x30e   : > { %v8290_v45 = vadd.f32 %v4525_v19, %v4437_v26  ;;  %v4442_v2 = vadd.f32 %v4441_v33, %v8662_v8  ;;  %v3268_v26 = vrot.slane %v3266_v23, 1  ;;  %v8664_v19 = vld [vmem:[#allocation38_spill] sm:$0xff] }
 0x30f   : > { %v3394_v7 = vrot.slane %v8664_v19, 1  ;;  %v6451_v19 = vld [vmem:[#allocation2 + $0xa8] sm:$0xff]  }
 0x310   : > { %8661 = vst [vmem:[#allocation35_spill] sm:$0xff] %v8290_v45  ;;  %v4586_v41 = vpop.f32.mrf.mxu0  ;;  %v3269_v36 = vor.u32 %v3268_v26, %v3264_v57  ;;  %v3393_v45 = vrot.slane %v6506_v63, 1  ;;  %v6721_v57 = vld [vmem:[#allocation2 + $0x3c] sm:$0xe] }
 0x311   : > { %v4587_v50 = vadd.f32 %v4586_v41, %v8147_v37  ;;  %v4675_v22 = vpop.f32.mrf.mxu1  ;;  %v8665_v37 = vld [vmem:[#allocation40_spill] sm:$0xff]  ;;  %v2037_v41 = vld [vmem:[#allocation2 + $0xb0] sm:$0x1] }
 0x312   : > { %v3274_v23 = vsel %vm2201_vm6, %v3269_v36, %v3273_v3  ;;  %v3395_v46 = vsel %vm2458_vm9, %v3393_v45, %v3394_v7  ;;  %v3111_v60 = vunpack.c.l.b16 %v2037_v41  ;;  %v8666_v41 = vld [vmem:[#allocation33_spill] sm:$0xff] }
 0x313   : > { %v8295_v28 = vadd.f32 %v4675_v22, %v4587_v50 }
 0x315   : > { %v8298_v56 = vpop.f32.mrf.mxu3  ;;  %v4443_v4 = vpop.f32.mrf.mxu2 }
 0x316   : > { %v8303_v33 = vadd.f32 %v4443_v4, %v8665_v37 }
 0x318   : > { %v4589_v8 = vpop.f32.mrf.mxu0 }
 0x319   : > { %v4590_v50 = vadd.f32 %v4589_v8, %v8159_v17  ;;  %v4678_v22 = vpop.f32.mrf.mxu1  ;;  %4761 = vmatmul.bf16.gmra.mxu2 %v3395_v46  ;;  %v8313_v17 = vpack.c.b16 %v3111_v60, %v3111_v60  ;;  %v3278_v8 = vshll.u32 %v6451_v19, 16 }
 0x31b   : > { %v8306_v40 = vadd.f32 %v4678_v22, %v4590_v50  ;;  %4628 = vmatmul.bf16.gmra.mxu0 %v8663_v49  ;;  %v3283_v45 = vshll.u32 %v8313_v17, 16  ;;  %v6722_v22 = vor.u32 %v6721_v57, %v8666_v41  ;;  %v6088_v57 = vld [vmem:[#allocation12 + $0x8] sm:$0xff] }
 0x31c   : > { %4717 = vmatmul.bf16.gmra.mxu1 %v3274_v23  ;;  %v3276_v23 = vshrl.u32 %v6451_v19, 16  ;;  %4954 = vmatpush.bf16.msra.mxu3 %v6088_v57 }
 0x31d   : > { %v4530_v35 = vpop.f32.mrf.mxu3  ;;  %v4446_v37 = vpop.f32.mrf.mxu2  ;;  %v3285_v46 = vrot.slane %v3283_v45, 1 }
 0x31e   : > { %v8311_v4 = vadd.f32 %v4530_v35, %v4442_v2  ;;  %v4447_v26 = vadd.f32 %v4446_v37, %v8061_v32  ;;  %v3280_v2 = vrot.slane %v3278_v8, 1  ;;  %v3397_v32 = vrot.slane %v8073_v24, 1 }
 0x31f   : > { %v3396_v35 = vrot.slane %v6722_v22, 1  ;;  %v3290_v24 = vshll.u32 %v8102_v10, 16 }
 0x320   : > { %v4591_v63 = vpop.f32.mrf.mxu0 }
 0x321   : > { %v4592_v49 = vadd.f32 %v4591_v63, %v8177_v15  ;;  %v4680_v3 = vpop.f32.mrf.mxu1  ;;  %v3281_v15 = vor.u32 %v3280_v2, %v3276_v23  ;;  %v3398_v63 = vsel %vm2458_vm9, %v3396_v35, %v3397_v32  ;;  %v3295_v2 = vshll.u32 %v8119_v11, 16  ;;  %v8668_v32 = vld [vmem:[#allocation41_spill] sm:$0xff]  ;;  %v8669_v35 = vld [vmem:[#allocation42_spill] sm:$0xff] }
 0x322   : > { %v3292_v22 = vrot.slane %v3290_v24, 1  ;;  %v6452_v24 = vld [vmem:[#allocation2 + $0xc0] sm:$0xff]  }
 0x323   : > { %v8317_v50 = vadd.f32 %v4680_v3, %v4592_v49  ;;  %v3286_v37 = vsel %vm2201_vm6, %v3281_v15, %v3285_v46  ;;  %v3288_v46 = vshrl.u32 %v8102_v10, 16  ;;  %v3400_v15 = vrot.slane %v8668_v32, 1  ;;  %v1753_v32 = vld [vmem:[#allocation2 + $0xd4] sm:$0x1] }
 0x325   : > { %v8320_v7 = vpop.f32.mrf.mxu3  ;;  %v4448_v36 = vpop.f32.mrf.mxu2 }
 0x326   : > { %v8325_v60 = vadd.f32 %v4448_v36, %v8079_v58  ;;  %v6507_v58 = vld [vmem:[#allocation2 + $0x48] sm:$0xf0] }
 0x329   : > { %4766 = vmatmul.bf16.gmra.mxu2 %v3398_v63  ;;  %v3293_v63 = vor.u32 %v3292_v22, %v3288_v46  ;;  %v1754_v46 = vsel %vm7256_vm2, 0, %v1753_v32 }
 0x32a   : > { %1755 = vst [vmem:[#allocation2 + $0xd4] sm:$0x1] %v1754_v46 }
 0x32b   : > { %4633 = vmatmul.bf16.gmra.mxu0 %v6451_v19  ;;  %v6508_v19 = vld [vmem:[#allocation2 + $0x48] sm:$0xe] }
 0x32c   : > { %4722 = vmatmul.bf16.gmra.mxu1 %v3286_v37  ;;  %v6509_v36 = vor.u32 %v6508_v19, %v6507_v58  ;;  %v1749_v19 = vld [vmem:[#allocation2 + $0xcc] sm:$0xf] }
 0x32d   : > { %v4535_v49 = vpop.f32.mrf.mxu3  ;;  %v4451_v3 = vpop.f32.mrf.mxu2 }
 0x32e   : > { %v8329_v8 = vadd.f32 %v4535_v49, %v4447_v26  ;;  %v4452_v45 = vadd.f32 %v4451_v3, %v8091_v34  ;;  %v3297_v26 = vrot.slane %v3295_v2, 1  ;;  %v2039_v34 = vld [vmem:[#allocation2 + $0xc8] sm:$0x1]  ;;  %v3399_v49 = vrot.slane %v6509_v36, 1 }
 0x32f   : > { %v3113_v3 = vunpack.c.l.b16 %v2039_v34  ;;  %v3300_v34 = vshrl.u32 %v6452_v24, 16 }
 0x330   : > { %8667 = vst [vmem:[#allocation30_spill] sm:$0xff] %v8329_v8  ;;  %v3298_v11 = vsel %vm2201_vm6, %v3293_v63, %v3297_v26  ;;  %v3401_v57 = vsel %vm2458_vm9, %v3399_v49, %v3400_v15  ;;  %v6724_v15 = vld [vmem:[#allocation2 + $0x54] sm:$0xe] }
 0x335   : > { %v8334_v41 = vpop.f32.mrf.mxu3  ;;  %v4453_v23 = vpop.f32.mrf.mxu2 }
 0x336   : > { %v8339_v37 = vadd.f32 %v4453_v23, %v8669_v35  ;;  %v3302_v35 = vshll.u32 %v6452_v24, 16 }
 0x338   : > { %8670 = vst [vmem:[#allocation36_spill] sm:$0xff] %v8339_v37  ;;  %v8346_v37 = vpack.c.b16 %v3113_v3, %v3113_v3 }
 0x339   : > { %4771 = vmatmul.bf16.gmra.mxu2 %v3401_v57 }
 0x33a   : > { %v3307_v63 = vshll.u32 %v8346_v37, 16 }
 0x33b   : > { %4638 = vmatmul.bf16.gmra.mxu0 %v8102_v10  ;;  %v1750_v10 = vsel %vm7262_vm5, 0, %v1749_v19  ;;  %v3403_v19 = vrot.slane %v8136_v61, 1 }
 0x33c   : > { %4727 = vmatmul.bf16.gmra.mxu1 %v3298_v11  ;;  %1751 = vst [vmem:[#allocation2 + $0xcc] sm:$0xf] %v1750_v10  ;;  %v8674_v11 = vld [vmem:[#allocation43_spill] sm:$0xff] }
 0x33d   : > { %v4540_v58 = vpop.f32.mrf.mxu3  ;;  %v4456_v23 = vpop.f32.mrf.mxu2  ;;  %v6725_v57 = vor.u32 %v6724_v15, %v8674_v11  ;;  %v6510_v11 = vld [vmem:[#allocation2 + $0x60] sm:$0xf0] }
 0x33e   : > { %v8344_v2 = vadd.f32 %v4540_v58, %v4452_v45  ;;  %v4457_v26 = vadd.f32 %v4456_v23, %v8124_v16  ;;  %v3304_v45 = vrot.slane %v3302_v35, 1  ;;  %v1861_v23 = vld [vmem:[#allocation2 + $0xd4] sm:$0xf] }
 0x33f   : > { %v3402_v35 = vrot.slane %v6725_v57, 1  ;;  %v1862_v10 = vsel %vm7262_vm5, 0, %v1861_v23  ;;  %v6511_v57 = vld [vmem:[#allocation2 + $0x60] sm:$0xe] }
 0x340   : > { %8671 = vst [vmem:[#allocation37_spill] sm:$0xff] %v8344_v2  ;;  %v3305_v58 = vor.u32 %v3304_v45, %v3300_v34  ;;  %v3309_v2 = vrot.slane %v3307_v63, 1  ;;  %v6087_v34 = vld [vmem:[#allocation12] sm:$0xff]  ;;  %v8370_v63 = vld [vmem:[#allocation2 + $0xcc] sm:$0xf0] }
 0x341   : > { %1863 = vst [vmem:[#allocation2 + $0xd4] sm:$0xf] %v1862_v10  ;;  %v3404_v15 = vsel %vm2458_vm9, %v3402_v35, %v3403_v19  ;;  %4955 = vmatpush.bf16.msra.mxu3 %v6087_v34  ;;  %v6512_v19 = vor.u32 %v6511_v57, %v6510_v11  ;;  %v6727_v57 = vld [vmem:[#allocation2 + $0x6c] sm:$0xe] }
 0x342   : > { %v3310_v46 = vsel %vm2201_vm6, %v3305_v58, %v3309_v2 }
 0x343   : > { %v1807_v8 = vld [vmem:[#allocation2 + $0xcc] sm:$0x1] }
 0x344   : > { %v1808_v16 = vsel %vm7256_vm2, 0, %v1807_v8 }
 0x345   : > { %v8354_v49 = vpop.f32.mrf.mxu3  ;;  %v4458_v3 = vpop.f32.mrf.mxu2  ;;  %1809 = vst [vmem:[#allocation2 + $0xcc] sm:$0x1] %v1808_v16 }
 0x346   : > { %v8359_v32 = vadd.f32 %v4458_v3, %v8142_v38 }
 0x348   : > { %v2040_v22 = vld [vmem:[#allocation2 + $0xd4] sm:$0x1] }
 0x349   : > { %4776 = vmatmul.bf16.gmra.mxu2 %v3404_v15  ;;  %v3405_v15 = vrot.slane %v6512_v19, 1 }
 0x34b   : > { %4643 = vmatmul.bf16.gmra.mxu0 %v6452_v24  ;;  %v3114_v24 = vunpack.c.l.b16 %v2040_v22 }
 0x34c   : > { %4732 = vmatmul.bf16.gmra.mxu1 %v3310_v46  ;;  %v2023_v45 = vld [vmem:[#allocation2 + $0xcc] sm:$0xff]  }
 0x34d   : > { %v4545_v61 = vpop.f32.mrf.mxu3  ;;  %v4461_v36 = vpop.f32.mrf.mxu2  ;;  %v8372_v2 = vpack.c.b16 %v3114_v24, %v3114_v24  ;;  %v3314_v58 = vshll.u32 %v2023_v45, 16 }
 0x34e   : > { %v8367_v38 = vadd.f32 %v4545_v61, %v4457_v26  ;;  %v4462_v8 = vadd.f32 %v4461_v36, %v8154_v59  ;;  %v3312_v26 = vshrl.u32 %v2023_v45, 16  ;;  %v3406_v59 = vrot.slane %v8163_v54, 1 }
 0x34f   : > { %v3319_v16 = vshll.u32 %v8372_v2, 16  ;;  %v3316_v35 = vrot.slane %v3314_v58, 1 }
 0x350   : > { %v3407_v34 = vsel %vm2458_vm9, %v3405_v15, %v3406_v59  ;;  %v6514_v15 = vld [vmem:[#allocation2 + $0x78] sm:$0xe] }
 0x351   : > { %v3321_v46 = vrot.slane %v3319_v16, 1  ;;  %v3317_v61 = vor.u32 %v3316_v35, %v3312_v26 }
 0x353   : > { %v3322_v36 = vsel %vm2201_vm6, %v3317_v61, %v3321_v46  ;;  %v6513_v46 = vld [vmem:[#allocation2 + $0x78] sm:$0xf0] }
 0x355   : > { %v8374_v3 = vpop.f32.mrf.mxu3  ;;  %v4463_v23 = vpop.f32.mrf.mxu2 }
 0x356   : > { %v8379_v10 = vadd.f32 %v4463_v23, %v8167_v52  ;;  %v6728_v52 = vor.u32 %v6727_v57, %v8175_v13  ;;  %v6515_v13 = vor.u32 %v6514_v15, %v6513_v46 }
 0x358   : > { %v3408_v16 = vrot.slane %v6728_v52, 1 }
 0x359   : > { %4781 = vmatmul.bf16.gmra.mxu2 %v3407_v34 }
 0x35b   : > { %4648 = vmatmul.bf16.gmra.mxu0 %v2023_v45  ;;  %v3409_v45 = vrot.slane %v8193_v43, 1  ;;  %v3412_v43 = vrot.slane %v8220_v55, 1 }
 0x35c   : > { %4737 = vmatmul.bf16.gmra.mxu1 %v3322_v36  ;;  %v3411_v36 = vrot.slane %v6515_v13, 1 }
 0x35d   : > { %v4550_v22 = vpop.f32.mrf.mxu3  ;;  %v4466_v24 = vpop.f32.mrf.mxu2  ;;  %v3410_v23 = vsel %vm2458_vm9, %v3408_v16, %v3409_v45  ;;  %v3415_v16 = vrot.slane %v8249_v27, 1 }
 0x35e   : > { %v8383_v11 = vadd.f32 %v4550_v22, %v4462_v8  ;;  %v4467_v54 = vadd.f32 %v4466_v24, %v8184_v25  ;;  %v3413_v22 = vsel %vm2458_vm9, %v3411_v36, %v3412_v43  ;;  %v6517_v43 = vld [vmem:[#allocation2 + $0x90] sm:$0xe] }
 0x365   : > { %v8386_v58 = vpop.f32.mrf.mxu3  ;;  %v4468_v19 = vpop.f32.mrf.mxu2 }
 0x366   : > { %v8391_v26 = vadd.f32 %v4468_v19, %v8199_v29 }
 0x369   : > { %4786 = vmatmul.bf16.gmra.mxu2 %v3410_v23 }
 0x36d   : > { %v4555_v8 = vpop.f32.mrf.mxu3  ;;  %v4471_v35 = vpop.f32.mrf.mxu2 }
 0x36e   : > { %v8394_v59 = vadd.f32 %v4555_v8, %v4467_v54  ;;  %v4472_v25 = vadd.f32 %v4471_v35, %v8213_v18  ;;  %v6730_v18 = vld [vmem:[#allocation2 + $0x84] sm:$0xe] }
 0x36f   : > { %v6731_v52 = vor.u32 %v6730_v18, %v8236_v12 }
 0x371   : > { %v3414_v23 = vrot.slane %v6731_v52, 1 }
 0x373   : > { %v3416_v46 = vsel %vm2458_vm9, %v3414_v23, %v3415_v16 }
 0x375   : > { %v8397_v61 = vpop.f32.mrf.mxu3  ;;  %v4473_v34 = vpop.f32.mrf.mxu2 }
 0x376   : > { %v8401_v29 = vadd.f32 %v4473_v34, %v8230_v44  ;;  %v4594_v44 = vpop.f32.mrf.mxu0  ;;  %v6516_v34 = vld [vmem:[#allocation2 + $0x90] sm:$0xf0] }
 0x379   : > { %4791 = vmatmul.bf16.gmra.mxu2 %v3413_v22 }
 0x37d   : > { %v4560_v24 = vpop.f32.mrf.mxu3  ;;  %v4752_v57 = vpop.f32.mrf.mxu2 }
 0x37e   : > { %v8404_v54 = vadd.f32 %v4560_v24, %v4472_v25  ;;  %v4753_v19 = vadd.f32 %v4752_v57, %v8243_v48  ;;  %v4683_v25 = vpop.f32.mrf.mxu1  ;;  %v4596_v12 = vpop.f32.mrf.mxu0  ;;  %v6518_v48 = vor.u32 %v6517_v43, %v6516_v34 }
 0x380   : > { %v4832_v8 = vmax.f32 %v4753_v19, 0.0  ;;  %v3417_v57 = vrot.slane %v6518_v48, 1 }
 0x385   : > { %v4754_v45 = vpop.f32.mrf.mxu2 }
 0x386   : > { %v4755_v55 = vadd.f32 %v4754_v45, %v8253_v6  ;;  %v3418_v6 = vrot.slane %v8271_v5, 1  ;;  %v4685_v24 = vpop.f32.mrf.mxu1  ;;  %v4599_v16 = vpop.f32.mrf.mxu0 }
 0x388   : > { %v4833_v35 = vmax.f32 %v4755_v55, 0.0  ;;  %v3419_v19 = vsel %vm2458_vm9, %v3417_v57, %v3418_v6 }
 0x389   : > { %4796 = vmatmul.bf16.gmra.mxu2 %v3416_v46 }
 0x38a   : > { %v4864_v15 = vpack.c.bf16 %v4833_v35, %v4832_v8 }
 0x38c   : > { %4956 = vmatmul.bf16.vlgmr.msra.gmra.mxu3 %v4864_v15  ;;  %v8675_v15 = vld [vmem:[#allocation31_spill] sm:$0xff] }
 0x38d   : > { %v4757_v13 = vpop.f32.mrf.mxu2 }
 0x38e   : > { %v4758_v36 = vadd.f32 %v4757_v13, %v8265_v1  ;;  %v4688_v23 = vpop.f32.mrf.mxu1  ;;  %v4601_v1 = vpop.f32.mrf.mxu0 }
 0x390   : > { %v4834_v18 = vmax.f32 %v4758_v36, 0.0  ;;  %v6519_v36 = vld [vmem:[#allocation2 + $0xa8] sm:$0xf0] }
 0x395   : > { %v4759_v27 = vpop.f32.mrf.mxu2 }
 0x396   : > { %v4760_v22 = vadd.f32 %v4759_v27, %v8275_v51  ;;  %v4690_v34 = vpop.f32.mrf.mxu1  ;;  %v4604_v48 = vpop.f32.mrf.mxu0  ;;  %v6520_v27 = vld [vmem:[#allocation2 + $0xa8] sm:$0xe] }
 0x397   : > { %v6521_v6 = vor.u32 %v6520_v27, %v6519_v36 }
 0x398   : > { %v4835_v52 = vmax.f32 %v4760_v22, 0.0 }
 0x399   : > { %4801 = vmatmul.bf16.gmra.mxu2 %v3419_v19 }
 0x39a   : > { %v4865_v45 = vpack.c.bf16 %v4835_v52, %v4834_v18  ;;  %v3424_v18 = vrot.slane %v8313_v17, 1  ;;  %v3423_v52 = vrot.slane %v6521_v6, 1 }
 0x39c   : > { %4961 = vmatmul.bf16.gmra.mxu3 %v4865_v45 }
 0x39d   : > { %v4762_v55 = vpop.f32.mrf.mxu2 }
 0x39e   : > { %v4763_v8 = vadd.f32 %v4762_v55, %v8286_v20  ;;  %v4693_v57 = vpop.f32.mrf.mxu1  ;;  %v4606_v55 = vpop.f32.mrf.mxu0 }
 0x3a0   : > { %v4836_v46 = vmax.f32 %v4763_v8, 0.0  ;;  %v3425_v8 = vsel %vm2458_vm9, %v3423_v52, %v3424_v18 }
 0x3a5   : > { %v4764_v35 = vpop.f32.mrf.mxu2 }
 0x3a6   : > { %v4765_v5 = vadd.f32 %v4764_v35, %v8295_v28 }
 0x3a8   : > { %v4837_v51 = vmax.f32 %v4765_v5, 0.0 }
 0x3a9   : > { %4806 = vmatmul.bf16.gmra.mxu2 %v8675_v15 }
 0x3aa   : > { %v4866_v13 = vpack.c.bf16 %v4837_v51, %v4836_v46  ;;  %v4508_v46 = vadd.f32 %v8203_v42, %v8180_v30  ;;  %v4695_v51 = vpop.f32.mrf.mxu1  ;;  %v4513_v30 = vadd.f32 %v8233_v53, %v8209_v39  ;;  %v6522_v42 = vld [vmem:[#allocation2 + $0xc0] sm:$0xf0] }
 0x3ac   : > { %4966 = vmatmul.bf16.gmra.mxu3 %v4866_v13  ;;  %v4597_v15 = vadd.f32 %v4596_v12, %v4508_v46  ;;  %v4609_v13 = vpop.f32.mrf.mxu0 }
 0x3ad   : > { %v4767_v43 = vpop.f32.mrf.mxu2 }
 0x3ae   : > { %v4768_v22 = vadd.f32 %v4767_v43, %v8306_v40  ;;  %v4595_v40 = vadd.f32 %v4594_v44, %v8189_v31  ;;  %v4600_v31 = vadd.f32 %v4599_v16, %v8218_v14  ;;  %v6523_v44 = vld [vmem:[#allocation2 + $0xc0] sm:$0xe] }
 0x3af   : > { %v6524_v12 = vor.u32 %v6523_v44, %v6522_v42 }
 0x3b0   : > { %v4838_v19 = vmax.f32 %v4768_v22, 0.0  ;;  %v4684_v17 = vadd.f32 %v4683_v25, %v4595_v40  ;;  %v4602_v25 = vadd.f32 %v4601_v1, %v4513_v30  ;;  %v3430_v40 = vrot.slane %v8346_v37, 1  ;;  %v8677_v1 = vld [vmem:[#allocation44_spill] sm:$0xff] }
 0x3b1   : > { %v3429_v46 = vrot.slane %v6524_v12, 1 }
 0x3b3   : > { %v3431_v39 = vsel %vm2458_vm9, %v3429_v46, %v3430_v40 }
 0x3b4   : > { %v4611_v52 = vpop.f32.mrf.mxu0 }
 0x3b5   : > { %v4769_v20 = vpop.f32.mrf.mxu2 }
 0x3b6   : > { %v4770_v28 = vadd.f32 %v4769_v20, %v8317_v50  ;;  %v4686_v50 = vadd.f32 %v4685_v24, %v4597_v15  ;;  %v4698_v20 = vpop.f32.mrf.mxu1  ;;  %v4689_v24 = vadd.f32 %v4688_v23, %v4600_v31  ;;  %v4518_v23 = vadd.f32 %v8256_v47, %v8239_v62 }
 0x3b8   : > { %v4839_v45 = vmax.f32 %v4770_v28, 0.0  ;;  %v8676_v28 = vld [vmem:[#allocation32_spill] sm:$0xff]  ;;  %v4607_v37 = vadd.f32 %v4606_v55, %v4518_v23 }
 0x3b9   : > { %4811 = vmatmul.bf16.gmra.mxu2 %v3425_v8  ;;  %v4691_v8 = vadd.f32 %v4690_v34, %v4602_v25  ;;  %v4605_v34 = vadd.f32 %v4604_v48, %v8677_v1  ;;  %v4523_v48 = vadd.f32 %v8278_v9, %v8261_v21  ;;  %v8679_v21 = vld [vmem:[#allocation35_spill] sm:$0xff] }
 0x3ba   : > { %v4867_v35 = vpack.c.bf16 %v4839_v45, %v4838_v19 }
 0x3bc   : > { %4971 = vmatmul.bf16.gmra.mxu3 %v4867_v35 }
 0x3bd   : > { %v4772_v5 = vpop.f32.mrf.mxu2 }
 0x3be   : > { %v4773_v43 = vadd.f32 %v4772_v5, %v4684_v17  ;;  %v4700_v45 = vpop.f32.mrf.mxu1  ;;  %v4614_v17 = vpop.f32.mrf.mxu0 }
 0x3bf   : > { %v4615_v9 = vadd.f32 %v4614_v17, %v8679_v21 }
 0x3c0   : > { %v4840_v6 = vmax.f32 %v4773_v43, 0.0 }
 0x3c5   : > { %v4774_v36 = vpop.f32.mrf.mxu2 }
 0x3c6   : > { %v4775_v27 = vadd.f32 %v4774_v36, %v4686_v50  ;;  %v6733_v36 = vld [vmem:[#allocation2 + $0xcc] sm:$0xe]  ;;  %v4703_v53 = vpop.f32.mrf.mxu1 }
 0x3c8   : > { %v4841_v22 = vmax.f32 %v4775_v27, 0.0  ;;  %v6734_v27 = vor.u32 %v6733_v36, %v8370_v63 }
 0x3c9   : > { %4816 = vmatmul.bf16.gmra.mxu2 %v8676_v28  ;;  %v3433_v28 = vrot.slane %v8372_v2, 1  ;;  %v4612_v2 = vadd.f32 %v4611_v52, %v4523_v48  ;;  %v4704_v52 = vadd.f32 %v4703_v53, %v4615_v9 }
 0x3ca   : > { %v4868_v18 = vpack.c.bf16 %v4841_v22, %v4840_v6  ;;  %v4616_v6 = vpop.f32.mrf.mxu0  ;;  %v4694_v22 = vadd.f32 %v4693_v57, %v4605_v34  ;;  %v4610_v57 = vadd.f32 %v4609_v13, %v8269_v0 }
 0x3cc   : > { %4976 = vmatmul.bf16.gmra.mxu3 %v4868_v18  ;;  %v3432_v18 = vrot.slane %v6734_v27, 1  ;;  %v8443_v27 = vpop.f32.mrf.mxu3 }
 0x3cd   : > { %v4777_v19 = vpop.f32.mrf.mxu2 }
 0x3ce   : > { %v4778_v35 = vadd.f32 %v4777_v19, %v4689_v24  ;;  %v4696_v19 = vadd.f32 %v4695_v51, %v4607_v37  ;;  %v4705_v44 = vpop.f32.mrf.mxu1  ;;  %v3434_v25 = vsel %vm2458_vm9, %v3432_v18, %v3433_v28  ;;  %v4699_v51 = vadd.f32 %v4698_v20, %v4610_v57 }
 0x3d0   : > { %v4842_v50 = vmax.f32 %v4778_v35, 0.0 }
 0x3d2   : > { %v4619_v47 = vpop.f32.mrf.mxu0 }
 0x3d3   : > { %v4620_v17 = vadd.f32 %v4619_v47, %v8311_v4 }
 0x3d5   : > { %v4779_v5 = vpop.f32.mrf.mxu2 }
 0x3d6   : > { %v4780_v15 = vadd.f32 %v4779_v5, %v4691_v8  ;;  %v4708_v55 = vpop.f32.mrf.mxu1  ;;  %v4701_v8 = vadd.f32 %v4700_v45, %v4612_v2 }
 0x3d8   : > { %v4843_v43 = vmax.f32 %v4780_v15, 0.0 }
 0x3d9   : > { %4821 = vmatmul.bf16.gmra.mxu2 %v3431_v39 }
 0x3da   : > { %v4869_v14 = vpack.c.bf16 %v4843_v43, %v4842_v50  ;;  %v4621_v5 = vpop.f32.mrf.mxu0 }
 0x3dc   : > { %4981 = vmatmul.bf16.gmra.mxu3 %v4869_v14  ;;  %v8678_v14 = vld [vmem:[#allocation34_spill] sm:$0xff] }
 0x3dd   : > { %v4782_v16 = vpop.f32.mrf.mxu2 }
 0x3de   : > { %v4783_v30 = vadd.f32 %v4782_v16, %v4694_v22  ;;  %v4710_v36 = vpop.f32.mrf.mxu1  ;;  %v4528_v16 = vadd.f32 %v8298_v56, %v8678_v14  ;;  %v4533_v56 = vadd.f32 %v8320_v7, %v8303_v33 }
 0x3e0   : > { %v4844_v12 = vmax.f32 %v4783_v30, 0.0  ;;  %v4617_v13 = vadd.f32 %v4616_v6, %v4528_v16  ;;  %v4622_v30 = vadd.f32 %v4621_v5, %v4533_v56 }
 0x3e2   : > { %v4624_v0 = vpop.f32.mrf.mxu0  ;;  %v4706_v20 = vadd.f32 %v4705_v44, %v4617_v13  ;;  %v6525_v13 = vld [vmem:[%s7294_s17 + $0x8] sm:$0xff]  }
 0x3e5   : > { %v4784_v31 = vpop.f32.mrf.mxu2 }
 0x3e6   : > { %v4785_v42 = vadd.f32 %v4784_v31, %v4696_v19  ;;  %v4713_v23 = vpop.f32.mrf.mxu1  ;;  %v8451_v31 = vld [vmem:[%s8582_s8] ss:$0 sm:$0xff] }
 0x3e8   : > { %v4845_v24 = vmax.f32 %v4785_v42, 0.0  ;;  %v4709_v42 = vadd.f32 %v4708_v55, %v4620_v17 }
 0x3e9   : > { %4826 = vmatmul.bf16.gmra.mxu2 %v3434_v25  ;;  %v6273_v25 = vld [vmem:[%s7294_s17] sm:$0xff]  }
 0x3ea   : > { %v4870_v62 = vpack.c.bf16 %v4845_v24, %v4844_v12  ;;  %v4626_v18 = vpop.f32.mrf.mxu0  ;;  %v4711_v12 = vadd.f32 %v4710_v36, %v4622_v30  ;;  %v6274_v48 = vunpack.c.l.bf16 %v6273_v25  ;;  %v6275_v4 = vunpack.c.h.bf16 %v6273_v25 }
 0x3ec   : > { %4986 = vmatmul.bf16.gmra.mxu3 %v4870_v62 }
 0x3ed   : > { %v4787_v63 = vpop.f32.mrf.mxu2 }
 0x3ee   : > { %v4788_v35 = vadd.f32 %v4787_v63, %v4699_v51  ;;  %v4715_v53 = vpop.f32.mrf.mxu1 }
 0x3f0   : > { %v4846_v15 = vmax.f32 %v4788_v35, 0.0 }
 0x3f2   : > { %v4629_v44 = vpop.f32.mrf.mxu0 }
 0x3f5   : > { %v4789_v46 = vpop.f32.mrf.mxu2 }
 0x3f6   : > { %v4790_v40 = vadd.f32 %v4789_v46, %v4701_v8  ;;  %v4718_v8 = vpop.f32.mrf.mxu1 }
 0x3f8   : > { %v4847_v50 = vmax.f32 %v4790_v40, 0.0 }
 0x3fa   : > { %v4871_v43 = vpack.c.bf16 %v4847_v50, %v4846_v15  ;;  %v4631_v40 = vpop.f32.mrf.mxu0  ;;  %v4538_v50 = vadd.f32 %v8334_v41, %v8325_v60 }
 0x3fc   : > { %4991 = vmatmul.bf16.gmra.mxu3 %v4871_v43  ;;  %v8680_v43 = vld [vmem:[#allocation30_spill] sm:$0xff]  ;;  %v4627_v16 = vadd.f32 %v4626_v18, %v4538_v50 }
 0x3fd   : > { %v4792_v39 = vpop.f32.mrf.mxu2  ;;  %v4625_v36 = vadd.f32 %v4624_v0, %v8680_v43 }
 0x3fe   : > { %v4793_v45 = vadd.f32 %v4792_v39, %v4704_v52  ;;  %v4720_v9 = vpop.f32.mrf.mxu1  ;;  %v4716_v52 = vadd.f32 %v4715_v53, %v4627_v16 }
 0x3ff   : > { %v4714_v21 = vadd.f32 %v4713_v23, %v4625_v36 }
 0x400   : > { %v4848_v37 = vmax.f32 %v4793_v45, 0.0 }
 0x405   : > { %v4794_v1 = vpop.f32.mrf.mxu2 }
 0x406   : > { %v4795_v34 = vadd.f32 %v4794_v1, %v4706_v20 }
 0x408   : > { %v4849_v22 = vmax.f32 %v4795_v34, 0.0  ;;  %v6278_v34 = vunpack.c.l.bf16 %v6525_v13 }
 0x40a   : > { %v4872_v28 = vpack.c.bf16 %v4849_v22, %v4848_v37  ;;  %v4634_v22 = vpop.f32.mrf.mxu0 }
 0x40c   : > { %4996 = vmatmul.bf16.gmra.mxu3 %v4872_v28 }
 0x40d   : > { %v4797_v19 = vpop.f32.mrf.mxu2 }
 0x40e   : > { %v4798_v24 = vadd.f32 %v4797_v19, %v4709_v42  ;;  %v6279_v19 = vunpack.c.h.bf16 %v6525_v13  ;;  %v8681_v42 = vld [vmem:[#allocation36_spill] sm:$0xff] }
 0x40f   : > { %v4957_v6 = vpop.f32.mrf.mxu3  ;;  %v4543_v25 = vadd.f32 %v8354_v49, %v8681_v42 }
 0x410   : > { %v4958_v62 = vadd.f32 %v8451_v31, %v4957_v6  ;;  %v4850_v47 = vmax.f32 %v4798_v24, 0.0  ;;  %v4723_v6 = vpop.f32.mrf.mxu1 }
 0x412   : > { %v5101_v57 = vadd.f32 %v6274_v48, %v4958_v62  ;;  %v4632_v48 = vadd.f32 %v4631_v40, %v4543_v25 }
 0x414   : > { %v5133_v5 = vmax.f32 %v5101_v57, 0.0 }
 0x415   : > { %v4799_v63 = vpop.f32.mrf.mxu2 }
 0x416   : > { %v4800_v33 = vadd.f32 %v4799_v63, %v4711_v12  ;;  %v8682_v12 = vld [vmem:[#allocation37_spill] sm:$0xff] }
 0x417   : > { %v4959_v7 = vpop.f32.mrf.mxu3  ;;  %v4630_v24 = vadd.f32 %v4629_v44, %v8682_v12  ;;  %v4553_v12 = vadd.f32 %v8386_v58, %v8379_v10 }
 0x418   : > { %v4851_v2 = vmax.f32 %v4800_v33, 0.0  ;;  %v4960_v51 = vadd.f32 %v8451_v31, %v4959_v7  ;;  %v4636_v33 = vpop.f32.mrf.mxu0 }
 0x419   : > { %v4719_v7 = vadd.f32 %v4718_v8, %v4630_v24 }
 0x41a   : > { %v4873_v55 = vpack.c.bf16 %v4851_v2, %v4850_v47  ;;  %v5102_v35 = vadd.f32 %v6275_v4, %v4960_v51  ;;  %v6526_v4 = vld [vmem:[%s7294_s17 + $0x10] sm:$0xff]   ;;  %v4721_v47 = vadd.f32 %v4720_v9, %v4632_v48  ;;  %v4635_v9 = vadd.f32 %v4634_v22, %v8367_v38 }
 0x41c   : > { %v5134_v46 = vmax.f32 %v5102_v35, 0.0  ;;  %5001 = vmatmul.bf16.gmra.mxu3 %v4873_v55  ;;  %v6282_v55 = vunpack.c.l.bf16 %v6526_v4 }
 0x41d   : > { %v4802_v15 = vpop.f32.mrf.mxu2 }
 0x41e   : > { %v6339_v39 = vpack.c.bf16 %v5134_v46, %v5133_v5  ;;  %v4803_v20 = vadd.f32 %v4802_v15, %v4714_v21  ;;  %v4725_v5 = vpop.f32.mrf.mxu1  ;;  %v6283_v15 = vunpack.c.h.bf16 %v6526_v4  ;;  %v4548_v21 = vadd.f32 %v8374_v3, %v8359_v32  ;;  %v6528_v4 = vld [vmem:[%s7294_s17 + $0x20] sm:$0xff]  }
 0x41f   : > { %v4962_v14 = vpop.f32.mrf.mxu3 }
 0x420   : > { %6340 = vst [vmem:[%s7294_s17] sm:$0xff] %v6339_v39   ;;  %v4963_v45 = vadd.f32 %v8451_v31, %v4962_v14  ;;  %v4852_v60 = vmax.f32 %v4803_v20, 0.0  ;;  %v4639_v36 = vpop.f32.mrf.mxu0  ;;  %v4637_v20 = vadd.f32 %v4636_v33, %v4548_v21 }
 0x421   : > { %v4640_v24 = vadd.f32 %v4639_v36, %v8383_v11 }
 0x422   : > { %v5103_v41 = vadd.f32 %v6278_v34, %v4963_v45  ;;  %v6527_v34 = vld [vmem:[%s7294_s17 + $0x18] sm:$0xff]  }
 0x424   : > { %v5135_v17 = vmax.f32 %v5103_v41, 0.0 }
 0x425   : > { %v4804_v1 = vpop.f32.mrf.mxu2 }
 0x426   : > { %v4805_v37 = vadd.f32 %v4804_v1, %v4716_v52  ;;  %v4728_v45 = vpop.f32.mrf.mxu1  ;;  %v4724_v1 = vadd.f32 %v4723_v6, %v4635_v9 }
 0x427   : > { %v4964_v28 = vpop.f32.mrf.mxu3 }
 0x428   : > { %v4853_v0 = vmax.f32 %v4805_v37, 0.0  ;;  %v4965_v18 = vadd.f32 %v8451_v31, %v4964_v28  ;;  %v4726_v37 = vadd.f32 %v4725_v5, %v4637_v20 }
 0x42a   : > { %v4874_v23 = vpack.c.bf16 %v4853_v0, %v4852_v60  ;;  %v5104_v56 = vadd.f32 %v6279_v19, %v4965_v18  ;;  %v4641_v60 = vpop.f32.mrf.mxu0  ;;  %v6286_v0 = vunpack.c.l.bf16 %v6527_v34 }
 0x42b   : > { %v4642_v33 = vadd.f32 %v4641_v60, %v4553_v12 }
 0x42c   : > { %v5136_v53 = vmax.f32 %v5104_v56, 0.0  ;;  %5006 = vmatmul.bf16.gmra.mxu3 %v4874_v23  ;;  %v6287_v56 = vunpack.c.h.bf16 %v6527_v34 }
 0x42d   : > { %v4807_v30 = vpop.f32.mrf.mxu2 }
 0x42e   : > { %v6344_v62 = vpack.c.bf16 %v5136_v53, %v5135_v17  ;;  %v4808_v57 = vadd.f32 %v4807_v30, %v4719_v7  ;;  %v4730_v6 = vpop.f32.mrf.mxu1  ;;  %v4729_v7 = vadd.f32 %v4728_v45, %v4640_v24  ;;  %v6529_v45 = vld [vmem:[%s7294_s17 + $0x28] sm:$0xff]  }
 0x42f   : > { %v4967_v63 = vpop.f32.mrf.mxu3 }
 0x430   : > { %6540 = vst [vmem:[%s7294_s17 + $0x8] sm:$0xff] %v6344_v62   ;;  %v4968_v2 = vadd.f32 %v8451_v31, %v4967_v63  ;;  %v4854_v49 = vmax.f32 %v4808_v57, 0.0 }
 0x432   : > { %v5105_v44 = vadd.f32 %v6282_v55, %v4968_v2  ;;  %v4644_v63 = vpop.f32.mrf.mxu0 }
 0x434   : > { %v5137_v39 = vmax.f32 %v5105_v44, 0.0 }
 0x435   : > { %v4809_v51 = vpop.f32.mrf.mxu2 }
 0x436   : > { %v4810_v35 = vadd.f32 %v4809_v51, %v4721_v47  ;;  %v4731_v47 = vadd.f32 %v4730_v6, %v4642_v33  ;;  %v4733_v51 = vpop.f32.mrf.mxu1 }
 0x437   : > { %v4969_v46 = vpop.f32.mrf.mxu3 }
 0x438   : > { %v4855_v50 = vmax.f32 %v4810_v35, 0.0  ;;  %v4970_v40 = vadd.f32 %v8451_v31, %v4969_v46  ;;  %v6290_v35 = vunpack.c.l.bf16 %v6528_v4 }
 0x43a   : > { %v4875_v43 = vpack.c.bf16 %v4855_v50, %v4854_v49  ;;  %v5106_v8 = vadd.f32 %v6283_v15, %v4970_v40  ;;  %v6291_v15 = vunpack.c.h.bf16 %v6528_v4  ;;  %v4646_v44 = vpop.f32.mrf.mxu0 }
 0x43c   : > { %v5138_v14 = vmax.f32 %v5106_v8, 0.0  ;;  %5011 = vmatmul.bf16.gmra.mxu3 %v4875_v43 }
 0x43d   : > { %v4812_v16 = vpop.f32.mrf.mxu2 }
 0x43e   : > { %v6349_v13 = vpack.c.bf16 %v5138_v14, %v5137_v39  ;;  %v4813_v28 = vadd.f32 %v4812_v16, %v4724_v1  ;;  %v4558_v39 = vadd.f32 %v8397_v61, %v8391_v26  ;;  %v4645_v14 = vadd.f32 %v4644_v63, %v8394_v59  ;;  %v4735_v21 = vpop.f32.mrf.mxu1 }
 0x43f   : > { %v4972_v52 = vpop.f32.mrf.mxu3  ;;  %v6295_v26 = vunpack.c.h.bf16 %v6529_v45 }
 0x440   : > { %6541 = vst [vmem:[%s7294_s17 + $0x10] sm:$0xff] %v6349_v13   ;;  %v4973_v19 = vadd.f32 %v8451_v31, %v4972_v52  ;;  %v4856_v32 = vmax.f32 %v4813_v28, 0.0  ;;  %v4647_v13 = vadd.f32 %v4646_v44, %v4558_v39  ;;  %v4734_v52 = vadd.f32 %v4733_v51, %v4645_v14 }
 0x442   : > { %v5107_v3 = vadd.f32 %v6286_v0, %v4973_v19  ;;  %v4649_v20 = vpop.f32.mrf.mxu0  ;;  %v4736_v1 = vadd.f32 %v4735_v21, %v4647_v13  ;;  %v6294_v19 = vunpack.c.l.bf16 %v6529_v45  ;;  %v6532_v21 = vld [vmem:[%s7294_s17 + $0x40] sm:$0xff]  }
 0x443   : > { %v4650_v6 = vadd.f32 %v4649_v20, %v8404_v54  ;;  %v6306_v13 = vunpack.c.l.bf16 %v6532_v21 }
 0x444   : > { %v5139_v30 = vmax.f32 %v5107_v3, 0.0 }
 0x445   : > { %v4814_v41 = vpop.f32.mrf.mxu2 }
 0x446   : > { %v4815_v18 = vadd.f32 %v4814_v41, %v4726_v37  ;;  %v4738_v41 = vpop.f32.mrf.mxu1 }
 0x447   : > { %v4974_v23 = vpop.f32.mrf.mxu3  ;;  %v4739_v24 = vadd.f32 %v4738_v41, %v4650_v6  ;;  %v6533_v41 = vld [vmem:[%s7294_s17 + $0x48] sm:$0xff]  }
 0x448   : > { %v4857_v38 = vmax.f32 %v4815_v18, 0.0  ;;  %v4975_v22 = vadd.f32 %v8451_v31, %v4974_v23 }
 0x44a   : > { %v4876_v17 = vpack.c.bf16 %v4857_v38, %v4856_v32  ;;  %v5108_v53 = vadd.f32 %v6287_v56, %v4975_v22  ;;  %v4651_v22 = vpop.f32.mrf.mxu0 }
 0x44c   : > { %v5140_v42 = vmax.f32 %v5108_v53, 0.0  ;;  %5016 = vmatmul.bf16.gmra.mxu3 %v4876_v17  ;;  %v4563_v53 = vadd.f32 %v8443_v27, %v8401_v29 }
 0x44d   : > { %v4817_v25 = vpop.f32.mrf.mxu2 }
 0x44e   : > { %v6354_v62 = vpack.c.bf16 %v5140_v42, %v5139_v30  ;;  %v4818_v57 = vadd.f32 %v4817_v25, %v4729_v7  ;;  %v4652_v25 = vadd.f32 %v4651_v22, %v4563_v53  ;;  %v4740_v12 = vpop.f32.mrf.mxu1 }
 0x44f   : > { %v4977_v48 = vpop.f32.mrf.mxu3 }
 0x450   : > { %6542 = vst [vmem:[%s7294_s17 + $0x18] sm:$0xff] %v6354_v62   ;;  %v4978_v2 = vadd.f32 %v8451_v31, %v4977_v48  ;;  %v4858_v10 = vmax.f32 %v4818_v57, 0.0  ;;  %v6530_v62 = vld [vmem:[%s7294_s17 + $0x30] sm:$0xff]   ;;  %v4741_v63 = vadd.f32 %v4740_v12, %v4652_v25 }
 0x451   : > { %v6298_v4 = vunpack.c.l.bf16 %v6530_v62  ;;  %v6299_v29 = vunpack.c.h.bf16 %v6530_v62 }
 0x452   : > { %v5109_v58 = vadd.f32 %v6290_v35, %v4978_v2 }
 0x454   : > { %v5141_v43 = vmax.f32 %v5109_v58, 0.0  ;;  %v6531_v58 = vld [vmem:[%s7294_s17 + $0x38] sm:$0xff]  }
 0x455   : > { %v4819_v55 = vpop.f32.mrf.mxu2 }
 0x456   : > { %v4820_v5 = vadd.f32 %v4819_v55, %v4731_v47 }
 0x457   : > { %v4979_v46 = vpop.f32.mrf.mxu3 }
 0x458   : > { %v4859_v11 = vmax.f32 %v4820_v5, 0.0  ;;  %v4980_v49 = vadd.f32 %v8451_v31, %v4979_v46 }
 0x45a   : > { %v4877_v50 = vpack.c.bf16 %v4859_v11, %v4858_v10  ;;  %v5110_v40 = vadd.f32 %v6291_v15, %v4980_v49  ;;  %v6302_v49 = vunpack.c.l.bf16 %v6531_v58 }
 0x45c   : > { %v5142_v8 = vmax.f32 %v5110_v40, 0.0  ;;  %5021 = vmatmul.bf16.gmra.mxu3 %v4877_v50 }
 0x45d   : > { %v4822_v36 = vpop.f32.mrf.mxu2 }
 0x45e   : > { %v6359_v16 = vpack.c.bf16 %v5142_v8, %v5141_v43  ;;  %v4823_v34 = vadd.f32 %v4822_v36, %v4734_v52  ;;  %v6303_v43 = vunpack.c.h.bf16 %v6531_v58 }
 0x45f   : > { %v4982_v9 = vpop.f32.mrf.mxu3 }
 0x460   : > { %6543 = vst [vmem:[%s7294_s17 + $0x20] sm:$0xff] %v6359_v16   ;;  %v4983_v37 = vadd.f32 %v8451_v31, %v4982_v9  ;;  %v4860_v61 = vmax.f32 %v4823_v34, 0.0 }
 0x462   : > { %v5111_v59 = vadd.f32 %v6294_v19, %v4983_v37 }
 0x464   : > { %v5143_v3 = vmax.f32 %v5111_v59, 0.0 }
 0x465   : > { %v4824_v28 = vpop.f32.mrf.mxu2 }
 0x466   : > { %v4825_v60 = vadd.f32 %v4824_v28, %v4736_v1  ;;  %v6307_v1 = vunpack.c.h.bf16 %v6532_v21 }
 0x467   : > { %v4984_v0 = vpop.f32.mrf.mxu3 }
 0x468   : > { %v4861_v18 = vmax.f32 %v4825_v60, 0.0  ;;  %v4985_v23 = vadd.f32 %v8451_v31, %v4984_v0 }
 0x46a   : > { %v4878_v56 = vpack.c.bf16 %v4861_v18, %v4860_v61  ;;  %v5112_v32 = vadd.f32 %v6295_v26, %v4985_v23  ;;  %v6310_v26 = vunpack.c.l.bf16 %v6533_v41  ;;  %v6311_v23 = vunpack.c.h.bf16 %v6533_v41 }
 0x46c   : > { %v5144_v38 = vmax.f32 %v5112_v32, 0.0  ;;  %5026 = vmatmul.bf16.gmra.mxu3 %v4878_v56 }
 0x46d   : > { %v4827_v17 = vpop.f32.mrf.mxu2 }
 0x46e   : > { %v6364_v30 = vpack.c.bf16 %v5144_v38, %v5143_v3  ;;  %v4828_v48 = vadd.f32 %v4827_v17, %v4739_v24  ;;  %v6534_v17 = vld [vmem:[%s7294_s17 + $0x50] sm:$0xff]  }
 0x46f   : > { %v4987_v42 = vpop.f32.mrf.mxu3  ;;  %v6314_v6 = vunpack.c.l.bf16 %v6534_v17  ;;  %v6315_v12 = vunpack.c.h.bf16 %v6534_v17 }
 0x470   : > { %6544 = vst [vmem:[%s7294_s17 + $0x28] sm:$0xff] %v6364_v30   ;;  %v4988_v33 = vadd.f32 %v8451_v31, %v4987_v42  ;;  %v4862_v27 = vmax.f32 %v4828_v48, 0.0 }
 0x472   : > { %v5113_v54 = vadd.f32 %v6298_v4, %v4988_v33 }
 0x474   : > { %v5145_v5 = vmax.f32 %v5113_v54, 0.0 }
 0x475   : > { %v4829_v7 = vpop.f32.mrf.mxu2 }
 0x476   : > { %v4830_v47 = vadd.f32 %v4829_v7, %v4741_v63  ;;  %v6535_v7 = vld [vmem:[%s7294_s17 + $0x58] sm:$0xff]  }
 0x477   : > { %v4989_v57 = vpop.f32.mrf.mxu3  ;;  %v6319_v54 = vunpack.c.h.bf16 %v6535_v7 }
 0x478   : > { %v4863_v2 = vmax.f32 %v4830_v47, 0.0  ;;  %v4990_v51 = vadd.f32 %v8451_v31, %v4989_v57  ;;  %v6318_v47 = vunpack.c.l.bf16 %v6535_v7 }
 0x47a   : > { %v4879_v55 = vpack.c.bf16 %v4863_v2, %v4862_v27  ;;  %v5114_v35 = vadd.f32 %v6299_v29, %v4990_v51 }
 0x47c   : > { %v5146_v46 = vmax.f32 %v5114_v35, 0.0  ;;  %5031 = vmatmul.bf16.gmra.mxu3 %v4879_v55 }
 0x47e   : > { %v6369_v15 = vpack.c.bf16 %v5146_v46, %v5145_v5  ;;  %v6536_v46 = vld [vmem:[%s7294_s17 + $0x60] sm:$0xff]  }
 0x47f   : > { %v4992_v10 = vpop.f32.mrf.mxu3 }
 0x480   : > { %6545 = vst [vmem:[%s7294_s17 + $0x30] sm:$0xff] %v6369_v15   ;;  %v4993_v11 = vadd.f32 %v8451_v31, %v4992_v10  ;;  %v6322_v10 = vunpack.c.l.bf16 %v6536_v46 }
 0x482   : > { %v5115_v50 = vadd.f32 %v6302_v49, %v4993_v11 }
 0x484   : > { %v5147_v36 = vmax.f32 %v5115_v50, 0.0 }
 0x487   : > { %v4994_v44 = vpop.f32.mrf.mxu3 }
 0x488   : > { %v4995_v40 = vadd.f32 %v8451_v31, %v4994_v44  ;;  %v6323_v44 = vunpack.c.h.bf16 %v6536_v46 }
 0x48a   : > { %v5116_v8 = vadd.f32 %v6303_v43, %v4995_v40 }
 0x48c   : > { %v5148_v39 = vmax.f32 %v5116_v8, 0.0 }
 0x48e   : > { %v6374_v14 = vpack.c.bf16 %v5148_v39, %v5147_v36  ;;  %v6537_v39 = vld [vmem:[%s7294_s17 + $0x68] sm:$0xff]  }
 0x48f   : > { %v4997_v16 = vpop.f32.mrf.mxu3 }
 0x490   : > { %6546 = vst [vmem:[%s7294_s17 + $0x38] sm:$0xff] %v6374_v14   ;;  %v4998_v9 = vadd.f32 %v8451_v31, %v4997_v16  ;;  %v6326_v16 = vunpack.c.l.bf16 %v6537_v39 }
 0x492   : > { %v5117_v20 = vadd.f32 %v6306_v13, %v4998_v9 }
 0x494   : > { %v5149_v37 = vmax.f32 %v5117_v20, 0.0 }
 0x497   : > { %v4999_v52 = vpop.f32.mrf.mxu3 }
 0x498   : > { %v5000_v45 = vadd.f32 %v8451_v31, %v4999_v52  ;;  %v6327_v52 = vunpack.c.h.bf16 %v6537_v39 }
 0x49a   : > { %v5118_v34 = vadd.f32 %v6307_v1, %v5000_v45 }
 0x49c   : > { %v5150_v28 = vmax.f32 %v5118_v34, 0.0 }
 0x49e   : > { %v6379_v19 = vpack.c.bf16 %v5150_v28, %v5149_v37  ;;  %v6538_v28 = vld [vmem:[%s7294_s17 + $0x70] sm:$0xff]  }
 0x49f   : > { %v5002_v60 = vpop.f32.mrf.mxu3 }
 0x4a0   : > { %6547 = vst [vmem:[%s7294_s17 + $0x40] sm:$0xff] %v6379_v19   ;;  %v5003_v0 = vadd.f32 %v8451_v31, %v5002_v60  ;;  %v6330_v60 = vunpack.c.l.bf16 %v6538_v28 }
 0x4a2   : > { %v5119_v59 = vadd.f32 %v6310_v26, %v5003_v0 }
 0x4a4   : > { %v5151_v32 = vmax.f32 %v5119_v59, 0.0 }
 0x4a7   : > { %v5004_v61 = vpop.f32.mrf.mxu3 }
 0x4a8   : > { %v5005_v18 = vadd.f32 %v8451_v31, %v5004_v61  ;;  %v6331_v61 = vunpack.c.h.bf16 %v6538_v28 }
 0x4aa   : > { %v5120_v56 = vadd.f32 %v6311_v23, %v5005_v18 }
 0x4ac   : > { %v5152_v3 = vmax.f32 %v5120_v56, 0.0 }
 0x4ae   : > { %v6384_v38 = vpack.c.bf16 %v5152_v3, %v5151_v32  ;;  %v6539_v3 = vld [vmem:[%s7294_s17 + $0x78] sm:$0xff]  }
 0x4af   : > { %v5007_v22 = vpop.f32.mrf.mxu3 }
 0x4b0   : > { %6548 = vst [vmem:[%s7294_s17 + $0x48] sm:$0xff] %v6384_v38   ;;  %v5008_v53 = vadd.f32 %v8451_v31, %v5007_v22  ;;  %v6334_v22 = vunpack.c.l.bf16 %v6539_v3 }
 0x4b2   : > { %v5121_v42 = vadd.f32 %v6314_v6, %v5008_v53 }
 0x4b4   : > { %v5153_v62 = vmax.f32 %v5121_v42, 0.0 }
 0x4b7   : > { %v5009_v30 = vpop.f32.mrf.mxu3 }
 0x4b8   : > { %v5010_v25 = vadd.f32 %v8451_v31, %v5009_v30  ;;  %v6335_v30 = vunpack.c.h.bf16 %v6539_v3 }
 0x4ba   : > { %v5122_v24 = vadd.f32 %v6315_v12, %v5010_v25 }
 0x4bc   : > { %v5154_v63 = vmax.f32 %v5122_v24, 0.0 }
 0x4be   : > { %v6389_v48 = vpack.c.bf16 %v5154_v63, %v5153_v62 }
 0x4bf   : > { %v5012_v33 = vpop.f32.mrf.mxu3 }
 0x4c0   : > { %6549 = vst [vmem:[%s7294_s17 + $0x50] sm:$0xff] %v6389_v48   ;;  %v5013_v4 = vadd.f32 %v8451_v31, %v5012_v33 }
 0x4c2   : > { %v5123_v29 = vadd.f32 %v6318_v47, %v5013_v4 }
 0x4c4   : > { %v5155_v51 = vmax.f32 %v5123_v29, 0.0 }
 0x4c7   : > { %v5014_v57 = vpop.f32.mrf.mxu3 }
 0x4c8   : > { %v5015_v27 = vadd.f32 %v8451_v31, %v5014_v57 }
 0x4ca   : > { %v5124_v2 = vadd.f32 %v6319_v54, %v5015_v27 }
 0x4cc   : > { %v5156_v55 = vmax.f32 %v5124_v2, 0.0 }
 0x4ce   : > { %v6394_v35 = vpack.c.bf16 %v5156_v55, %v5155_v51 }
 0x4cf   : > { %v5017_v5 = vpop.f32.mrf.mxu3 }
 0x4d0   : > { %6550 = vst [vmem:[%s7294_s17 + $0x58] sm:$0xff] %v6394_v35   ;;  %v5018_v15 = vadd.f32 %v8451_v31, %v5017_v5 }
 0x4d2   : > { %v5125_v11 = vadd.f32 %v6322_v10, %v5018_v15 }
 0x4d4   : > { %v5157_v40 = vmax.f32 %v5125_v11, 0.0 }
 0x4d7   : > { %v5019_v58 = vpop.f32.mrf.mxu3 }
 0x4d8   : > { %v5020_v49 = vadd.f32 %v8451_v31, %v5019_v58 }
 0x4da   : > { %v5126_v50 = vadd.f32 %v6323_v44, %v5020_v49 }
 0x4dc   : > { %v5158_v43 = vmax.f32 %v5126_v50, 0.0 }
 0x4de   : > { %v6399_v8 = vpack.c.bf16 %v5158_v43, %v5157_v40 }
 0x4df   : > { %v5022_v36 = vpop.f32.mrf.mxu3 }
 0x4e0   : > { %6551 = vst [vmem:[%s7294_s17 + $0x60] sm:$0xff] %v6399_v8   ;;  %v5023_v14 = vadd.f32 %v8451_v31, %v5022_v36 }
 0x4e2   : > { %v5127_v9 = vadd.f32 %v6326_v16, %v5023_v14 }
 0x4e4   : > { %v5159_v45 = vmax.f32 %v5127_v9, 0.0 }
 0x4e7   : > { %v5024_v21 = vpop.f32.mrf.mxu3 }
 0x4e8   : > { %v5025_v13 = vadd.f32 %v8451_v31, %v5024_v21 }
 0x4ea   : > { %v5128_v20 = vadd.f32 %v6327_v52, %v5025_v13 }
 0x4ec   : > { %v5160_v1 = vmax.f32 %v5128_v20, 0.0 }
 0x4ee   : > { %v6404_v34 = vpack.c.bf16 %v5160_v1, %v5159_v45 }
 0x4ef   : > { %v5027_v37 = vpop.f32.mrf.mxu3 }
 0x4f0   : > { %6552 = vst [vmem:[%s7294_s17 + $0x68] sm:$0xff] %v6404_v34   ;;  %v5028_v19 = vadd.f32 %v8451_v31, %v5027_v37 }
 0x4f2   : > { %v5129_v0 = vadd.f32 %v6330_v60, %v5028_v19 }
 0x4f4   : > { %v5161_v18 = vmax.f32 %v5129_v0, 0.0 }
 0x4f7   : > { %v5029_v41 = vpop.f32.mrf.mxu3 }
 0x4f8   : > { %v5030_v26 = vadd.f32 %v8451_v31, %v5029_v41 }
 0x4fa   : > { %v5130_v59 = vadd.f32 %v6331_v61, %v5030_v26 }
 0x4fc   : > { %v5162_v23 = vmax.f32 %v5130_v59, 0.0 }
 0x4fe   : > { %v6409_v56 = vpack.c.bf16 %v5162_v23, %v5161_v18 }
 0x4ff   : > { %v5032_v32 = vpop.f32.mrf.mxu3 }
 0x500   : > { %6553 = vst [vmem:[%s7294_s17 + $0x70] sm:$0xff] %v6409_v56   ;;  %v5033_v38 = vadd.f32 %v8451_v31, %v5032_v32 }
 0x502   : > { %v5131_v53 = vadd.f32 %v6334_v22, %v5033_v38 }
 0x504   : > { %v5163_v25 = vmax.f32 %v5131_v53, 0.0 }
 0x507   : > { %v5034_v17 = vpop.f32.mrf.mxu3 }
 0x508   : > { %v5035_v6 = vadd.f32 %v8451_v31, %v5034_v17 }
 0x50a   : > { %v5132_v42 = vadd.f32 %v6335_v30, %v5035_v6 }
 0x50c   : > { %v5164_v12 = vmax.f32 %v5132_v42, 0.0 }
 0x50e   : > { %v6414_v24 = vpack.c.bf16 %v5164_v12, %v5163_v25 }
 0x510   : > { %6554 = vst [vmem:[%s7294_s17 + $0x78] sm:$0xff] %v6414_v24  }
 0x511   : > { %6942 = shalt.err (!%p6939_p12)
}
 0x512   : > { %s7025_s25 = smov 64   ;;  %s7026_s17 = smov 4  }
 0x513   : > { %6573 = dma.vmem_to_hbm [thread:$0]  (%p7154_p5), %s5246_s18, 2048, %s5248_s28, %s5230_s11, %s7025_s25, %s7025_s25, %s7026_s17  }
 0x514 PF: > { %s8686_s21 = sld [smem:[#allocation20_spill]] }
 0x515   : > { %s8688_s1 = sld [smem:[#allocation23_spill]] }
 0x51a   : > { %s5262_s2 = sand.u32 1, %s8686_s21  }
 0x51b   : > { %p8689_p13 = scmp.ge.s32.totalorder %s8688_s1, 2  ;;  %s5263_s30 = scalar_lea.sflag [#allocation5], %s5262_s2 }
 0x51d   : > { %p6596_p0 = pnand %p8689_p13, %p7122_p6 }
 0x51f   : > { %p6597_p3 = pneg %p6596_p0 }
 0x521   : > { %6984 = dma.done.wait (%p6597_p3), %s5263_s30, 2048  }
 0x522   : > { %6986 = vsyncadd (%p6597_p3), %s5263_s30, 4294965248  ;;  %s30_s14 = sadd.s32 1, %s8688_s1   ;;  %s8690_s9 = sld [smem:[#allocation21_spill]] }
 0x523   : > { %p27_p7 = scmp.ge.s32.totalorder %s30_s14, 4   ;;  %s8691_s11 = sld [smem:[#allocation27_spill]] }
 0x524   : > { %s8692_s27 = sld [smem:[#allocation25_spill]]  ;;  %s8693_s30 = smov %s6999_s10 }
 0x525   : > { %s8695_s12 = smov %s7011_s13 }
 0x526   :  { %29 = sbr.rel (!%p27_p7) target bundleno = 15 (0xf), region = 157 }
 0x528   : > { %s8694_s10 = smov %s8690_s9 }
 0x52a   : > { %s8696_s13 = smov %s8692_s27 }
 0x52b   :  { %5269 = vsyncpa [#allocation4], 1 }
 0x52c   :  { %5271 = vsyncpa [#allocation4 + $0x1], 1 }
 0x52d   :  { %5272 = vsyncpa [#allocation7], 1 }
 0x52e   :  { %5274 = vsyncpa [#allocation7 + $0x1], 1 }
 0x52f   :  { %5275 = vsyncpa [#allocation10], 1 }
 0x530   :  { %5276 = vsyncpa [#allocation13], 1 }
 0x531   :  { %5277 = vsyncpa [#allocation5], 1 }
 0x532   :  { %5279 = vsyncpa [#allocation5 + $0x1], 1 }

</bundles_post_ra>
